<compile_context>
chip_gen: v7x
topology: tpu7x:2x2x1
jax: 0.10.0
libtpu: 0.0.40
codegen_flags: <defaults>
</compile_context>

<pallas_src>
import jax
import jax.numpy as jnp
from jax.experimental import pallas as pl
from jax.experimental.pallas import tpu as pltpu


VMEM_LIMIT = 48 * 1024 * 1024


# ----------------------------- tiling helper ------------------------------- #

def _pick_tile(dim, pref, align):
    """Largest divisor of `dim` that is <= pref and a multiple of `align`;
    falls back to the full dim (always a legal TPU block)."""
    if dim <= pref:
        return dim
    start = pref - pref % align
    for t in range(start, 0, -align):
        if dim % t == 0:
            return t
    return dim


# ----------------------------- tiled linear -------------------------------- #

def _linear_kernel(x_ref, w_ref, b_ref, o_ref):
    o_ref[...] = (jnp.dot(x_ref[...].astype(jnp.bfloat16), w_ref[...],
                          preferred_element_type=jnp.float32) + b_ref[...])


def linear(x, w, b, *, tm_pref=512, tn_pref=512):
    """x (M,K) f32 @ w (K,N) bf16 + b (N,) f32 -> (M,N) f32, lane-dense tiles."""
    M, K = x.shape
    N = w.shape[1]
    tm = _pick_tile(M, tm_pref, 16)
    tn = _pick_tile(N, tn_pref, 128)
    # Grid ordered (N tiles, M tiles) so the weight tile stays resident while the
    # row axis sweeps (M is the fastest-varying axis).
    return pl.pallas_call(
        _linear_kernel,
        out_shape=jax.ShapeDtypeStruct((M, N), jnp.float32),
        grid=(N // tn, M // tm),
        in_specs=[pl.BlockSpec((tm, K), lambda j, i: (i, 0)),
                  pl.BlockSpec((K, tn), lambda j, i: (0, j)),
                  pl.BlockSpec((1, tn), lambda j, i: (0, j))],
        out_specs=pl.BlockSpec((tm, tn), lambda j, i: (i, j)),
        compiler_params=pltpu.CompilerParams(
            dimension_semantics=("parallel", "parallel"),
            vmem_limit_bytes=VMEM_LIMIT),
    )(x, w, b.reshape(1, N))


# -------------------- fused char-CNN + highway + projection ---------------- #

def _make_char_cnn_kernel(filters, num_highways):
    n_conv = len(filters)

    def kernel(*refs):
        emb_ref = refs[0]
        conv_w = refs[1:1 + n_conv]
        conv_b = refs[1 + n_conv:1 + 2 * n_conv]
        idx = 1 + 2 * n_conv
        hw_refs = refs[idx:idx + 4 * num_highways]
        idx += 4 * num_highways
        pw_ref, pb_ref, o_ref = refs[idx], refs[idx + 1], refs[idx + 2]

        n, t_len, c_dim = emb_ref.shape
        emb = emb_ref[...]                                     # (n, T, C) bf16

        pooled = []
        for (k, out_ch), w_ref, b_ref in zip(filters, conv_w, conv_b):
            l_out = t_len - k + 1
            # im2col window built once per filter -> ONE dot with K = k*C.
            win = jnp.concatenate([emb[:, j:j + l_out, :] for j in range(k)],
                                  axis=-1).reshape(n * l_out, k * c_dim)
            h = (jnp.dot(win, w_ref[...], preferred_element_type=jnp.float32)
                 .reshape(n, l_out, out_ch) + b_ref[...])
            h = jnp.max(h, axis=1)                             # max over time
            pooled.append(jnp.maximum(h, 0.0))                 # relu
        x = jnp.concatenate(pooled, axis=-1)                   # (n, nf) f32

        for li in range(num_highways):
            wh_ref, bh_ref, wg_ref, bg_ref = hw_refs[4 * li:4 * li + 4]
            xb = x.astype(jnp.bfloat16)
            hidden = jnp.maximum(
                jnp.dot(xb, wh_ref[...], preferred_element_type=jnp.float32)
                + bh_ref[...], 0.0)
            gate = jax.nn.sigmoid(
                jnp.dot(xb, wg_ref[...], preferred_element_type=jnp.float32)
                + bg_ref[...])
            x = gate * x + (1.0 - gate) * hidden               # matches reference

        o_ref[...] = (jnp.dot(x.astype(jnp.bfloat16), pw_ref[...],
                              preferred_element_type=jnp.float32) + pb_ref[...])

    return kernel


def conv_token_embedder(params, cfg, chars):
    """chars (B,S,T) int32 -> time-major token embeddings (S,B,P) f32."""
    B, S, T = chars.shape
    C = cfg['char_embedding_dim']
    P = cfg['projection_dim']
    filters = cfg['char_conv_filters']
    nf = sum(o for _, o in filters)
    nh = cfg['num_highways']
    N = S * B

    # Flatten time-major so the LSTM input needs no (B,S,P) relayout afterwards.
    flat = jnp.transpose(chars, (1, 0, 2)).reshape(N, T)
    # TODO(synk): char-embedding gather stays in XLA (data-dependent row gather).
    embeds = params['char_emb'][flat]                           # (N, T, C) bf16

    tn = _pick_tile(N, 512, 8)
    kernel = _make_char_cnn_kernel(filters, nh)

    args = [embeds]
    in_specs = [pl.BlockSpec((tn, T, C), lambda i: (i, 0, 0))]
    for (k, o), cp in zip(filters, params['convs']):
        args.append(cp['w'])                                    # (k*C, O) bf16, packed
        in_specs.append(pl.BlockSpec((k * C, o), lambda i: (0, 0)))
    for (k, o), cp in zip(filters, params['convs']):
        args.append(cp['b'].reshape(1, o))
        in_specs.append(pl.BlockSpec((1, o), lambda i: (0, 0)))
    for hp in params['highways']:
        args += [hp['wh'], hp['bh'].reshape(1, nf), hp['wg'], hp['bg'].reshape(1, nf)]
        in_specs += [pl.BlockSpec((nf, nf), lambda i: (0, 0)),
                     pl.BlockSpec((1, nf), lambda i: (0, 0)),
                     pl.BlockSpec((nf, nf), lambda i: (0, 0)),
                     pl.BlockSpec((1, nf), lambda i: (0, 0))]
    args += [params['proj']['w'], params['proj']['b'].reshape(1, P)]
    in_specs += [pl.BlockSpec((nf, P), lambda i: (0, 0)),
                 pl.BlockSpec((1, P), lambda i: (0, 0))]

    token = pl.pallas_call(
        kernel,
        out_shape=jax.ShapeDtypeStruct((N, P), jnp.float32),
        grid=(N // tn,),
        in_specs=in_specs,
        out_specs=pl.BlockSpec((tn, P), lambda i: (i, 0)),
        compiler_params=pltpu.CompilerParams(dimension_semantics=("parallel",),
                                             vmem_limit_bytes=VMEM_LIMIT),
    )(*args)
    return token.reshape(S, B, P)


# --------------- fused bi-directional LSTM + mask + projection ------------- #

def _bilstm_kernel(x_ref, mask_ref, wih_ref, whh_ref, b_ref, pw_ref, pb_ref,
                   o_ref, gx_scr, h_scr):
    S, B, P = x_ref.shape
    H = h_scr.shape[-1]

    # Hoisted input-to-hidden path: ONE (S*B,P)@(P,4H) matmul, bias folded in.
    xb = x_ref[...].astype(jnp.bfloat16).reshape(S * B, P)
    gx_scr[...] = (jnp.dot(xb, wih_ref[...], preferred_element_type=jnp.float32)
                   .reshape(S, B, 4 * H) + b_ref[...])

    whh = whh_ref[...]                       # (H, 4H) bf16, gate-concat along lanes

    def step(t, carry):
        h, c = carry
        # Single recurrent matmul per timestep; gate slices are H-aligned lanes.
        gates = gx_scr[t] + jnp.dot(h.astype(jnp.bfloat16), whh,
                                    preferred_element_type=jnp.float32)   # (B, 4H)
        i_g = jax.nn.sigmoid(gates[:, 0 * H:1 * H])
        f_g = jax.nn.sigmoid(gates[:, 1 * H:2 * H])
        g_g = jnp.tanh(gates[:, 2 * H:3 * H])
        o_g = jax.nn.sigmoid(gates[:, 3 * H:4 * H])
        c = f_g * c + i_g * g_g
        h = o_g * jnp.tanh(c)
        h_scr[t] = h
        return (h, c)

    h0 = jnp.zeros((B, H), jnp.float32)
    jax.lax.fori_loop(0, S, step, (h0, h0))

    # Fused pad_packed_sequence zero-mask + batched H->P projection, off the
    # serial critical path (one big lane-dense store).
    hm = (h_scr[...] * mask_ref[...]).astype(jnp.bfloat16).reshape(S * B, H)
    o_ref[...] = (jnp.dot(hm, pw_ref[...], preferred_element_type=jnp.float32)
                  .reshape(S, B, P) + pb_ref[...]).astype(o_ref.dtype)


def bilstm_all(x_stack, mask_tm, wih, whh, bias, pw, pb):
    """Run n_lstm independent LSTMs (stacked along axis 0) in one pallas_call.

    x_stack (n,S,B,P) f32, mask_tm (S,B,1) f32, wih (n,P,4H) bf16, whh (n,H,4H)
    bf16, bias (n,4H) f32, pw (n,H,P) bf16, pb (n,P) f32.
    """
    n_lstm, S, B, P = x_stack.shape
    H = whh.shape[1]
    H4 = whh.shape[-1]

    # Pad batch to >=8 sublanes so the recurrent (B,H) vregs / MXU rows aren't wasted.
    Bp = max(8, -(-B // 8) * 8)
    if Bp != B:
        x_stack = jnp.pad(x_stack, ((0, 0), (0, 0), (0, Bp - B), (0, 0)))
        mask_tm = jnp.pad(mask_tm, ((0, 0), (0, Bp - B), (0, 0)))

    # TODO(synk): at production hidden_dim=4096 the (H,4H) weight block and the
    # (S,B,4H) gate scratch exceed VMEM (esp. v7x 64 MiB); an extra 'arbitrary'
    # K-tiling grid axis over H plus S-chunking of the gate pre-compute is needed.
    out = pl.pallas_call(
        _bilstm_kernel,
        out_shape=jax.ShapeDtypeStruct((n_lstm, S, Bp, P), jnp.float32),
        grid=(n_lstm,),
        in_specs=[pl.BlockSpec((None, S, Bp, P), lambda l: (l, 0, 0, 0)),
                  pl.BlockSpec((S, Bp, 1), lambda l: (0, 0, 0)),
                  pl.BlockSpec((None, P, H4), lambda l: (l, 0, 0)),
                  pl.BlockSpec((None, H, H4), lambda l: (l, 0, 0)),
                  pl.BlockSpec((None, 1, H4), lambda l: (l, 0, 0)),
                  pl.BlockSpec((None, H, P), lambda l: (l, 0, 0)),
                  pl.BlockSpec((None, 1, P), lambda l: (l, 0, 0))],
        out_specs=pl.BlockSpec((None, S, Bp, P), lambda l: (l, 0, 0, 0)),
        scratch_shapes=[pltpu.VMEM((S, Bp, H4), jnp.float32),
                        pltpu.VMEM((S, Bp, H), jnp.float32)],
        compiler_params=pltpu.CompilerParams(
            dimension_semantics=("parallel",),
            vmem_limit_bytes=VMEM_LIMIT),
    )(x_stack, mask_tm, wih, whh, bias.reshape(n_lstm, 1, H4),
      pw, pb.reshape(n_lstm, 1, P))
    return out[:, :, :B, :] if Bp != B else out


# ----------------------------- Parameters ---------------------------------- #

def init_params(key, cfg, vocab_c_size, vocab_w_size, pad_idx=0):
    keys = iter(jax.random.split(key, 128))

    def rnd(shape, scale=0.1, dtype=jnp.float32):
        return (jax.random.normal(next(keys), shape, jnp.float32) * scale).astype(dtype)

    p = {}
    C = cfg['char_embedding_dim']
    emb = jax.random.uniform(next(keys), (vocab_c_size, C), jnp.float32, -0.25, 0.25)
    p['char_emb'] = emb.at[pad_idx].set(0.0).astype(jnp.bfloat16)  # padding row zero

    # conv weights pre-packed per filter: (k*C, O) bf16 (one-dot im2col contraction)
    p['convs'] = [{'w': rnd((k * C, o), dtype=jnp.bfloat16), 'b': rnd((o,))}
                  for k, o in cfg['char_conv_filters']]

    nf = sum(o for _, o in cfg['char_conv_filters'])
    # highway stored as separate hidden/gate bf16 matrices; gate bias init 1.0
    # (intent of reference fill_(1)).
    p['highways'] = [{'wh': rnd((nf, nf), dtype=jnp.bfloat16), 'bh': rnd((nf,)),
                      'wg': rnd((nf, nf), dtype=jnp.bfloat16),
                      'bg': jnp.ones((nf,), jnp.float32)}
                     for _ in range(cfg['num_highways'])]

    P = cfg['projection_dim']
    p['proj'] = {'w': rnd((nf, P), dtype=jnp.bfloat16), 'b': rnd((P,))}

    H = cfg['hidden_dim']
    n = 2 * cfg['num_layers']                        # [fwd layers..., bwd layers...]
    p['lstm'] = {'wih': rnd((n, P, 4 * H), dtype=jnp.bfloat16),   # gate-concat (i,f,g,o)
                 'whh': rnd((n, H, 4 * H), dtype=jnp.bfloat16),
                 'b': rnd((n, 4 * H)),
                 'proj_w': rnd((n, H, P), dtype=jnp.bfloat16),
                 'proj_b': rnd((n, P))}

    # Classifier weight padded to 128-lane multiple; logits sliced back afterwards.
    Vp = max(128, -(-vocab_w_size // 128) * 128)
    cw = rnd((2 * P, vocab_w_size))
    cb = rnd((vocab_w_size,))
    p['cls'] = {'w': jnp.pad(cw, ((0, 0), (0, Vp - vocab_w_size))).astype(jnp.bfloat16),
                'b': jnp.pad(cb, (0, Vp - vocab_w_size))}
    return p


# ----------------------------- Forward pass -------------------------------- #

def elmo_encoder_last(params, cfg, inputs_tm, lengths):
    """Time-major ELMo encoder; only the top fwd/bwd layer is computed (the only
    states BiLM.forward consumes).  Because the reference never re-assigns
    forward/backward inputs, every layer reads the original embeddings, so the
    lower layers are dead compute for this forward pass."""
    S, B, P = inputs_tm.shape
    L = cfg['num_layers']

    pos = jnp.arange(S)[:, None]                              # (S, 1)
    Ln = lengths[None, :]                                     # (1, B)
    valid = pos < Ln                                          # (S, B)
    rev_idx = jnp.where(valid, Ln - 1 - pos, pos)             # (S, B) time-major
    mask_tm = valid.astype(jnp.float32)[:, :, None]           # (S, B, 1)

    # TODO(synk): length-dependent sequence reversal kept as XLA gathers; could move
    # into the LSTM kernel via PrefetchScalarGridSpec (SMEM rev_idx).
    gidx = jnp.broadcast_to(rev_idx[:, :, None], inputs_tm.shape)
    rev_inputs_tm = jnp.take_along_axis(inputs_tm, gidx, axis=0)

    lp = params['lstm']
    fsel, bsel = L - 1, 2 * L - 1                             # top fwd / top bwd LSTM
    sel = lambda a: jnp.stack([a[fsel], a[bsel]], axis=0)     # static slices, no gather
    x_stack = jnp.stack([inputs_tm, rev_inputs_tm], axis=0)   # (2, S, B, P)

    out = bilstm_all(x_stack, mask_tm, sel(lp['wih']), sel(lp['whh']),
                     sel(lp['b']), sel(lp['proj_w']), sel(lp['proj_b']))
    fwd_tm = out[0]                                           # (S, B, P)
    bwd_tm = jnp.take_along_axis(out[1], gidx, axis=0)        # re-reverse, time-major
    return fwd_tm, bwd_tm


def bilm_forward(params, cfg, chars, lengths, vocab_w_size):
    token_tm = conv_token_embedder(params, cfg, chars)        # (S, B, P) time-major
    # F.dropout(p=32) is invalid in the reference; inference mode -> identity.
    fwd_tm, bwd_tm = elmo_encoder_last(params, cfg, token_tm, lengths)
    S, B, P = fwd_tm.shape
    feats = jnp.concatenate([fwd_tm, bwd_tm], axis=-1).reshape(S * B, 2 * P)
    logits = linear(feats, params['cls']['w'], params['cls']['b'])   # (S*B, Vp)
    Vp = logits.shape[-1]
    logits = jnp.transpose(logits.reshape(S, B, Vp), (1, 0, 2))      # (B, S, Vp)
    return logits[:, :, :vocab_w_size]


# ----------------------------- Main ----------------------------------------- #

if __name__ == "__main__":
    cfg = {
        'char_embedding_dim': 16,
        'char_conv_filters': [[1, 32], [2, 32], [3, 64]],   # nf = 128 (lane-dense)
        'num_highways': 2,
        'projection_dim': 128,
        'hidden_dim': 128,
        'num_layers': 2,
    }
    vocab_c_size, vocab_w_size = 20, 24
    B, S, T = 2, 8, 6

    key = jax.random.PRNGKey(0)
    k_param, k_chars = jax.random.split(key)
    params = init_params(k_param, cfg, vocab_c_size, vocab_w_size, pad_idx=0)

    chars = jax.random.randint(k_chars, (B, S, T), 1, vocab_c_size, dtype=jnp.int32)
    lengths = jnp.array([8, 5], dtype=jnp.int32)

    fwd_fn = jax.jit(lambda p, c, l: bilm_forward(p, cfg, c, l, vocab_w_size))
    logits = fwd_fn(params, chars, lengths)
    jax.block_until_ready(logits)
    assert logits.shape == (B, S, vocab_w_size)
    assert logits.dtype == jnp.float32
    print("KERNEL_OK")
</pallas_src>

<mosaic_0001>
module attributes {stable_mosaic.version = 11 : i64} {
  func.func private @main(%arg0: i32) attributes {dimension_semantics = [#tpu.dimension_semantics<core_parallel>], iteration_bounds = array<i64: 2>, tpu.core_type = #tpu.core_type<sc_scalar_subcore>, window_params = []} {
    return
  }
}

module attributes {stable_mosaic.version = 11 : i64} {
  func.func private @main(%arg0: i32) attributes {dimension_semantics = [#tpu.dimension_semantics<core_parallel>], iteration_bounds = array<i64: 2>, tpu.core_type = #tpu.core_type<sc_scalar_subcore>, window_params = []} {
    return
  }
}

module attributes {stable_mosaic.version = 11 : i64} {
  func.func @kernel(%arg0: i32, %arg1: memref<16x6x16xbf16, #tpu.memory_space<vmem>>, %arg2: memref<16x32xbf16, #tpu.memory_space<vmem>>, %arg3: memref<32x32xbf16, #tpu.memory_space<vmem>>, %arg4: memref<48x64xbf16, #tpu.memory_space<vmem>>, %arg5: memref<1x32xf32, #tpu.memory_space<vmem>>, %arg6: memref<1x32xf32, #tpu.memory_space<vmem>>, %arg7: memref<1x64xf32, #tpu.memory_space<vmem>>, %arg8: memref<128x128xbf16, #tpu.memory_space<vmem>>, %arg9: memref<1x128xf32, #tpu.memory_space<vmem>>, %arg10: memref<128x128xbf16, #tpu.memory_space<vmem>>, %arg11: memref<1x128xf32, #tpu.memory_space<vmem>>, %arg12: memref<128x128xbf16, #tpu.memory_space<vmem>>, %arg13: memref<1x128xf32, #tpu.memory_space<vmem>>, %arg14: memref<128x128xbf16, #tpu.memory_space<vmem>>, %arg15: memref<1x128xf32, #tpu.memory_space<vmem>>, %arg16: memref<128x128xbf16, #tpu.memory_space<vmem>>, %arg17: memref<1x128xf32, #tpu.memory_space<vmem>>, %arg18: memref<16x128xf32, #tpu.memory_space<vmem>>) attributes {dimension_semantics = [#tpu.dimension_semantics<parallel>], iteration_bounds = array<i64: 1>, scalar_prefetch = 0 : i64, scratch_operands = 0 : i64, tpu.core_type = #tpu.core_type<tc>, window_params = [{transform_indices = @transform_0, window_bounds = array<i64: 16, 6, 16>}, {pipeline_mode = #tpu.pipeline_mode<synchronous>, transform_indices = @transform_1, window_bounds = array<i64: 16, 32>}, {pipeline_mode = #tpu.pipeline_mode<synchronous>, transform_indices = @transform_2, window_bounds = array<i64: 32, 32>}, {pipeline_mode = #tpu.pipeline_mode<synchronous>, transform_indices = @transform_3, window_bounds = array<i64: 48, 64>}, {pipeline_mode = #tpu.pipeline_mode<synchronous>, transform_indices = @transform_4, window_bounds = array<i64: 1, 32>}, {pipeline_mode = #tpu.pipeline_mode<synchronous>, transform_indices = @transform_5, window_bounds = array<i64: 1, 32>}, {pipeline_mode = #tpu.pipeline_mode<synchronous>, transform_indices = @transform_6, window_bounds = array<i64: 1, 64>}, {pipeline_mode = #tpu.pipeline_mode<synchronous>, transform_indices = @transform_7, window_bounds = array<i64: 128, 128>}, {pipeline_mode = #tpu.pipeline_mode<synchronous>, transform_indices = @transform_8, window_bounds = array<i64: 1, 128>}, {pipeline_mode = #tpu.pipeline_mode<synchronous>, transform_indices = @transform_9, window_bounds = array<i64: 128, 128>}, {pipeline_mode = #tpu.pipeline_mode<synchronous>, transform_indices = @transform_10, window_bounds = array<i64: 1, 128>}, {pipeline_mode = #tpu.pipeline_mode<synchronous>, transform_indices = @transform_11, window_bounds = array<i64: 128, 128>}, {pipeline_mode = #tpu.pipeline_mode<synchronous>, transform_indices = @transform_12, window_bounds = array<i64: 1, 128>}, {pipeline_mode = #tpu.pipeline_mode<synchronous>, transform_indices = @transform_13, window_bounds = array<i64: 128, 128>}, {pipeline_mode = #tpu.pipeline_mode<synchronous>, transform_indices = @transform_14, window_bounds = array<i64: 1, 128>}, {pipeline_mode = #tpu.pipeline_mode<synchronous>, transform_indices = @transform_15, window_bounds = array<i64: 128, 128>}, {pipeline_mode = #tpu.pipeline_mode<synchronous>, transform_indices = @transform_16, window_bounds = array<i64: 1, 128>}, {transform_indices = @transform_17, window_bounds = array<i64: 16, 128>}]} {
    %c0 = arith.constant 0 : index
    %c0_0 = arith.constant 0 : index
    %c0_1 = arith.constant 0 : index
    %0 = vector.load %arg1[%c0, %c0_0, %c0_1] : memref<16x6x16xbf16, #tpu.memory_space<vmem>>, vector<16x6x16xbf16>
    %1 = vector.shape_cast %0 : vector<16x6x16xbf16> to vector<96x16xbf16>
    %c0_2 = arith.constant 0 : index
    %c0_3 = arith.constant 0 : index
    %2 = vector.load %arg2[%c0_2, %c0_3] : memref<16x32xbf16, #tpu.memory_space<vmem>>, vector<16x32xbf16>
    %cst = arith.constant dense<0.000000e+00> : vector<96x32xf32>
    %3 = tpu.matmul %1, %2, %cst {dimension_numbers = #tpu.dot_dimension_numbers<[1], [0], [0], [1], [0, 0, 1, 1], [], []>} : vector<96x16xbf16>, vector<16x32xbf16>, vector<96x32xf32> -> vector<96x32xf32>
    %4 = vector.shape_cast %3 : vector<96x32xf32> to vector<16x6x32xf32>
    %c0_4 = arith.constant 0 : index
    %c0_5 = arith.constant 0 : index
    %5 = vector.load %arg5[%c0_4, %c0_5] : memref<1x32xf32, #tpu.memory_space<vmem>>, vector<1x32xf32>
    %6 = vector.shape_cast %5 : vector<1x32xf32> to vector<1x1x32xf32>
    %7 = vector.broadcast %6 : vector<1x1x32xf32> to vector<16x6x32xf32>
    %8 = arith.addf %4, %7 : vector<16x6x32xf32>
    %cst_6 = arith.constant dense<0xFF800000> : vector<16x32xf32>
    %9 = vector.multi_reduction <maximumf>, %8, %cst_6 [1] : vector<16x6x32xf32> to vector<16x32xf32>
    %cst_7 = arith.constant 0.000000e+00 : f32
    %10 = vector.broadcast %cst_7 : f32 to vector<16x32xf32>
    %11 = arith.maximumf %9, %10 : vector<16x32xf32>
    %12 = vector.extract_strided_slice %0 {offsets = [0, 0, 0], sizes = [16, 5, 16], strides = [1, 1, 1]} : vector<16x6x16xbf16> to vector<16x5x16xbf16>
    %13 = vector.extract_strided_slice %0 {offsets = [0, 1, 0], sizes = [16, 5, 16], strides = [1, 1, 1]} : vector<16x6x16xbf16> to vector<16x5x16xbf16>
    %14 = tpu.concatenate %12, %13 in 2 : vector<16x5x16xbf16>, vector<16x5x16xbf16> -> vector<16x5x32xbf16>
    %15 = vector.shape_cast %14 : vector<16x5x32xbf16> to vector<80x32xbf16>
    %c0_8 = arith.constant 0 : index
    %c0_9 = arith.constant 0 : index
    %16 = vector.load %arg3[%c0_8, %c0_9] : memref<32x32xbf16, #tpu.memory_space<vmem>>, vector<32x32xbf16>
    %cst_10 = arith.constant dense<0.000000e+00> : vector<80x32xf32>
    %17 = tpu.matmul %15, %16, %cst_10 {dimension_numbers = #tpu.dot_dimension_numbers<[1], [0], [0], [1], [0, 0, 1, 1], [], []>} : vector<80x32xbf16>, vector<32x32xbf16>, vector<80x32xf32> -> vector<80x32xf32>
    %18 = vector.shape_cast %17 : vector<80x32xf32> to vector<16x5x32xf32>
    %c0_11 = arith.constant 0 : index
    %c0_12 = arith.constant 0 : index
    %19 = vector.load %arg6[%c0_11, %c0_12] : memref<1x32xf32, #tpu.memory_space<vmem>>, vector<1x32xf32>
    %20 = vector.shape_cast %19 : vector<1x32xf32> to vector<1x1x32xf32>
    %21 = vector.broadcast %20 : vector<1x1x32xf32> to vector<16x5x32xf32>
    %22 = arith.addf %18, %21 : vector<16x5x32xf32>
    %cst_13 = arith.constant dense<0xFF800000> : vector<16x32xf32>
    %23 = vector.multi_reduction <maximumf>, %22, %cst_13 [1] : vector<16x5x32xf32> to vector<16x32xf32>
    %cst_14 = arith.constant 0.000000e+00 : f32
    %24 = vector.broadcast %cst_14 : f32 to vector<16x32xf32>
    %25 = arith.maximumf %23, %24 : vector<16x32xf32>
    %26 = vector.extract_strided_slice %0 {offsets = [0, 0, 0], sizes = [16, 4, 16], strides = [1, 1, 1]} : vector<16x6x16xbf16> to vector<16x4x16xbf16>
    %27 = vector.extract_strided_slice %0 {offsets = [0, 1, 0], sizes = [16, 4, 16], strides = [1, 1, 1]} : vector<16x6x16xbf16> to vector<16x4x16xbf16>
    %28 = vector.extract_strided_slice %0 {offsets = [0, 2, 0], sizes = [16, 4, 16], strides = [1, 1, 1]} : vector<16x6x16xbf16> to vector<16x4x16xbf16>
    %29 = tpu.concatenate %26, %27, %28 in 2 : vector<16x4x16xbf16>, vector<16x4x16xbf16>, vector<16x4x16xbf16> -> vector<16x4x48xbf16>
    %30 = vector.shape_cast %29 : vector<16x4x48xbf16> to vector<64x48xbf16>
    %c0_15 = arith.constant 0 : index
    %c0_16 = arith.constant 0 : index
    %31 = vector.load %arg4[%c0_15, %c0_16] : memref<48x64xbf16, #tpu.memory_space<vmem>>, vector<48x64xbf16>
    %cst_17 = arith.constant dense<0.000000e+00> : vector<64x64xf32>
    %32 = tpu.matmul %30, %31, %cst_17 {dimension_numbers = #tpu.dot_dimension_numbers<[1], [0], [0], [1], [0, 0, 1, 1], [], []>} : vector<64x48xbf16>, vector<48x64xbf16>, vector<64x64xf32> -> vector<64x64xf32>
    %33 = vector.shape_cast %32 : vector<64x64xf32> to vector<16x4x64xf32>
    %c0_18 = arith.constant 0 : index
    %c0_19 = arith.constant 0 : index
    %34 = vector.load %arg7[%c0_18, %c0_19] : memref<1x64xf32, #tpu.memory_space<vmem>>, vector<1x64xf32>
    %35 = vector.shape_cast %34 : vector<1x64xf32> to vector<1x1x64xf32>
    %36 = vector.broadcast %35 : vector<1x1x64xf32> to vector<16x4x64xf32>
    %37 = arith.addf %33, %36 : vector<16x4x64xf32>
    %cst_20 = arith.constant dense<0xFF800000> : vector<16x64xf32>
    %38 = vector.multi_reduction <maximumf>, %37, %cst_20 [1] : vector<16x4x64xf32> to vector<16x64xf32>
    %cst_21 = arith.constant 0.000000e+00 : f32
    %39 = vector.broadcast %cst_21 : f32 to vector<16x64xf32>
    %40 = arith.maximumf %38, %39 : vector<16x64xf32>
    %41 = tpu.concatenate %11, %25, %40 in 1 : vector<16x32xf32>, vector<16x32xf32>, vector<16x64xf32> -> vector<16x128xf32>
    %42 = arith.truncf %41 : vector<16x128xf32> to vector<16x128xbf16>
    %c0_22 = arith.constant 0 : index
    %c0_23 = arith.constant 0 : index
    %43 = vector.load %arg8[%c0_22, %c0_23] : memref<128x128xbf16, #tpu.memory_space<vmem>>, vector<128x128xbf16>
    %cst_24 = arith.constant dense<0.000000e+00> : vector<16x128xf32>
    %44 = tpu.matmul %42, %43, %cst_24 {dimension_numbers = #tpu.dot_dimension_numbers<[1], [0], [0], [1], [0, 0, 1, 1], [], []>} : vector<16x128xbf16>, vector<128x128xbf16>, vector<16x128xf32> -> vector<16x128xf32>
    %c0_25 = arith.constant 0 : index
    %c0_26 = arith.constant 0 : index
    %45 = vector.load %arg9[%c0_25, %c0_26] : memref<1x128xf32, #tpu.memory_space<vmem>>, vector<1x128xf32>
    %46 = vector.broadcast %45 : vector<1x128xf32> to vector<16x128xf32>
    %47 = arith.addf %44, %46 : vector<16x128xf32>
    %cst_27 = arith.constant 0.000000e+00 : f32
    %48 = vector.broadcast %cst_27 : f32 to vector<16x128xf32>
    %49 = arith.maximumf %47, %48 : vector<16x128xf32>
    %c0_28 = arith.constant 0 : index
    %c0_29 = arith.constant 0 : index
    %50 = vector.load %arg10[%c0_28, %c0_29] : memref<128x128xbf16, #tpu.memory_space<vmem>>, vector<128x128xbf16>
    %cst_30 = arith.constant dense<0.000000e+00> : vector<16x128xf32>
    %51 = tpu.matmul %42, %50, %cst_30 {dimension_numbers = #tpu.dot_dimension_numbers<[1], [0], [0], [1], [0, 0, 1, 1], [], []>} : vector<16x128xbf16>, vector<128x128xbf16>, vector<16x128xf32> -> vector<16x128xf32>
    %c0_31 = arith.constant 0 : index
    %c0_32 = arith.constant 0 : index
    %52 = vector.load %arg11[%c0_31, %c0_32] : memref<1x128xf32, #tpu.memory_space<vmem>>, vector<1x128xf32>
    %53 = vector.broadcast %52 : vector<1x128xf32> to vector<16x128xf32>
    %54 = arith.addf %51, %53 : vector<16x128xf32>
    %55 = arith.negf %54 : vector<16x128xf32>
    %56 = math.exp %55 : vector<16x128xf32>
    %cst_33 = arith.constant 1.000000e+00 : f32
    %57 = vector.broadcast %cst_33 : f32 to vector<16x128xf32>
    %58 = arith.addf %57, %56 : vector<16x128xf32>
    %59 = arith.divf %57, %58 : vector<16x128xf32>
    %60 = arith.mulf %59, %41 : vector<16x128xf32>
    %cst_34 = arith.constant 1.000000e+00 : f32
    %61 = vector.broadcast %cst_34 : f32 to vector<16x128xf32>
    %62 = arith.subf %61, %59 : vector<16x128xf32>
    %63 = arith.mulf %62, %49 : vector<16x128xf32>
    %64 = arith.addf %60, %63 : vector<16x128xf32>
    %65 = arith.truncf %64 : vector<16x128xf32> to vector<16x128xbf16>
    %c0_35 = arith.constant 0 : index
    %c0_36 = arith.constant 0 : index
    %66 = vector.load %arg12[%c0_35, %c0_36] : memref<128x128xbf16, #tpu.memory_space<vmem>>, vector<128x128xbf16>
    %cst_37 = arith.constant dense<0.000000e+00> : vector<16x128xf32>
    %67 = tpu.matmul %65, %66, %cst_37 {dimension_numbers = #tpu.dot_dimension_numbers<[1], [0], [0], [1], [0, 0, 1, 1], [], []>} : vector<16x128xbf16>, vector<128x128xbf16>, vector<16x128xf32> -> vector<16x128xf32>
    %c0_38 = arith.constant 0 : index
    %c0_39 = arith.constant 0 : index
    %68 = vector.load %arg13[%c0_38, %c0_39] : memref<1x128xf32, #tpu.memory_space<vmem>>, vector<1x128xf32>
    %69 = vector.broadcast %68 : vector<1x128xf32> to vector<16x128xf32>
    %70 = arith.addf %67, %69 : vector<16x128xf32>
    %cst_40 = arith.constant 0.000000e+00 : f32
    %71 = vector.broadcast %cst_40 : f32 to vector<16x128xf32>
    %72 = arith.maximumf %70, %71 : vector<16x128xf32>
    %c0_41 = arith.constant 0 : index
    %c0_42 = arith.constant 0 : index
    %73 = vector.load %arg14[%c0_41, %c0_42] : memref<128x128xbf16, #tpu.memory_space<vmem>>, vector<128x128xbf16>
    %cst_43 = arith.constant dense<0.000000e+00> : vector<16x128xf32>
    %74 = tpu.matmul %65, %73, %cst_43 {dimension_numbers = #tpu.dot_dimension_numbers<[1], [0], [0], [1], [0, 0, 1, 1], [], []>} : vector<16x128xbf16>, vector<128x128xbf16>, vector<16x128xf32> -> vector<16x128xf32>
    %c0_44 = arith.constant 0 : index
    %c0_45 = arith.constant 0 : index
    %75 = vector.load %arg15[%c0_44, %c0_45] : memref<1x128xf32, #tpu.memory_space<vmem>>, vector<1x128xf32>
    %76 = vector.broadcast %75 : vector<1x128xf32> to vector<16x128xf32>
    %77 = arith.addf %74, %76 : vector<16x128xf32>
    %78 = arith.negf %77 : vector<16x128xf32>
    %79 = math.exp %78 : vector<16x128xf32>
    %cst_46 = arith.constant 1.000000e+00 : f32
    %80 = vector.broadcast %cst_46 : f32 to vector<16x128xf32>
    %81 = arith.addf %80, %79 : vector<16x128xf32>
    %82 = arith.divf %80, %81 : vector<16x128xf32>
    %83 = arith.mulf %82, %64 : vector<16x128xf32>
    %cst_47 = arith.constant 1.000000e+00 : f32
    %84 = vector.broadcast %cst_47 : f32 to vector<16x128xf32>
    %85 = arith.subf %84, %82 : vector<16x128xf32>
    %86 = arith.mulf %85, %72 : vector<16x128xf32>
    %87 = arith.addf %83, %86 : vector<16x128xf32>
    %88 = arith.truncf %87 : vector<16x128xf32> to vector<16x128xbf16>
    %c0_48 = arith.constant 0 : index
    %c0_49 = arith.constant 0 : index
    %89 = vector.load %arg16[%c0_48, %c0_49] : memref<128x128xbf16, #tpu.memory_space<vmem>>, vector<128x128xbf16>
    %cst_50 = arith.constant dense<0.000000e+00> : vector<16x128xf32>
    %90 = tpu.matmul %88, %89, %cst_50 {dimension_numbers = #tpu.dot_dimension_numbers<[1], [0], [0], [1], [0, 0, 1, 1], [], []>} : vector<16x128xbf16>, vector<128x128xbf16>, vector<16x128xf32> -> vector<16x128xf32>
    %c0_51 = arith.constant 0 : index
    %c0_52 = arith.constant 0 : index
    %91 = vector.load %arg17[%c0_51, %c0_52] : memref<1x128xf32, #tpu.memory_space<vmem>>, vector<1x128xf32>
    %92 = vector.broadcast %91 : vector<1x128xf32> to vector<16x128xf32>
    %93 = arith.addf %90, %92 : vector<16x128xf32>
    %c0_53 = arith.constant 0 : index
    %c0_54 = arith.constant 0 : index
    %94 = vector.load %arg18[%c0_53, %c0_54] : memref<16x128xf32, #tpu.memory_space<vmem>>, vector<16x128xf32>
    tpu.vector_store %arg18[%c0_53, %c0_54], %93 {strides = array<i32>} : memref<16x128xf32, #tpu.memory_space<vmem>>, vector<16x128xf32>,
    return
  }
  func.func @transform_0(%arg0: i32) -> (i32, i32, i32) {
    %c0_i32 = arith.constant 0 : i32
    %c0_i32_0 = arith.constant 0 : i32
    %c0_i32_1 = arith.constant 0 : i32
    return %arg0, %c0_i32, %c0_i32_0 : i32, i32, i32
  }
  func.func @transform_1(%arg0: i32) -> (i32, i32) {
    %c0_i32 = arith.constant 0 : i32
    %c0_i32_0 = arith.constant 0 : i32
    %c0_i32_1 = arith.constant 0 : i32
    return %c0_i32, %c0_i32_0 : i32, i32
  }
  func.func @transform_2(%arg0: i32) -> (i32, i32) {
    %c0_i32 = arith.constant 0 : i32
    %c0_i32_0 = arith.constant 0 : i32
    %c0_i32_1 = arith.constant 0 : i32
    return %c0_i32, %c0_i32_0 : i32, i32
  }
  func.func @transform_3(%arg0: i32) -> (i32, i32) {
    %c0_i32 = arith.constant 0 : i32
    %c0_i32_0 = arith.constant 0 : i32
    %c0_i32_1 = arith.constant 0 : i32
    return %c0_i32, %c0_i32_0 : i32, i32
  }
  func.func @transform_4(%arg0: i32) -> (i32, i32) {
    %c0_i32 = arith.constant 0 : i32
    %c0_i32_0 = arith.constant 0 : i32
    %c0_i32_1 = arith.constant 0 : i32
    return %c0_i32, %c0_i32_0 : i32, i32
  }
  func.func @transform_5(%arg0: i32) -> (i32, i32) {
    %c0_i32 = arith.constant 0 : i32
    %c0_i32_0 = arith.constant 0 : i32
    %c0_i32_1 = arith.constant 0 : i32
    return %c0_i32, %c0_i32_0 : i32, i32
  }
  func.func @transform_6(%arg0: i32) -> (i32, i32) {
    %c0_i32 = arith.constant 0 : i32
    %c0_i32_0 = arith.constant 0 : i32
    %c0_i32_1 = arith.constant 0 : i32
    return %c0_i32, %c0_i32_0 : i32, i32
  }
  func.func @transform_7(%arg0: i32) -> (i32, i32) {
    %c0_i32 = arith.constant 0 : i32
    %c0_i32_0 = arith.constant 0 : i32
    %c0_i32_1 = arith.constant 0 : i32
    return %c0_i32, %c0_i32_0 : i32, i32
  }
  func.func @transform_8(%arg0: i32) -> (i32, i32) {
    %c0_i32 = arith.constant 0 : i32
    %c0_i32_0 = arith.constant 0 : i32
    %c0_i32_1 = arith.constant 0 : i32
    return %c0_i32, %c0_i32_0 : i32, i32
  }
  func.func @transform_9(%arg0: i32) -> (i32, i32) {
    %c0_i32 = arith.constant 0 : i32
    %c0_i32_0 = arith.constant 0 : i32
    %c0_i32_1 = arith.constant 0 : i32
    return %c0_i32, %c0_i32_0 : i32, i32
  }
  func.func @transform_10(%arg0: i32) -> (i32, i32) {
    %c0_i32 = arith.constant 0 : i32
    %c0_i32_0 = arith.constant 0 : i32
    %c0_i32_1 = arith.constant 0 : i32
    return %c0_i32, %c0_i32_0 : i32, i32
  }
  func.func @transform_11(%arg0: i32) -> (i32, i32) {
    %c0_i32 = arith.constant 0 : i32
    %c0_i32_0 = arith.constant 0 : i32
    %c0_i32_1 = arith.constant 0 : i32
    return %c0_i32, %c0_i32_0 : i32, i32
  }
  func.func @transform_12(%arg0: i32) -> (i32, i32) {
    %c0_i32 = arith.constant 0 : i32
    %c0_i32_0 = arith.constant 0 : i32
    %c0_i32_1 = arith.constant 0 : i32
    return %c0_i32, %c0_i32_0 : i32, i32
  }
  func.func @transform_13(%arg0: i32) -> (i32, i32) {
    %c0_i32 = arith.constant 0 : i32
    %c0_i32_0 = arith.constant 0 : i32
    %c0_i32_1 = arith.constant 0 : i32
    return %c0_i32, %c0_i32_0 : i32, i32
  }
  func.func @transform_14(%arg0: i32) -> (i32, i32) {
    %c0_i32 = arith.constant 0 : i32
    %c0_i32_0 = arith.constant 0 : i32
    %c0_i32_1 = arith.constant 0 : i32
    return %c0_i32, %c0_i32_0 : i32, i32
  }
  func.func @transform_15(%arg0: i32) -> (i32, i32) {
    %c0_i32 = arith.constant 0 : i32
    %c0_i32_0 = arith.constant 0 : i32
    %c0_i32_1 = arith.constant 0 : i32
    return %c0_i32, %c0_i32_0 : i32, i32
  }
  func.func @transform_16(%arg0: i32) -> (i32, i32) {
    %c0_i32 = arith.constant 0 : i32
    %c0_i32_0 = arith.constant 0 : i32
    %c0_i32_1 = arith.constant 0 : i32
    return %c0_i32, %c0_i32_0 : i32, i32
  }
  func.func @transform_17(%arg0: i32) -> (i32, i32) {
    %c0_i32 = arith.constant 0 : i32
    %c0_i32_0 = arith.constant 0 : i32
    return %arg0, %c0_i32 : i32, i32
  }
}

module attributes {stable_mosaic.version = 11 : i64} {
  func.func @_bilstm_kernel(%arg0: i32, %arg1: memref<1x8x8x128xf32, #tpu.memory_space<vmem>>, %arg2: memref<8x8x1xf32, #tpu.memory_space<vmem>>, %arg3: memref<1x128x512xbf16, #tpu.memory_space<vmem>>, %arg4: memref<1x128x512xbf16, #tpu.memory_space<vmem>>, %arg5: memref<1x1x512xf32, #tpu.memory_space<vmem>>, %arg6: memref<1x128x128xbf16, #tpu.memory_space<vmem>>, %arg7: memref<1x1x128xf32, #tpu.memory_space<vmem>>, %arg8: memref<1x8x8x128xf32, #tpu.memory_space<vmem>>, %arg9: memref<8x8x512xf32, #tpu.memory_space<vmem>>, %arg10: memref<8x8x128xf32, #tpu.memory_space<vmem>>) attributes {dimension_semantics = [#tpu.dimension_semantics<parallel>], iteration_bounds = array<i64: 2>, scalar_prefetch = 0 : i64, scratch_operands = 2 : i64, tpu.core_type = #tpu.core_type<tc>, window_params = [{transform_indices = @transform_0, window_bounds = array<i64: 1, 8, 8, 128>}, {pipeline_mode = #tpu.pipeline_mode<synchronous>, transform_indices = @transform_1, window_bounds = array<i64: 8, 8, 1>}, {transform_indices = @transform_2, window_bounds = array<i64: 1, 128, 512>}, {transform_indices = @transform_3, window_bounds = array<i64: 1, 128, 512>}, {transform_indices = @transform_4, window_bounds = array<i64: 1, 1, 512>}, {transform_indices = @transform_5, window_bounds = array<i64: 1, 128, 128>}, {transform_indices = @transform_6, window_bounds = array<i64: 1, 1, 128>}, {transform_indices = @transform_7, window_bounds = array<i64: 1, 8, 8, 128>}]} {
    %c0 = arith.constant 0 : index
    %c0_0 = arith.constant 0 : index
    %c0_1 = arith.constant 0 : index
    %c0_2 = arith.constant 0 : index
    %0 = vector.load %arg1[%c0, %c0_0, %c0_1, %c0_2] : memref<1x8x8x128xf32, #tpu.memory_space<vmem>>, vector<1x8x8x128xf32>
    %1 = vector.shape_cast %0 : vector<1x8x8x128xf32> to vector<8x8x128xf32>
    %2 = arith.truncf %1 : vector<8x8x128xf32> to vector<8x8x128xbf16>
    %3 = vector.shape_cast %2 : vector<8x8x128xbf16> to vector<64x128xbf16>
    %c0_3 = arith.constant 0 : index
    %c0_4 = arith.constant 0 : index
    %c0_5 = arith.constant 0 : index
    %4 = vector.load %arg3[%c0_3, %c0_4, %c0_5] : memref<1x128x512xbf16, #tpu.memory_space<vmem>>, vector<1x128x512xbf16>
    %5 = vector.shape_cast %4 : vector<1x128x512xbf16> to vector<128x512xbf16>
    %cst = arith.constant dense<0.000000e+00> : vector<64x512xf32>
    %6 = tpu.matmul %3, %5, %cst {dimension_numbers = #tpu.dot_dimension_numbers<[1], [0], [0], [1], [0, 0, 1, 1], [], []>} : vector<64x128xbf16>, vector<128x512xbf16>, vector<64x512xf32> -> vector<64x512xf32>
    %7 = vector.shape_cast %6 : vector<64x512xf32> to vector<8x8x512xf32>
    %c0_6 = arith.constant 0 : index
    %c0_7 = arith.constant 0 : index
    %c0_8 = arith.constant 0 : index
    %8 = vector.load %arg5[%c0_6, %c0_7, %c0_8] : memref<1x1x512xf32, #tpu.memory_space<vmem>>, vector<1x1x512xf32>
    %9 = vector.shape_cast %8 : vector<1x1x512xf32> to vector<1x512xf32>
    %10 = vector.shape_cast %9 : vector<1x512xf32> to vector<1x1x512xf32>
    %11 = vector.broadcast %10 : vector<1x1x512xf32> to vector<8x8x512xf32>
    %12 = arith.addf %7, %11 : vector<8x8x512xf32>
    %c0_9 = arith.constant 0 : index
    %c0_10 = arith.constant 0 : index
    %c0_11 = arith.constant 0 : index
    %13 = vector.load %arg9[%c0_9, %c0_10, %c0_11] : memref<8x8x512xf32, #tpu.memory_space<vmem>>, vector<8x8x512xf32>
    tpu.vector_store %arg9[%c0_9, %c0_10, %c0_11], %12 {strides = array<i32>} : memref<8x8x512xf32, #tpu.memory_space<vmem>>, vector<8x8x512xf32>,
    %c0_12 = arith.constant 0 : index
    %c0_13 = arith.constant 0 : index
    %c0_14 = arith.constant 0 : index
    %14 = vector.load %arg4[%c0_12, %c0_13, %c0_14] : memref<1x128x512xbf16, #tpu.memory_space<vmem>>, vector<1x128x512xbf16>
    %15 = vector.shape_cast %14 : vector<1x128x512xbf16> to vector<128x512xbf16>
    %cst_15 = arith.constant 0.000000e+00 : f32
    %16 = vector.broadcast %cst_15 : f32 to vector<8x128xf32>
    %c0_i32 = arith.constant 0 : i32
    %c8_i32 = arith.constant 8 : i32
    %17 = arith.addi %c0_i32, %c8_i32 : i32
    %c1_i32 = arith.constant 1 : i32
    %18:2 = scf.for %arg11 = %c0_i32 to %17 step %c1_i32 iter_args(%arg12 = %16, %arg13 = %16) -> (vector<8x128xf32>, vector<8x128xf32>)  : i32 {
      %37 = arith.index_cast %arg11 : i32 to index
      %c0_34 = arith.constant 0 : index
      %c0_35 = arith.constant 0 : index
      %38 = vector.load %arg9[%37, %c0_34, %c0_35] : memref<8x8x512xf32, #tpu.memory_space<vmem>>, vector<1x8x512xf32>
      %39 = vector.shape_cast %38 : vector<1x8x512xf32> to vector<8x512xf32>
      %40 = arith.truncf %arg12 : vector<8x128xf32> to vector<8x128xbf16>
      %cst_36 = arith.constant dense<0.000000e+00> : vector<8x512xf32>
      %41 = tpu.matmul %40, %15, %cst_36 {dimension_numbers = #tpu.dot_dimension_numbers<[1], [0], [0], [1], [0, 0, 1, 1], [], []>} : vector<8x128xbf16>, vector<128x512xbf16>, vector<8x512xf32> -> vector<8x512xf32>
      %42 = arith.addf %39, %41 : vector<8x512xf32>
      %43 = vector.extract_strided_slice %42 {offsets = [0, 0], sizes = [8, 128], strides = [1, 1]} : vector<8x512xf32> to vector<8x128xf32>
      %44 = arith.negf %43 : vector<8x128xf32>
      %45 = math.exp %44 : vector<8x128xf32>
      %cst_37 = arith.constant 1.000000e+00 : f32
      %46 = vector.broadcast %cst_37 : f32 to vector<8x128xf32>
      %47 = arith.addf %46, %45 : vector<8x128xf32>
      %48 = arith.divf %46, %47 : vector<8x128xf32>
      %49 = vector.extract_strided_slice %42 {offsets = [0, 128], sizes = [8, 128], strides = [1, 1]} : vector<8x512xf32> to vector<8x128xf32>
      %50 = arith.negf %49 : vector<8x128xf32>
      %51 = math.exp %50 : vector<8x128xf32>
      %cst_38 = arith.constant 1.000000e+00 : f32
      %52 = vector.broadcast %cst_38 : f32 to vector<8x128xf32>
      %53 = arith.addf %52, %51 : vector<8x128xf32>
      %54 = arith.divf %52, %53 : vector<8x128xf32>
      %55 = vector.extract_strided_slice %42 {offsets = [0, 256], sizes = [8, 128], strides = [1, 1]} : vector<8x512xf32> to vector<8x128xf32>
      %56 = math.tanh %55 : vector<8x128xf32>
      %57 = vector.extract_strided_slice %42 {offsets = [0, 384], sizes = [8, 128], strides = [1, 1]} : vector<8x512xf32> to vector<8x128xf32>
      %58 = arith.negf %57 : vector<8x128xf32>
      %59 = math.exp %58 : vector<8x128xf32>
      %cst_39 = arith.constant 1.000000e+00 : f32
      %60 = vector.broadcast %cst_39 : f32 to vector<8x128xf32>
      %61 = arith.addf %60, %59 : vector<8x128xf32>
      %62 = arith.divf %60, %61 : vector<8x128xf32>
      %63 = arith.mulf %54, %arg13 : vector<8x128xf32>
      %64 = arith.mulf %48, %56 : vector<8x128xf32>
      %65 = arith.addf %63, %64 : vector<8x128xf32>
      %66 = math.tanh %65 : vector<8x128xf32>
      %67 = arith.mulf %62, %66 : vector<8x128xf32>
      %68 = arith.index_cast %arg11 : i32 to index
      %c0_40 = arith.constant 0 : index
      %c0_41 = arith.constant 0 : index
      %69 = vector.load %arg10[%68, %c0_40, %c0_41] : memref<8x8x128xf32, #tpu.memory_space<vmem>>, vector<1x8x128xf32>
      %70 = vector.shape_cast %69 : vector<1x8x128xf32> to vector<8x128xf32>
      %71 = vector.shape_cast %67 : vector<8x128xf32> to vector<1x8x128xf32>
      tpu.vector_store %arg10[%68, %c0_40, %c0_41], %71 {strides = array<i32>} : memref<8x8x128xf32, #tpu.memory_space<vmem>>, vector<1x8x128xf32>,
      scf.yield %67, %65 : vector<8x128xf32>, vector<8x128xf32>
    }
    %c8_i32_16 = arith.constant 8 : i32
    %c0_17 = arith.constant 0 : index
    %c0_18 = arith.constant 0 : index
    %c0_19 = arith.constant 0 : index
    %19 = vector.load %arg10[%c0_17, %c0_18, %c0_19] : memref<8x8x128xf32, #tpu.memory_space<vmem>>, vector<8x8x128xf32>
    %c0_20 = arith.constant 0 : index
    %c0_21 = arith.constant 0 : index
    %c0_22 = arith.constant 0 : index
    %20 = vector.load %arg2[%c0_20, %c0_21, %c0_22] : memref<8x8x1xf32, #tpu.memory_space<vmem>>, vector<8x8x1xf32>
    %21 = vector.broadcast %20 : vector<8x8x1xf32> to vector<8x8x128xf32>
    %22 = arith.mulf %19, %21 : vector<8x8x128xf32>
    %23 = arith.truncf %22 : vector<8x8x128xf32> to vector<8x8x128xbf16>
    %24 = vector.shape_cast %23 : vector<8x8x128xbf16> to vector<64x128xbf16>
    %c0_23 = arith.constant 0 : index
    %c0_24 = arith.constant 0 : index
    %c0_25 = arith.constant 0 : index
    %25 = vector.load %arg6[%c0_23, %c0_24, %c0_25] : memref<1x128x128xbf16, #tpu.memory_space<vmem>>, vector<1x128x128xbf16>
    %26 = vector.shape_cast %25 : vector<1x128x128xbf16> to vector<128x128xbf16>
    %cst_26 = arith.constant dense<0.000000e+00> : vector<64x128xf32>
    %27 = tpu.matmul %24, %26, %cst_26 {dimension_numbers = #tpu.dot_dimension_numbers<[1], [0], [0], [1], [0, 0, 1, 1], [], []>} : vector<64x128xbf16>, vector<128x128xbf16>, vector<64x128xf32> -> vector<64x128xf32>
    %28 = vector.shape_cast %27 : vector<64x128xf32> to vector<8x8x128xf32>
    %c0_27 = arith.constant 0 : index
    %c0_28 = arith.constant 0 : index
    %c0_29 = arith.constant 0 : index
    %29 = vector.load %arg7[%c0_27, %c0_28, %c0_29] : memref<1x1x128xf32, #tpu.memory_space<vmem>>, vector<1x1x128xf32>
    %30 = vector.shape_cast %29 : vector<1x1x128xf32> to vector<1x128xf32>
    %31 = vector.shape_cast %30 : vector<1x128xf32> to vector<1x1x128xf32>
    %32 = vector.broadcast %31 : vector<1x1x128xf32> to vector<8x8x128xf32>
    %33 = arith.addf %28, %32 : vector<8x8x128xf32>
    %c0_30 = arith.constant 0 : index
    %c0_31 = arith.constant 0 : index
    %c0_32 = arith.constant 0 : index
    %c0_33 = arith.constant 0 : index
    %34 = vector.load %arg8[%c0_30, %c0_31, %c0_32, %c0_33] : memref<1x8x8x128xf32, #tpu.memory_space<vmem>>, vector<1x8x8x128xf32>
    %35 = vector.shape_cast %34 : vector<1x8x8x128xf32> to vector<8x8x128xf32>
    %36 = vector.shape_cast %33 : vector<8x8x128xf32> to vector<1x8x8x128xf32>
    tpu.vector_store %arg8[%c0_30, %c0_31, %c0_32, %c0_33], %36 {strides = array<i32>} : memref<1x8x8x128xf32, #tpu.memory_space<vmem>>, vector<1x8x8x128xf32>,
    return
  }
  func.func @transform_0(%arg0: i32) -> (i32, i32, i32, i32) {
    %c0_i32 = arith.constant 0 : i32
    %c0_i32_0 = arith.constant 0 : i32
    %c0_i32_1 = arith.constant 0 : i32
    %c0_i32_2 = arith.constant 0 : i32
    return %arg0, %c0_i32, %c0_i32_0, %c0_i32_1 : i32, i32, i32, i32
  }
  func.func @transform_1(%arg0: i32) -> (i32, i32, i32) {
    %c0_i32 = arith.constant 0 : i32
    %c0_i32_0 = arith.constant 0 : i32
    %c0_i32_1 = arith.constant 0 : i32
    %c0_i32_2 = arith.constant 0 : i32
    return %c0_i32, %c0_i32_0, %c0_i32_1 : i32, i32, i32
  }
  func.func @transform_2(%arg0: i32) -> (i32, i32, i32) {
    %c0_i32 = arith.constant 0 : i32
    %c0_i32_0 = arith.constant 0 : i32
    %c0_i32_1 = arith.constant 0 : i32
    return %arg0, %c0_i32, %c0_i32_0 : i32, i32, i32
  }
  func.func @transform_3(%arg0: i32) -> (i32, i32, i32) {
    %c0_i32 = arith.constant 0 : i32
    %c0_i32_0 = arith.constant 0 : i32
    %c0_i32_1 = arith.constant 0 : i32
    return %arg0, %c0_i32, %c0_i32_0 : i32, i32, i32
  }
  func.func @transform_4(%arg0: i32) -> (i32, i32, i32) {
    %c0_i32 = arith.constant 0 : i32
    %c0_i32_0 = arith.constant 0 : i32
    %c0_i32_1 = arith.constant 0 : i32
    return %arg0, %c0_i32, %c0_i32_0 : i32, i32, i32
  }
  func.func @transform_5(%arg0: i32) -> (i32, i32, i32) {
    %c0_i32 = arith.constant 0 : i32
    %c0_i32_0 = arith.constant 0 : i32
    %c0_i32_1 = arith.constant 0 : i32
    return %arg0, %c0_i32, %c0_i32_0 : i32, i32, i32
  }
  func.func @transform_6(%arg0: i32) -> (i32, i32, i32) {
    %c0_i32 = arith.constant 0 : i32
    %c0_i32_0 = arith.constant 0 : i32
    %c0_i32_1 = arith.constant 0 : i32
    return %arg0, %c0_i32, %c0_i32_0 : i32, i32, i32
  }
  func.func @transform_7(%arg0: i32) -> (i32, i32, i32, i32) {
    %c0_i32 = arith.constant 0 : i32
    %c0_i32_0 = arith.constant 0 : i32
    %c0_i32_1 = arith.constant 0 : i32
    %c0_i32_2 = arith.constant 0 : i32
    return %arg0, %c0_i32, %c0_i32_0, %c0_i32_1 : i32, i32, i32, i32
  }
}

module attributes {stable_mosaic.version = 11 : i64} {
  func.func @_linear_kernel(%arg0: i32, %arg1: i32, %arg2: memref<16x256xf32, #tpu.memory_space<vmem>>, %arg3: memref<256x128xbf16, #tpu.memory_space<vmem>>, %arg4: memref<1x128xf32, #tpu.memory_space<vmem>>, %arg5: memref<16x128xf32, #tpu.memory_space<vmem>>) attributes {dimension_semantics = [#tpu.dimension_semantics<parallel>, #tpu.dimension_semantics<parallel>], iteration_bounds = array<i64: 1, 1>, scalar_prefetch = 0 : i64, scratch_operands = 0 : i64, tpu.core_type = #tpu.core_type<tc>, window_params = [{transform_indices = @transform_0, window_bounds = array<i64: 16, 256>}, {transform_indices = @transform_1, window_bounds = array<i64: 256, 128>}, {transform_indices = @transform_2, window_bounds = array<i64: 1, 128>}, {transform_indices = @transform_3, window_bounds = array<i64: 16, 128>}]} {
    %c0 = arith.constant 0 : index
    %c0_0 = arith.constant 0 : index
    %0 = vector.load %arg2[%c0, %c0_0] : memref<16x256xf32, #tpu.memory_space<vmem>>, vector<16x256xf32>
    %1 = arith.truncf %0 : vector<16x256xf32> to vector<16x256xbf16>
    %c0_1 = arith.constant 0 : index
    %c0_2 = arith.constant 0 : index
    %2 = vector.load %arg3[%c0_1, %c0_2] : memref<256x128xbf16, #tpu.memory_space<vmem>>, vector<256x128xbf16>
    %cst = arith.constant dense<0.000000e+00> : vector<16x128xf32>
    %3 = tpu.matmul %1, %2, %cst {dimension_numbers = #tpu.dot_dimension_numbers<[1], [0], [0], [1], [0, 0, 1, 1], [], []>} : vector<16x256xbf16>, vector<256x128xbf16>, vector<16x128xf32> -> vector<16x128xf32>
    %c0_3 = arith.constant 0 : index
    %c0_4 = arith.constant 0 : index
    %4 = vector.load %arg4[%c0_3, %c0_4] : memref<1x128xf32, #tpu.memory_space<vmem>>, vector<1x128xf32>
    %5 = vector.broadcast %4 : vector<1x128xf32> to vector<16x128xf32>
    %6 = arith.addf %3, %5 : vector<16x128xf32>
    %c0_5 = arith.constant 0 : index
    %c0_6 = arith.constant 0 : index
    %7 = vector.load %arg5[%c0_5, %c0_6] : memref<16x128xf32, #tpu.memory_space<vmem>>, vector<16x128xf32>
    tpu.vector_store %arg5[%c0_5, %c0_6], %6 {strides = array<i32>} : memref<16x128xf32, #tpu.memory_space<vmem>>, vector<16x128xf32>,
    return
  }
  func.func @transform_0(%arg0: i32, %arg1: i32) -> (i32, i32) {
    %c0_i32 = arith.constant 0 : i32
    %c0_i32_0 = arith.constant 0 : i32
    return %arg1, %c0_i32 : i32, i32
  }
  func.func @transform_1(%arg0: i32, %arg1: i32) -> (i32, i32) {
    %c0_i32 = arith.constant 0 : i32
    %c0_i32_0 = arith.constant 0 : i32
    return %c0_i32, %arg0 : i32, i32
  }
  func.func @transform_2(%arg0: i32, %arg1: i32) -> (i32, i32) {
    %c0_i32 = arith.constant 0 : i32
    %c0_i32_0 = arith.constant 0 : i32
    return %c0_i32, %arg0 : i32, i32
  }
  func.func @transform_3(%arg0: i32, %arg1: i32) -> (i32, i32) {
    %c0_i32 = arith.constant 0 : i32
    return %arg1, %arg0 : i32, i32
  }
}

</mosaic_0001>

<bundles_post_ra>
// kernel: _lambda_.5
= control target key start
LH: loop header
LB: loop body
LE: loop exit
PB: predicated region body
PF: predicated region fallthrough
CT: control target
= control target key end

     0   :  { %s347_s1 = inlined_call_operand.vmem [shape: bf16[256,128], index: 1, kind: input, shape index: {}]   ;;  %s348_s0 = inlined_call_operand.vmem [shape: f32[16,256], index: 0, kind: input, shape index: {}]   ;;  %s349_s2 = inlined_call_operand.vmem [shape: f32[1,128], index: 2, kind: input, shape index: {}]   ;;  %s350_s3 = inlined_call_operand.vmem [shape: f32[16,128], index: 3, kind: output, shape index: {}]  }
   0x1   :  { %v242_v0 = vld [vmem:[%s347_s1 + $0x40] sm:$0xff]   ;;  %v244_v2 = vld [vmem:[%s347_s1 + $0x48] sm:$0xff]   ;;  %v246_v4 = vld [vmem:[%s347_s1 + $0x50] sm:$0xff]  }
   0x2   :  { %v243_v1 = vld [vmem:[%s347_s1] sm:$0xff]   ;;  %220 = vmatprep.subr.bf16.mxu0 %v242_v0  ;;  %v245_v3 = vld [vmem:[%s347_s1 + $0x8] sm:$0xff]   ;;  %v247_v5 = vld [vmem:[%s347_s1 + $0x10] sm:$0xff]  }
   0x3   :  { %221 = vmatpush3.bf16.msra.mxu0 %v243_v1  ;;  %v248_v6 = vld [vmem:[%s347_s1 + $0x58] sm:$0xff]   ;;  %v250_v8 = vld [vmem:[%s347_s1 + $0x60] sm:$0xff]   ;;  %v252_v10 = vld [vmem:[%s347_s1 + $0x68] sm:$0xff]  }
   0x4   :  { %222 = vmatprep.subr.bf16.mxu0 %v244_v2  ;;  %v249_v7 = vld [vmem:[%s347_s1 + $0x18] sm:$0xff]   ;;  %v251_v9 = vld [vmem:[%s347_s1 + $0x20] sm:$0xff]   ;;  %v16_v11 = vld [vmem:[%s348_s0 + $0x8] sm:$0xff] }
   0x5   :  { %v18_v12 = vld [vmem:[%s348_s0 + $0x18] sm:$0xff]  ;;  %v253_v14 = vld [vmem:[%s347_s1 + $0x28] sm:$0xff]   ;;  %v254_v15 = vld [vmem:[%s347_s1 + $0x70] sm:$0xff]  }
   0x6   :  { %v20_v13 = vpack.c.bf16 %v18_v12, %v16_v11  ;;  %v255_v16 = vld [vmem:[%s347_s1 + $0x30] sm:$0xff]   ;;  %v256_v17 = vld [vmem:[%s347_s1 + $0x78] sm:$0xff]   ;;  %v15_v19 = vld [vmem:[%s348_s0] sm:$0xff] }
   0x7   :  { %223 = vmatpush3.bf16.msra.mxu0 %v245_v3  ;;  %v257_v18 = vld [vmem:[%s347_s1 + $0x38] sm:$0xff]   ;;  %v17_v20 = vld [vmem:[%s348_s0 + $0x10] sm:$0xff]  ;;  %v203_v23 = vld [vmem:[%s349_s2] ss:$0 sm:$0xff] }
   0x8   :  { %224 = vmatprep.subr.bf16.mxu0 %v246_v4  ;;  %188 = vmatprep.mubr.bf16.mxu0 %v20_v13  ;;  %v19_v21 = vpack.c.bf16 %v17_v20, %v15_v19 }
   0xb   :  { %225 = vmatpush3.bf16.msra.mxu0 %v247_v5 }
   0xc   :  { %226 = vmatprep.subr.bf16.mxu0 %v248_v6 }
   0xf   :  { %227 = vmatpush3.bf16.msra.mxu0 %v249_v7 }
  0x10   :  { %228 = vmatprep.subr.bf16.mxu0 %v250_v8 }
  0x13   :  { %229 = vmatpush3.bf16.msra.mxu0 %v251_v9 }
  0x14   :  { %230 = vmatprep.subr.bf16.mxu0 %v252_v10 }
  0x17   :  { %231 = vmatpush3.bf16.msra.mxu0 %v253_v14 }
  0x18   :  { %232 = vmatprep.subr.bf16.mxu0 %v254_v15 }
  0x1b   :  { %233 = vmatpush3.bf16.msra.mxu0 %v255_v16 }
  0x1c   :  { %234 = vmatprep.subr.bf16.mxu0 %v256_v17 }
  0x1f   :  { %235 = vmatpush3.bf16.msra.mxu0 %v257_v18 }
  0x22   :  { %189 = vmatmul.mubr.bf16.vlgmr.msra.gmra.mrb[0].mxu0 %v19_v21 }
  0xf5   :  { %v236_v22 = vpop.f32.mrb[0].mxu0 }
  0xf6   :  { %v237_v24 = vpop.f32.mrb[1].mxu0 }
  0xf7   :  { %v238_v25 = vadd.f32 %v237_v24, %v236_v22  ;;  %v239_v26 = vpop.f32.mrb[2].mxu0 }
  0xf8   :  { %v240_v27 = vpop.f32.mrb[3].mxu0 }
  0xf9   :  { %v191_v28 = vadd.f32 %v238_v25, %v203_v23  ;;  %v241_v29 = vadd.f32 %v240_v27, %v239_v26 }
  0xfb   :  { %197 = vst [vmem:[%s350_s3] sm:$0xff] %v191_v28  ;;  %v194_v30 = vadd.f32 %v241_v29, %v203_v23 }
  0xfd   :  { %198 = vst [vmem:[%s350_s3 + $0x8] sm:$0xff] %v194_v30 }

// kernel: _lambda_.4
= control target key start
LH: loop header
LB: loop body
LE: loop exit
PB: predicated region body
PF: predicated region fallthrough
CT: control target
= control target key end

     0   :  { %s1884_s24 = smov 0   ;;  %s2259_s0 = inlined_call_operand.vmem [shape: f32[2,8,8,128], index: 0, kind: input, shape index: {}]   ;;  %s2260_s1 = inlined_call_operand.vmem [shape: f32[8,8,1], index: 1, kind: input, shape index: {}]   ;;  %s2261_s2 = inlined_call_operand.vmem [shape: bf16[2,128,512], index: 2, kind: input, shape index: {}]   ;;  %s2262_s3 = inlined_call_operand.vmem [shape: bf16[2,128,512], index: 3, kind: input, shape index: {}]   ;;  %s2263_s4 = inlined_call_operand.vmem [shape: f32[2,1,512], index: 4, kind: input, shape index: {}]   ;;  %s2264_s5 = inlined_call_operand.vmem [shape: bf16[2,128,128], index: 5, kind: input, shape index: {}]   ;;  %s2265_s6 = inlined_call_operand.vmem [shape: f32[2,1,128], index: 6, kind: input, shape index: {}]   ;;  %s2266_s7 = inlined_call_operand.vmem [shape: f32[2,8,8,128], index: 7, kind: output, shape index: {}]  }
   0x1 LB: > { %s1531_s25 = sadd.s32 4294967295, %s1828_s24   ;;  %p1535_p0 = scmp.ge.s32.totalorder %s1828_s24, 1  ;;  %s1828_s24 = sphi %s1884_s24, %s17_s24  }
   0x2   : > { %p284_p1 = scmp.lt.s32.totalorder %s1828_s24, 3 }
   0x4   : > { %p285_p2 = pnand %p1535_p0, %p284_p1 }
   0x5   : > { %p338_p3 = scmp.lt.s32.totalorder (!%p285_p2), %s1531_s25, 1  ;;  %v1842_v0 = vmov (!%p285_p2), 0   ;;  %s2122_s30 = smov (!%p285_p2), 0  }
   0x6   : > { %288 = sbr.rel (%p285_p2) target bundleno = 913 (0x391), region = 48  ;;  %635 = vmatprep.mubr.bf16.mxu0 (!%p285_p2), %v1842_v0  ;;  %708 = vmatprep.mubr.bf16.mxu1 (!%p285_p2), %v1842_v0 }
   0xd   : > { %s2268_s25 = smov (!%p338_p3, %s1531_s25), 1 }
   0xe   : > { %s1637_s26 = sshll.u32 %s2268_s25, 8  ;;  %s364_s29 = scalar_lea.vmem %s2265_s6, %s2268_s25 }
   0xf   : > { %s1904_s9 = scalar_lea.vmem %s2261_s2, %s1637_s26  ;;  %s1909_s12 = scalar_lea.vmem %s2262_s3, %s1637_s26 }
  0x10   : > { %v1736_v1 = vld [vmem:[%s1904_s9 + $0x4] ss:$16 sps:$4 sm:$0xff]   ;;  %s1913_s13 = sshll.u32 %s2268_s25, 6  ;;  %v1919_v3 = vld [vmem:[%s1909_s12 + $0x8] sm:$0xff]  ;;  %v1931_v5 = vld [vmem:[%s1909_s12 + $0x18] sm:$0xff]  ;;  %s1542_s23 = sshll.u32 %s2268_s25, 2 }
  0x11   : > { %v1916_v2 = vld [vmem:[%s1909_s12] sm:$0xff]  ;;  %v1922_v4 = vld [vmem:[%s1909_s12 + $0x10] sm:$0xff]  ;;  %s1928_s16 = scalar_lea.vmem %s2264_s5, %s1913_s13  ;;  %603 = vmatprep.subr.bf16.mxu0 %v1736_v1  ;;  %v1937_v7 = vld [vmem:[%s1909_s12 + $0x28] sm:$0xff]  ;;  %s1943_s19 = scalar_lea.vmem %s2266_s7, %s1913_s13 }
  0x12   : > { %v1934_v6 = vld [vmem:[%s1909_s12 + $0x20] sm:$0xff]  ;;  %v1946_v8 = vld [vmem:[%s1909_s12 + $0x30] sm:$0xff]  ;;  %v1949_v9 = vld [vmem:[%s1909_s12 + $0x38] sm:$0xff]  ;;  %s2055_s22 = scalar_lea.vmem %s2259_s0, %s1913_s13  ;;  %s356_s28 = scalar_lea.vmem %s2263_s4, %s1542_s23 }
  0x13   : > { %v1952_v10 = vld [vmem:[%s1909_s12 + $0x40] sm:$0xff]  ;;  %v1955_v11 = vld [vmem:[%s1909_s12 + $0x48] sm:$0xff]  ;;  %v1958_v12 = vld [vmem:[%s1909_s12 + $0x50] sm:$0xff] }
  0x14   : > { %v1961_v13 = vld [vmem:[%s1909_s12 + $0x58] sm:$0xff]  ;;  %v1964_v14 = vld [vmem:[%s1909_s12 + $0x60] sm:$0xff]  ;;  %v1967_v15 = vld [vmem:[%s1909_s12 + $0x68] sm:$0xff] }
  0x15   : > { %v1970_v16 = vld [vmem:[%s1909_s12 + $0x70] sm:$0xff]  ;;  %v1973_v17 = vld [vmem:[%s1909_s12 + $0x78] sm:$0xff]  ;;  %v1976_v18 = vld [vmem:[%s1909_s12 + $0x80] sm:$0xff] }
  0x16   : > { %v1979_v19 = vld [vmem:[%s1909_s12 + $0x88] sm:$0xff]  ;;  %v1982_v20 = vld [vmem:[%s1909_s12 + $0x90] sm:$0xff]  ;;  %v1985_v21 = vld [vmem:[%s1909_s12 + $0x98] sm:$0xff] }
  0x17   : > { %v1988_v22 = vld [vmem:[%s1909_s12 + $0xa0] sm:$0xff]  ;;  %v1991_v23 = vld [vmem:[%s1909_s12 + $0xa8] sm:$0xff]  ;;  %v1994_v24 = vld [vmem:[%s1909_s12 + $0xb0] sm:$0xff] }
  0x18   : > { %v1997_v25 = vld [vmem:[%s1909_s12 + $0xb8] sm:$0xff]  ;;  %v2000_v26 = vld [vmem:[%s1909_s12 + $0xc0] sm:$0xff]  ;;  %v2003_v27 = vld [vmem:[%s1909_s12 + $0xc8] sm:$0xff] }
  0x19   : > { %v2006_v28 = vld [vmem:[%s1909_s12 + $0xd0] sm:$0xff]  ;;  %v2009_v29 = vld [vmem:[%s1909_s12 + $0xd8] sm:$0xff]  ;;  %v2012_v30 = vld [vmem:[%s1909_s12 + $0xe0] sm:$0xff] }
  0x1a   : > { %v2015_v31 = vld [vmem:[%s1909_s12 + $0xe8] sm:$0xff]  ;;  %v2018_v32 = vld [vmem:[%s1909_s12 + $0xf0] sm:$0xff]  ;;  %v2021_v33 = vld [vmem:[%s1909_s12 + $0xf8] sm:$0xff] }
  0x1b   : > { %v1738_v34 = vld [vmem:[%s1904_s9 + $0xc] ss:$16 sps:$4 sm:$0xff]   ;;  %v1740_v35 = vld [vmem:[%s1904_s9] ss:$16 sps:$4 sm:$0xff]   ;;  %v1741_v36 = vld [vmem:[%s1904_s9 + $0x8] ss:$16 sps:$4 sm:$0xff]  }
  0x1c   : > { %676 = vmatprep.subr.bf16.mxu1 %v1738_v34  ;;  %604 = vmatpush1.bf16.msra.mxu0 %v1740_v35  ;;  %v1742_v37 = vld [vmem:[%s1904_s9 + $0x24] ss:$16 sps:$4 sm:$0xff]   ;;  %v1744_v38 = vld [vmem:[%s1904_s9 + $0x2c] ss:$16 sps:$4 sm:$0xff]   ;;  %v1746_v39 = vld [vmem:[%s1904_s9 + $0x20] ss:$16 sps:$4 sm:$0xff]  }
  0x1d   : > { %677 = vmatpush1.bf16.msra.mxu1 %v1741_v36  ;;  %v1747_v40 = vld [vmem:[%s1904_s9 + $0x28] ss:$16 sps:$4 sm:$0xff]   ;;  %605 = vmatprep.subr.bf16.mxu0 %v1742_v37  ;;  %v1748_v41 = vld [vmem:[%s1904_s9 + $0x44] ss:$16 sps:$4 sm:$0xff]   ;;  %v1750_v42 = vld [vmem:[%s1904_s9 + $0x4c] ss:$16 sps:$4 sm:$0xff]  }
  0x1e   : > { %678 = vmatprep.subr.bf16.mxu1 %v1744_v38  ;;  %v1752_v43 = vld [vmem:[%s1904_s9 + $0x40] ss:$16 sps:$4 sm:$0xff]   ;;  %v1753_v44 = vld [vmem:[%s1904_s9 + $0x48] ss:$16 sps:$4 sm:$0xff]   ;;  %v1754_v45 = vld [vmem:[%s1904_s9 + $0x64] ss:$16 sps:$4 sm:$0xff]  }
  0x1f   : > { %v1756_v46 = vld [vmem:[%s1904_s9 + $0x6c] ss:$16 sps:$4 sm:$0xff]   ;;  %v1758_v47 = vld [vmem:[%s1904_s9 + $0x60] ss:$16 sps:$4 sm:$0xff]   ;;  %v1759_v48 = vld [vmem:[%s1904_s9 + $0x68] ss:$16 sps:$4 sm:$0xff]  }
  0x20   : > { %606 = vmatpush1.bf16.msra.mxu0 %v1746_v39  ;;  %v1760_v49 = vld [vmem:[%s1904_s9 + $0x84] ss:$16 sps:$4 sm:$0xff]   ;;  %v1762_v50 = vld [vmem:[%s1904_s9 + $0x8c] ss:$16 sps:$4 sm:$0xff]   ;;  %v1764_v51 = vld [vmem:[%s1904_s9 + $0x80] ss:$16 sps:$4 sm:$0xff]  }
  0x21   : > { %679 = vmatpush1.bf16.msra.mxu1 %v1747_v40  ;;  %607 = vmatprep.subr.bf16.mxu0 %v1748_v41  ;;  %v1765_v52 = vld [vmem:[%s1904_s9 + $0x88] ss:$16 sps:$4 sm:$0xff]   ;;  %v1766_v53 = vld [vmem:[%s1904_s9 + $0xa4] ss:$16 sps:$4 sm:$0xff]   ;;  %v1768_v54 = vld [vmem:[%s1904_s9 + $0xac] ss:$16 sps:$4 sm:$0xff]  }
  0x22   : > { %680 = vmatprep.subr.bf16.mxu1 %v1750_v42  ;;  %v1770_v55 = vld [vmem:[%s1904_s9 + $0xa0] ss:$16 sps:$4 sm:$0xff]   ;;  %v1771_v56 = vld [vmem:[%s1904_s9 + $0xa8] ss:$16 sps:$4 sm:$0xff]   ;;  %v1772_v57 = vld [vmem:[%s1904_s9 + $0xc4] ss:$16 sps:$4 sm:$0xff]  }
  0x23   : > { %v1774_v58 = vld [vmem:[%s1904_s9 + $0xcc] ss:$16 sps:$4 sm:$0xff]   ;;  %v1776_v59 = vld [vmem:[%s1904_s9 + $0xc0] ss:$16 sps:$4 sm:$0xff]   ;;  %v1777_v60 = vld [vmem:[%s1904_s9 + $0xc8] ss:$16 sps:$4 sm:$0xff]  }
  0x24   : > { %608 = vmatpush1.bf16.msra.mxu0 %v1752_v43  ;;  %v1778_v61 = vld [vmem:[%s1904_s9 + $0xe4] ss:$16 sps:$4 sm:$0xff]   ;;  %v1780_v62 = vld [vmem:[%s1904_s9 + $0xec] ss:$16 sps:$4 sm:$0xff]   ;;  %v1782_v63 = vld [vmem:[%s1904_s9 + $0xe0] ss:$16 sps:$4 sm:$0xff]  }
  0x25   : > { %681 = vmatpush1.bf16.msra.mxu1 %v1753_v44  ;;  %609 = vmatprep.subr.bf16.mxu0 %v1754_v45  ;;  %v371_v1 = vld [vmem:[%s2055_s22] sm:$0xff]  ;;  %v372_v34 = vld [vmem:[%s2055_s22 + $0x8] sm:$0xff]  ;;  %v373_v37 = vld [vmem:[%s2055_s22 + $0x10] sm:$0xff] }
  0x26   : > { %682 = vmatprep.subr.bf16.mxu1 %v1756_v46  ;;  %v1783_v35 = vld [vmem:[%s1904_s9 + $0xe8] ss:$16 sps:$4 sm:$0xff]   ;;  %v1641_v36 = vpack.c.bf16 %v372_v34, %v371_v1  ;;  %v375_v40 = vld [vmem:[%s2055_s22 + $0x20] sm:$0xff]  ;;  %v377_v43 = vld [vmem:[%s2055_s22 + $0x30] sm:$0xff]  ;;  %v751_v46 = vlaneseq }
  0x27   : > { %v374_v38 = vld [vmem:[%s2055_s22 + $0x18] sm:$0xff]  ;;  %v376_v41 = vld [vmem:[%s2055_s22 + $0x28] sm:$0xff] }
  0x28   : > { %610 = vmatpush1.bf16.msra.mxu0 %v1758_v47  ;;  %v1642_v39 = vpack.c.bf16 %v374_v38, %v373_v37  ;;  %v1643_v42 = vpack.c.bf16 %v376_v41, %v375_v40  ;;  %v378_v44 = vld [vmem:[%s2055_s22 + $0x38] sm:$0xff]  ;;  %v752_v47 = vshrl.u32 %v751_v46, 7 }
  0x29   : > { %683 = vmatpush1.bf16.msra.mxu1 %v1759_v48  ;;  %611 = vmatprep.subr.bf16.mxu0 %v1760_v49  ;;  %v1644_v45 = vpack.c.bf16 %v378_v44, %v377_v43  ;;  %v749_v49 = vld [vmem:[%s356_s28] sm:$0xf] }
  0x2a   : > { %684 = vmatprep.subr.bf16.mxu1 %v1762_v50  ;;  %v753_v48 = vsub.s32 0, %v752_v47  ;;  %v761_v50 = vsub.s32 2, %v752_v47 }
  0x2c   : > { %612 = vmatpush1.bf16.msra.mxu0 %v1764_v51  ;;  %v757_v51 = vsub.s32 1, %v752_v47 }
  0x2d   : > { %685 = vmatpush1.bf16.msra.mxu1 %v1765_v52  ;;  %613 = vmatprep.subr.bf16.mxu0 %v1766_v53  ;;  %v765_v52 = vsub.s32 3, %v752_v47  ;;  %v2078_v53 = vrot.slane %v749_v49, %v753_v48 }
  0x2e   : > { %686 = vmatprep.subr.bf16.mxu1 %v1768_v54  ;;  %v2080_v54 = vrot.slane %v749_v49, %v761_v50 }
  0x30   : > { %614 = vmatpush1.bf16.msra.mxu0 %v1770_v55  ;;  %v2082_v55 = vrot.slane %v749_v49, %v757_v51 }
  0x31   : > { %687 = vmatpush1.bf16.msra.mxu1 %v1771_v56  ;;  %615 = vmatprep.subr.bf16.mxu0 %v1772_v57  ;;  %v2084_v56 = vrot.slane %v749_v49, %v765_v52 }
  0x32   : > { %688 = vmatprep.subr.bf16.mxu1 %v1774_v58 }
  0x34   : > { %616 = vmatpush1.bf16.msra.mxu0 %v1776_v59 }
  0x35   : > { %689 = vmatpush1.bf16.msra.mxu1 %v1777_v60  ;;  %617 = vmatprep.subr.bf16.mxu0 %v1778_v61 }
  0x36   : > { %690 = vmatprep.subr.bf16.mxu1 %v1780_v62 }
  0x38   : > { %618 = vmatpush1.bf16.msra.mxu0 %v1782_v63 }
  0x39   : > { %691 = vmatpush1.bf16.msra.mxu1 %v1783_v35 }
  0x3b   : > { %636 = vmatmul.mubr.bf16.vlgmr.msra.gmra.mrb[0].mxu0 %v1641_v36 }
  0x3c   : > { %709 = vmatmul.mubr.bf16.vlgmr.msra.gmra.mrb[0].mxu1 %v1641_v36  ;;  %645 = vmatprep.mubr.bf16.mxu0 %v1842_v0 }
  0x3d   : > { %718 = vmatprep.mubr.bf16.mxu1 %v1842_v0 }
  0x43   : > { %646 = vmatmul.mubr.bf16.gmra.mrb[4].mxu0 %v1642_v39 }
  0x44   : > { %719 = vmatmul.mubr.bf16.gmra.mrb[4].mxu1 %v1642_v39  ;;  %655 = vmatprep.mubr.bf16.mxu0 %v1842_v0 }
  0x45   : > { %728 = vmatprep.mubr.bf16.mxu1 %v1842_v0 }
  0x4b   : > { %656 = vmatmul.mubr.bf16.gmra.mrb[8].mxu0 %v1643_v42 }
  0x4c   : > { %729 = vmatmul.mubr.bf16.gmra.mrb[8].mxu1 %v1643_v42  ;;  %665 = vmatprep.mubr.bf16.mxu0 %v1842_v0 }
  0x4d   : > { %738 = vmatprep.mubr.bf16.mxu1 %v1842_v0 }
  0x53   : > { %666 = vmatmul.mubr.bf16.gmra.mrb[12].mxu0 %v1644_v45 }
  0x54   : > { %739 = vmatmul.mubr.bf16.gmra.mrb[12].mxu1 %v1644_v45 }
 0x10e   : > { %v637_v57 = vpop.f32.mrb[0].mxu0 }
 0x10f   : > { %v771_v58 = vadd.f32 %v2078_v53, %v637_v57  ;;  %v710_v59 = vpop.f32.mrb[0].mxu1  ;;  %v639_v60 = vpop.f32.mrb[1].mxu0 }
 0x110   : > { %v773_v61 = vadd.f32 %v2080_v54, %v710_v59  ;;  %v772_v62 = vadd.f32 %v2082_v55, %v639_v60  ;;  %v712_v63 = vpop.f32.mrb[1].mxu1  ;;  %v641_v1 = vpop.f32.mrb[2].mxu0 }
 0x111   : > { %803 = vst [vmem:[#allocation2] sm:$0xff] %v771_v58  ;;  %v774_v34 = vadd.f32 %v2084_v56, %v712_v63  ;;  %v775_v35 = vadd.f32 %v2078_v53, %v641_v1  ;;  %v714_v36 = vpop.f32.mrb[2].mxu1  ;;  %v643_v37 = vpop.f32.mrb[3].mxu0 }
 0x112   : > { %805 = vst [vmem:[#allocation2 + $0x10] sm:$0xff] %v773_v61  ;;  %804 = vst [vmem:[#allocation2 + $0x8] sm:$0xff] %v772_v62  ;;  %v777_v38 = vadd.f32 %v2080_v54, %v714_v36  ;;  %v776_v39 = vadd.f32 %v2082_v55, %v643_v37  ;;  %v716_v40 = vpop.f32.mrb[3].mxu1 }
 0x113   : > { %806 = vst [vmem:[#allocation2 + $0x18] sm:$0xff] %v774_v34  ;;  %807 = vst [vmem:[#allocation2 + $0x20] sm:$0xff] %v775_v35  ;;  %v778_v41 = vadd.f32 %v2084_v56, %v716_v40 }
 0x114   : > { %809 = vst [vmem:[#allocation2 + $0x30] sm:$0xff] %v777_v38  ;;  %808 = vst [vmem:[#allocation2 + $0x28] sm:$0xff] %v776_v39 }
 0x115   : > { %810 = vst [vmem:[#allocation2 + $0x38] sm:$0xff] %v778_v41 }
 0x116   : > { %v647_v42 = vpop.f32.mrb[4].mxu0 }
 0x117   : > { %v779_v43 = vadd.f32 %v2078_v53, %v647_v42  ;;  %v720_v44 = vpop.f32.mrb[4].mxu1  ;;  %v649_v45 = vpop.f32.mrb[5].mxu0 }
 0x118   : > { %v781_v46 = vadd.f32 %v2080_v54, %v720_v44  ;;  %v780_v47 = vadd.f32 %v2082_v55, %v649_v45  ;;  %v722_v48 = vpop.f32.mrb[5].mxu1  ;;  %v651_v49 = vpop.f32.mrb[6].mxu0 }
 0x119   : > { %811 = vst [vmem:[#allocation2 + $0x40] sm:$0xff] %v779_v43  ;;  %v782_v50 = vadd.f32 %v2084_v56, %v722_v48  ;;  %v783_v51 = vadd.f32 %v2078_v53, %v651_v49  ;;  %v724_v52 = vpop.f32.mrb[6].mxu1  ;;  %v653_v57 = vpop.f32.mrb[7].mxu0 }
 0x11a   : > { %813 = vst [vmem:[#allocation2 + $0x50] sm:$0xff] %v781_v46  ;;  %812 = vst [vmem:[#allocation2 + $0x48] sm:$0xff] %v780_v47  ;;  %v785_v58 = vadd.f32 %v2080_v54, %v724_v52  ;;  %v784_v59 = vadd.f32 %v2082_v55, %v653_v57  ;;  %v726_v60 = vpop.f32.mrb[7].mxu1 }
 0x11b   : > { %814 = vst [vmem:[#allocation2 + $0x58] sm:$0xff] %v782_v50  ;;  %815 = vst [vmem:[#allocation2 + $0x60] sm:$0xff] %v783_v51  ;;  %v786_v61 = vadd.f32 %v2084_v56, %v726_v60 }
 0x11c   : > { %817 = vst [vmem:[#allocation2 + $0x70] sm:$0xff] %v785_v58  ;;  %816 = vst [vmem:[#allocation2 + $0x68] sm:$0xff] %v784_v59 }
 0x11d   : > { %818 = vst [vmem:[#allocation2 + $0x78] sm:$0xff] %v786_v61 }
 0x11e   : > { %v657_v62 = vpop.f32.mrb[8].mxu0 }
 0x11f   : > { %v787_v63 = vadd.f32 %v2078_v53, %v657_v62  ;;  %v730_v1 = vpop.f32.mrb[8].mxu1  ;;  %v659_v34 = vpop.f32.mrb[9].mxu0 }
 0x120   : > { %v789_v35 = vadd.f32 %v2080_v54, %v730_v1  ;;  %v788_v36 = vadd.f32 %v2082_v55, %v659_v34  ;;  %v732_v37 = vpop.f32.mrb[9].mxu1  ;;  %v661_v38 = vpop.f32.mrb[10].mxu0 }
 0x121   : > { %819 = vst [vmem:[#allocation2 + $0x80] sm:$0xff] %v787_v63  ;;  %v790_v39 = vadd.f32 %v2084_v56, %v732_v37  ;;  %v791_v40 = vadd.f32 %v2078_v53, %v661_v38  ;;  %v734_v41 = vpop.f32.mrb[10].mxu1  ;;  %v663_v42 = vpop.f32.mrb[11].mxu0  ;;  %v2120_v37 = vmov 0.0  }
 0x122   : > { %821 = vst [vmem:[#allocation2 + $0x90] sm:$0xff] %v789_v35  ;;  %820 = vst [vmem:[#allocation2 + $0x88] sm:$0xff] %v788_v36  ;;  %v793_v43 = vadd.f32 %v2080_v54, %v734_v41  ;;  %v792_v44 = vadd.f32 %v2082_v55, %v663_v42  ;;  %v736_v45 = vpop.f32.mrb[11].mxu1  ;;  %v2118_v36 = vmov 0.0  }
 0x123   : > { %822 = vst [vmem:[#allocation2 + $0x98] sm:$0xff] %v790_v39  ;;  %823 = vst [vmem:[#allocation2 + $0xa0] sm:$0xff] %v791_v40  ;;  %v794_v46 = vadd.f32 %v2084_v56, %v736_v45 }
 0x124   : > { %825 = vst [vmem:[#allocation2 + $0xb0] sm:$0xff] %v793_v43  ;;  %824 = vst [vmem:[#allocation2 + $0xa8] sm:$0xff] %v792_v44 }
 0x125   : > { %826 = vst [vmem:[#allocation2 + $0xb8] sm:$0xff] %v794_v46 }
 0x126   : > { %v667_v47 = vpop.f32.mrb[12].mxu0 }
 0x127   : > { %v795_v48 = vadd.f32 %v2078_v53, %v667_v47  ;;  %v740_v49 = vpop.f32.mrb[12].mxu1  ;;  %v669_v50 = vpop.f32.mrb[13].mxu0 }
 0x128   : > { %v797_v51 = vadd.f32 %v2080_v54, %v740_v49  ;;  %v796_v52 = vadd.f32 %v2082_v55, %v669_v50  ;;  %v742_v57 = vpop.f32.mrb[13].mxu1  ;;  %v671_v58 = vpop.f32.mrb[14].mxu0 }
 0x129   : > { %827 = vst [vmem:[#allocation2 + $0xc0] sm:$0xff] %v795_v48  ;;  %v798_v59 = vadd.f32 %v2084_v56, %v742_v57  ;;  %v799_v60 = vadd.f32 %v2078_v53, %v671_v58  ;;  %v744_v61 = vpop.f32.mrb[14].mxu1  ;;  %v673_v62 = vpop.f32.mrb[15].mxu0 }
 0x12a   : > { %829 = vst [vmem:[#allocation2 + $0xd0] sm:$0xff] %v797_v51  ;;  %828 = vst [vmem:[#allocation2 + $0xc8] sm:$0xff] %v796_v52  ;;  %v801_v63 = vadd.f32 %v2080_v54, %v744_v61  ;;  %v800_v1 = vadd.f32 %v2082_v55, %v673_v62  ;;  %v746_v34 = vpop.f32.mrb[15].mxu1 }
 0x12b   : > { %830 = vst [vmem:[#allocation2 + $0xd8] sm:$0xff] %v798_v59  ;;  %831 = vst [vmem:[#allocation2 + $0xe0] sm:$0xff] %v799_v60  ;;  %v802_v35 = vadd.f32 %v2084_v56, %v746_v34 }
 0x12c   : > { %833 = vst [vmem:[#allocation2 + $0xf0] sm:$0xff] %v801_v63  ;;  %832 = vst [vmem:[#allocation2 + $0xe8] sm:$0xff] %v800_v1 }
 0x12d   : > { %834 = vst [vmem:[#allocation2 + $0xf8] sm:$0xff] %v802_v35 }
 0x12e LB: >> { %v1586_v53 = vcombine.high %v1916_v2, %v1922_v4  ;;  %v1585_v54 = vcombine.low %v1916_v2, %v1922_v4  ;;  %v1590_v55 = vcombine.high %v1934_v6, %v1946_v8  ;;  %v1588_v56 = vcombine.high %v1919_v3, %v1931_v5  ;;  %s1645_s8 = sshll.u32 %s1840_s30, 5  ;;  %s1620_s10 = sshll.u32 %s1840_s30, 3  ;;  %s1840_s30 = sphi %s2122_s30, %s872_s30   ;;  %v1836_v37 = vphi %v2120_v37, %v1152_v37   ;;  %v1832_v36 = vphi %v2118_v36, %v1150_v36  }
 0x12f   : >> { %v1587_v38 = vcombine.low %v1919_v3, %v1931_v5  ;;  %v1592_v39 = vcombine.high %v1937_v7, %v1949_v9  ;;  %v1589_v40 = vcombine.low %v1934_v6, %v1946_v8  ;;  %v1594_v41 = vcombine.high %v1952_v10, %v1958_v12  ;;  %s877_s9 = scalar_lea.vmem [#allocation2], %s1645_s8  ;;  %s1154_s11 = scalar_lea.vmem [#allocation3], %s1620_s10 }
 0x130   : >> { %1043 = vmatprep.subr.bf16.mxu0 %v1586_v53  ;;  %1084 = vmatprep.subr.bf16.mxu1 %v1588_v56  ;;  %v1591_v42 = vcombine.low %v1937_v7, %v1949_v9  ;;  %v1596_v43 = vcombine.high %v1955_v11, %v1961_v13  ;;  %v1843_v44 = vmov 0   ;;  %v1593_v45 = vcombine.low %v1952_v10, %v1958_v12  ;;  %s872_s30 = sadd.s32 1, %s1840_s30  }
 0x131   : >> { %1044 = vmatpush1.bf16.msra.mxu0 %v1585_v54  ;;  %1085 = vmatpush1.bf16.msra.mxu1 %v1587_v38  ;;  %v1598_v46 = vcombine.high %v1964_v14, %v1970_v16  ;;  %v1595_v47 = vcombine.low %v1955_v11, %v1961_v13  ;;  %v1600_v48 = vcombine.high %v1967_v15, %v1973_v17  ;;  %p869_p4 = scmp.ge.s32.totalorder %s872_s30, 8  }
 0x132   : >> { %1045 = vmatprep.subr.bf16.mxu0 %v1590_v55  ;;  %1086 = vmatprep.subr.bf16.mxu1 %v1592_v39  ;;  %v1597_v49 = vcombine.low %v1964_v14, %v1970_v16  ;;  %v1602_v50 = vcombine.high %v1976_v18, %v1982_v20  ;;  %v1599_v51 = vcombine.low %v1967_v15, %v1973_v17  ;;  %v1169_v2 = vld [vmem:[%s2260_s1 + $0x28] sm:$0xff] (%p869_p4)  ;;  %v1167_v5 = vld [vmem:[%s2260_s1 + $0x18] sm:$0xff] (%p869_p4)  ;;  %v1166_v6 = vld [vmem:[%s2260_s1 + $0x10] sm:$0xff] (%p869_p4) }
 0x133   : >> { %1075 = vmatprep.mubr.bf16.mxu0 %v1843_v44  ;;  %1116 = vmatprep.mubr.bf16.mxu1 %v1843_v44  ;;  %v1604_v52 = vcombine.high %v1979_v19, %v1985_v21  ;;  %v1601_v57 = vcombine.low %v1976_v18, %v1982_v20  ;;  %v1606_v58 = vcombine.high %v1988_v22, %v1994_v24  ;;  %v1165_v3 = vld [vmem:[%s2260_s1 + $0x8] sm:$0xff] (%p869_p4)  ;;  %v1804_v7 = vld [vmem:[%s1928_s16 + $0x10] sm:$0xff] (%p869_p4)   ;;  %v1171_v8 = vld [vmem:[%s2260_s1 + $0x38] sm:$0xff] (%p869_p4) }
 0x134   : >> { %v1603_v59 = vcombine.low %v1979_v19, %v1985_v21  ;;  %v1608_v60 = vcombine.high %v1991_v23, %v1997_v25  ;;  %v1605_v61 = vcombine.low %v1988_v22, %v1994_v24  ;;  %v1610_v62 = vcombine.high %v2000_v26, %v2006_v28  ;;  %v878_v39 = vld [vmem:[%s877_s9] sm:$0xff]  ;;  %1801 = vset.pattern.permute.xlu1 (%p869_p4), %v1842_v0  ;;  %v1803_v4 = vld [vmem:[%s1928_s16 + $0x8] sm:$0xff] (%p869_p4)   ;;  %v1170_v9 = vld [vmem:[%s2260_s1 + $0x30] sm:$0xff] (%p869_p4) }
 0x135   : >> { %1046 = vmatpush1.bf16.msra.mxu0 %v1589_v40  ;;  %1087 = vmatpush1.bf16.msra.mxu1 %v1591_v42  ;;  %v1607_v63 = vcombine.low %v1991_v23, %v1997_v25  ;;  %v1612_v1 = vcombine.high %v2003_v27, %v2009_v29  ;;  %v1609_v34 = vcombine.low %v2000_v26, %v2006_v28  ;;  %v879_v40 = vld [vmem:[%s877_s9 + $0x8] sm:$0xff]  ;;  %v1805_v10 = vld [vmem:[%s1928_s16 + $0x18] sm:$0xff] (%p869_p4)   ;;  %v1806_v11 = vld [vmem:[%s1928_s16 + $0x20] sm:$0xff] (%p869_p4)  }
 0x136   : >> { %1047 = vmatprep.subr.bf16.mxu0 %v1594_v41  ;;  %1088 = vmatprep.subr.bf16.mxu1 %v1596_v43  ;;  %v1614_v35 = vcombine.high %v2012_v30, %v2018_v32  ;;  %v1611_v53 = vcombine.low %v2003_v27, %v2009_v29  ;;  %v1616_v54 = vcombine.high %v2015_v31, %v2021_v33  ;;  %v1807_v12 = vld [vmem:[%s1928_s16 + $0x28] sm:$0xff] (%p869_p4)   ;;  %v1808_v13 = vld [vmem:[%s1928_s16 + $0x30] sm:$0xff] (%p869_p4)   ;;  %v1809_v14 = vld [vmem:[%s1928_s16 + $0x38] sm:$0xff] (%p869_p4)  }
 0x137   : >> { %v1613_v55 = vcombine.low %v2012_v30, %v2018_v32  ;;  %v1615_v56 = vcombine.low %v2015_v31, %v2021_v33  ;;  %v882_v38 = vpack.c.bf16 %v1836_v37, %v1836_v37  ;;  %v881_v37 = vld [vmem:[%s877_s9 + $0x18] sm:$0xff]  ;;  %1800 = vset.pattern.permute.xlu0 (%p869_p4), %v1842_v0  ;;  %v1802_v0 = vld [vmem:[%s1928_s16] sm:$0xff] (%p869_p4)  }
 0x139   : >> { %1048 = vmatpush1.bf16.msra.mxu0 %v1593_v45  ;;  %1089 = vmatpush1.bf16.msra.mxu1 %v1595_v47 }
 0x13a   : >> { %1049 = vmatprep.subr.bf16.mxu0 %v1598_v46  ;;  %1090 = vmatprep.subr.bf16.mxu1 %v1600_v48 }
 0x13d   : >> { %1050 = vmatpush1.bf16.msra.mxu0 %v1597_v49  ;;  %1091 = vmatpush1.bf16.msra.mxu1 %v1599_v51 }
 0x13e   : >> { %1051 = vmatprep.subr.bf16.mxu0 %v1602_v50  ;;  %1092 = vmatprep.subr.bf16.mxu1 %v1604_v52 }
 0x141   : >> { %1052 = vmatpush1.bf16.msra.mxu0 %v1601_v57  ;;  %1093 = vmatpush1.bf16.msra.mxu1 %v1603_v59 }
 0x142   : >> { %1053 = vmatprep.subr.bf16.mxu0 %v1606_v58  ;;  %1094 = vmatprep.subr.bf16.mxu1 %v1608_v60  ;;  %v880_v58 = vld [vmem:[%s877_s9 + $0x10] sm:$0xff] }
 0x145   : >> { %1054 = vmatpush1.bf16.msra.mxu0 %v1605_v61  ;;  %1095 = vmatpush1.bf16.msra.mxu1 %v1607_v63 }
 0x146   : >> { %1055 = vmatprep.subr.bf16.mxu0 %v1610_v62  ;;  %1096 = vmatprep.subr.bf16.mxu1 %v1612_v1 }
 0x149   : >> { %1056 = vmatpush1.bf16.msra.mxu0 %v1609_v34  ;;  %1097 = vmatpush1.bf16.msra.mxu1 %v1611_v53 }
 0x14a   : >> { %1057 = vmatprep.subr.bf16.mxu0 %v1614_v35  ;;  %1098 = vmatprep.subr.bf16.mxu1 %v1616_v54 }
 0x14d   : >> { %1058 = vmatpush1.bf16.msra.mxu0 %v1613_v55  ;;  %1099 = vmatpush1.bf16.msra.mxu1 %v1615_v56 }
 0x14e   : > { %1662 = vmatprep.subr.bf16.mxu0 (%p869_p4), %v1802_v0  ;;  %1686 = vmatprep.subr.bf16.mxu1 (%p869_p4), %v1802_v0 }
 0x150   : >> { %1076 = vmatmul.mubr.bf16.vlgmr.msra.gmra.mrb[0].mxu0 %v882_v38  ;;  %1117 = vmatmul.mubr.bf16.vlgmr.msra.gmra.mrb[0].mxu1 %v882_v38 }
 0x151   : > { %1663 = vmatpush3.bf16.msra.mxu0 (%p869_p4), %v1802_v0  ;;  %1694 = vmatpush3.bf16.msra.mxu1 (%p869_p4), %v1802_v0 }
 0x152   : > { %1664 = vmatprep.subr.bf16.mxu0 (%p869_p4), %v1803_v4  ;;  %1687 = vmatprep.subr.bf16.mxu1 (%p869_p4), %v1803_v4 }
 0x155   : > { %1665 = vmatpush3.bf16.msra.mxu0 (%p869_p4), %v1803_v4  ;;  %1695 = vmatpush3.bf16.msra.mxu1 (%p869_p4), %v1803_v4 }
 0x156   : > { %1666 = vmatprep.subr.bf16.mxu0 (%p869_p4), %v1804_v7  ;;  %1688 = vmatprep.subr.bf16.mxu1 (%p869_p4), %v1804_v7 }
 0x159   : > { %1667 = vmatpush3.bf16.msra.mxu0 (%p869_p4), %v1804_v7  ;;  %1696 = vmatpush3.bf16.msra.mxu1 (%p869_p4), %v1804_v7 }
 0x15a   : > { %1668 = vmatprep.subr.bf16.mxu0 (%p869_p4), %v1805_v10  ;;  %1689 = vmatprep.subr.bf16.mxu1 (%p869_p4), %v1805_v10 }
 0x15d   : > { %1669 = vmatpush3.bf16.msra.mxu0 (%p869_p4), %v1805_v10  ;;  %1697 = vmatpush3.bf16.msra.mxu1 (%p869_p4), %v1805_v10 }
 0x15e   : > { %1670 = vmatprep.subr.bf16.mxu0 (%p869_p4), %v1806_v11  ;;  %1690 = vmatprep.subr.bf16.mxu1 (%p869_p4), %v1806_v11 }
 0x161   : > { %1671 = vmatpush3.bf16.msra.mxu0 (%p869_p4), %v1806_v11  ;;  %1698 = vmatpush3.bf16.msra.mxu1 (%p869_p4), %v1806_v11 }
 0x162   : > { %1672 = vmatprep.subr.bf16.mxu0 (%p869_p4), %v1807_v12  ;;  %1691 = vmatprep.subr.bf16.mxu1 (%p869_p4), %v1807_v12 }
 0x165   : > { %1673 = vmatpush3.bf16.msra.mxu0 (%p869_p4), %v1807_v12  ;;  %1699 = vmatpush3.bf16.msra.mxu1 (%p869_p4), %v1807_v12 }
 0x166   : > { %1674 = vmatprep.subr.bf16.mxu0 (%p869_p4), %v1808_v13  ;;  %1692 = vmatprep.subr.bf16.mxu1 (%p869_p4), %v1808_v13 }
 0x169   : > { %1675 = vmatpush3.bf16.msra.mxu0 (%p869_p4), %v1808_v13  ;;  %1700 = vmatpush3.bf16.msra.mxu1 (%p869_p4), %v1808_v13 }
 0x16a   : > { %1676 = vmatprep.subr.bf16.mxu0 (%p869_p4), %v1809_v14  ;;  %1693 = vmatprep.subr.bf16.mxu1 (%p869_p4), %v1809_v14 }
 0x16d   : > { %1677 = vmatpush3.bf16.msra.mxu0 (%p869_p4), %v1809_v14  ;;  %1701 = vmatpush3.bf16.msra.mxu1 (%p869_p4), %v1809_v14 }
 0x223   : >> { %v1077_v41 = vpop.f32.mrb[0].mxu0  ;;  %v1118_v44 = vpop.f32.mrb[0].mxu1 }
 0x224   : >> { %v1125_v42 = vadd.f32 %v1077_v41, %v878_v39  ;;  %v1079_v43 = vpop.f32.mrb[1].mxu0  ;;  %v1120_v47 = vpop.f32.mrb[1].mxu1  ;;  %v1127_v60 = vadd.f32 %v1118_v44, %v880_v58  ;;  %v1168_v41 = vld [vmem:[%s2260_s1 + $0x20] sm:$0xff] (%p869_p4) }
 0x225   : >> { %v1126_v45 = vadd.f32 %v1079_v43, %v879_v40  ;;  %v1081_v46 = vpop.f32.mrb[2].mxu0  ;;  %v1122_v50 = vpop.f32.mrb[2].mxu1  ;;  %v1128_v57 = vadd.f32 %v1120_v47, %v881_v37  ;;  %1194 = vperm.xlu1 (%p869_p4), %1801, %v1168_v41  }
 0x226   : >> { %v1617_v48 = vmul.f32 -1.442695, %v1125_v42  ;;  %v1082_v49 = vpop.f32.mrb[3].mxu0  ;;  %v1123_v52 = vpop.f32.mrb[3].mxu1  ;;  %v1164_v42 = vld [vmem:[%s2260_s1] sm:$0xff] (%p869_p4) }
 0x227   : >> { %v1618_v51 = vmul.f32 -1.442695, %v1126_v45  ;;  %v1619_v59 = vmul.f32 -1.442695, %v1128_v57  ;;  %1174 = vperm.xlu0 (%p869_p4), %1800, %v1164_v42  }
 0x228   : >> { %1784 = vpow2.f32 %v1617_v48 }
 0x229   : >> { %1786 = vpow2.f32 %v1618_v51  ;;  %1199 = vperm.xlu1 (%p869_p4), %1801, %v1169_v2   ;;  %v1633_v51 = vld [vmem:[%s364_s29] ss:$0 sm:$0xff] (%p869_p4) }
 0x22a   : >> { %1788 = vpow2.f32 %v1619_v59 }
 0x22b   : >> { %1790 = vtanh.f32 %v1127_v60  ;;  %1179 = vperm.xlu0 (%p869_p4), %1800, %v1165_v3  }
 0x22d   : > { %1189 = vperm.xlu1 (%p869_p4), %1801, %v1167_v5  }
 0x22f   : > { %1184 = vperm.xlu0 (%p869_p4), %1800, %v1166_v6  }
 0x231   : > { %1209 = vperm.xlu1 (%p869_p4), %1801, %v1171_v8  }
 0x232   : >> { %v1785_v61 = vpop.eup %1784 }
 0x233   : >> { %v1787_v62 = vpop.eup %1786  ;;  %v1132_v63 = vadd.f32 1.0, %v1785_v61  ;;  %1204 = vperm.xlu0 (%p869_p4), %1800, %v1170_v9  }
 0x234   : >> { %v1138_v1 = vadd.f32 1.0, %v1787_v62  ;;  %v1789_v34 = vpop.eup %1788 }
 0x235   : >> { %1792 = vrcp.f32 %v1132_v63  ;;  %v1791_v35 = vpop.eup %1790  ;;  %v1145_v54 = vadd.f32 1.0, %v1789_v34 }
 0x236   : >> { %1794 = vrcp.f32 %v1138_v1 }
 0x237   : >> { %1796 = vrcp.f32 %v1145_v54 }
 0x23f   : >> { %v1793_v53 = vpop.eup %1792 }
 0x240   : >> { %v1795_v55 = vpop.eup %1794  ;;  %v1149_v56 = vmul.f32 %v1793_v53, %v1791_v35 }
 0x241   : >> { %v1148_v38 = vmul.f32 %v1832_v36, %v1795_v55  ;;  %v1797_v39 = vpop.eup %1796 }
 0x243   : >> { %v1150_v36 = vadd.f32 %v1149_v56, %v1148_v38  }
 0x245   : >> { %1798 = vtanh.f32 %v1150_v36 }
 0x24c   : > { %871 = sbr.rel (!%p869_p4) target bundleno = 302 (0x12e), region = 102 }
 0x24f   : >> { %v1799_v40 = vpop.eup %1798 }
 0x250   : >> { %v1152_v37 = vmul.f32 %v1799_v40, %v1797_v39  }
 0x252   : >> { %1155 = vst [vmem:[%s1154_s11] sm:$0xff] %v1152_v37 }
 0x259   : > { %v1160_v17 = vld [vmem:[#allocation3 + $0x20] sm:$0xff]  ;;  %v1161_v19 = vld [vmem:[#allocation3 + $0x28] sm:$0xff]  ;;  %v1159_v27 = vld [vmem:[#allocation3 + $0x18] sm:$0xff] }
 0x25a   : > { %v1156_v18 = vld [vmem:[#allocation3] sm:$0xff]  ;;  %v1157_v20 = vld [vmem:[#allocation3 + $0x8] sm:$0xff]  ;;  %v1158_v28 = vld [vmem:[#allocation3 + $0x10] sm:$0xff] }
 0x25b   : > { %v1163_v43 = vld [vmem:[#allocation3 + $0x38] sm:$0xff]  ;;  %v1162_v44 = vld [vmem:[#allocation3 + $0x30] sm:$0xff] }
 0x2a4   : > { %v1195_v15 = vpop.permute.xlu1 %1194 }
 0x2a5   : > { %v1216_v23 = vmul.f32 %v1195_v15, %v1160_v17 }
 0x2a6   : > { %v1175_v16 = vpop.permute.xlu0 %1174 }
 0x2a7   : > { %v1212_v24 = vmul.f32 %v1175_v16, %v1156_v18 }
 0x2a8   : > { %v1200_v21 = vpop.permute.xlu1 %1199 }
 0x2a9   : > { %v1217_v25 = vmul.f32 %v1200_v21, %v1161_v19 }
 0x2aa   : > { %v1180_v22 = vpop.permute.xlu0 %1179 }
 0x2ab   : > { %v1213_v26 = vmul.f32 %v1180_v22, %v1157_v20  ;;  %v1648_v30 = vpack.c.bf16 %v1217_v25, %v1216_v23 }
 0x2ac   : > { %v1190_v31 = vpop.permute.xlu1 %1189 }
 0x2ad   : > { %v1646_v29 = vpack.c.bf16 %v1213_v26, %v1212_v24  ;;  %v1215_v33 = vmul.f32 %v1190_v31, %v1159_v27  ;;  %1682 = vmatprep.mubr.bf16.mxu1 %v1648_v30 }
 0x2ae   : > { %v1185_v32 = vpop.permute.xlu0 %1184 }
 0x2af   : > { %v1214_v36 = vmul.f32 %v1185_v32, %v1158_v28  ;;  %1678 = vmatprep.mubr.bf16.mxu0 %v1646_v29 }
 0x2b0   : > { %v1210_v46 = vpop.permute.xlu1 %1209 }
 0x2b1   : > { %v1647_v45 = vpack.c.bf16 %v1215_v33, %v1214_v36  ;;  %v1219_v48 = vmul.f32 %v1210_v46, %v1163_v43 }
 0x2b2   : > { %v1205_v47 = vpop.permute.xlu0 %1204 }
 0x2b3   : > { %v1218_v49 = vmul.f32 %v1205_v47, %v1162_v44  ;;  %1679 = vmatmul.mubr.bf16.vlgmr.msra.gmra.mrb[0].mxu0 %v1647_v45 }
 0x2b5   : > { %v1649_v50 = vpack.c.bf16 %v1219_v48, %v1218_v49 }
 0x2b7   : > { %1683 = vmatmul.mubr.bf16.vlgmr.msra.gmra.mrb[0].mxu1 %v1649_v50 }
 0x386   : > { %v1680_v37 = vpop.f32.mrb[0].mxu0 }
 0x387   : > { %v1390_v52 = vadd.f32 %v1680_v37, %v1633_v51  ;;  %v1350_v57 = vpop.f32.mrb[1].mxu0 }
 0x388   : > { %v1388_v58 = vadd.f32 %v1633_v51, %v1350_v57  ;;  %v1681_v59 = vpop.f32.mrb[2].mxu0 }
 0x389   : > { %1398 = vst [vmem:[%s1943_s19 + $0x10] sm:$0xff] %v1390_v52  ;;  %v1391_v60 = vadd.f32 %v1681_v59, %v1633_v51  ;;  %v1353_v61 = vpop.f32.mrb[3].mxu0 }
 0x38a   : > { %1396 = vst [vmem:[%s1943_s19] sm:$0xff] %v1388_v58  ;;  %v1389_v62 = vadd.f32 %v1633_v51, %v1353_v61  ;;  %v1684_v63 = vpop.f32.mrb[0].mxu1 }
 0x38b   : > { %1399 = vst [vmem:[%s1943_s19 + $0x18] sm:$0xff] %v1391_v60  ;;  %v1394_v1 = vadd.f32 %v1684_v63, %v1633_v51  ;;  %v1366_v34 = vpop.f32.mrb[1].mxu1 }
 0x38c   : > { %1397 = vst [vmem:[%s1943_s19 + $0x8] sm:$0xff] %v1389_v62  ;;  %v1392_v35 = vadd.f32 %v1633_v51, %v1366_v34  ;;  %v1685_v53 = vpop.f32.mrb[2].mxu1 }
 0x38d   : > { %1402 = vst [vmem:[%s1943_s19 + $0x30] sm:$0xff] %v1394_v1  ;;  %v1395_v54 = vadd.f32 %v1685_v53, %v1633_v51  ;;  %v1369_v55 = vpop.f32.mrb[3].mxu1 }
 0x38e   : > { %1400 = vst [vmem:[%s1943_s19 + $0x20] sm:$0xff] %v1392_v35  ;;  %v1393_v56 = vadd.f32 %v1633_v51, %v1369_v55 }
 0x38f   : > { %1403 = vst [vmem:[%s1943_s19 + $0x38] sm:$0xff] %v1395_v54 }
 0x390   : > { %1401 = vst [vmem:[%s1943_s19 + $0x28] sm:$0xff] %v1393_v56 }
 0x391 PF: > { %s17_s24 = sadd.s32 1, %s1828_s24  }
 0x392   : > { %p14_p5 = scmp.ge.s32.totalorder %s17_s24, 4  }
 0x394   :  { %16 = sbr.rel (!%p14_p5) target bundleno = 1 (0x1), region = 113 }

// kernel: _lambda_.3
= control target key start
LH: loop header
LB: loop body
LE: loop exit
PB: predicated region body
PF: predicated region fallthrough
CT: control target
= control target key end

     0   :  { %s8002_s0 = inlined_call_operand.vmem [shape: bf16[16,6,16], index: 0, kind: input, shape index: {}]   ;;  %s8003_s1 = inlined_call_operand.vmem [shape: bf16[16,32], index: 1, kind: input, shape index: {}]   ;;  %s8004_s2 = inlined_call_operand.vmem [shape: bf16[32,32], index: 2, kind: input, shape index: {}]   ;;  %s8005_s3 = inlined_call_operand.vmem [shape: bf16[48,64], index: 3, kind: input, shape index: {}]   ;;  %s8006_s4 = inlined_call_operand.vmem [shape: f32[1,32], index: 4, kind: input, shape index: {}]   ;;  %s8007_s5 = inlined_call_operand.vmem [shape: f32[1,32], index: 5, kind: input, shape index: {}]   ;;  %s8008_s6 = inlined_call_operand.vmem [shape: f32[1,64], index: 6, kind: input, shape index: {}]   ;;  %s8009_s7 = inlined_call_operand.vmem [shape: bf16[128,128], index: 7, kind: input, shape index: {}]   ;;  %s8010_s8 = inlined_call_operand.vmem [shape: f32[1,128], index: 8, kind: input, shape index: {}]   ;;  %s8011_s9 = inlined_call_operand.vmem [shape: bf16[128,128], index: 9, kind: input, shape index: {}]   ;;  %s8012_s10 = inlined_call_operand.vmem [shape: f32[1,128], index: 10, kind: input, shape index: {}]   ;;  %s8013_s11 = inlined_call_operand.vmem [shape: bf16[128,128], index: 11, kind: input, shape index: {}]   ;;  %s8014_s12 = inlined_call_operand.vmem [shape: f32[1,128], index: 12, kind: input, shape index: {}]   ;;  %s8015_s13 = inlined_call_operand.vmem [shape: bf16[128,128], index: 13, kind: input, shape index: {}]   ;;  %s8016_s14 = inlined_call_operand.vmem [shape: f32[1,128], index: 14, kind: input, shape index: {}]   ;;  %s8017_s15 = inlined_call_operand.vmem [shape: bf16[128,128], index: 15, kind: input, shape index: {}]   ;;  %s8018_s16 = inlined_call_operand.vmem [shape: f32[1,128], index: 16, kind: input, shape index: {}]   ;;  %s8019_s17 = inlined_call_operand.hbm [shape: f32[16,128], index: 17, kind: output, shape index: {}]  }
   0x1   :  { %8055 = sst [smem:[#allocation20_spill]] %s8002_s0 }
   0x2   :  { %8056 = sst [smem:[#allocation21_spill]] %s8003_s1 }
   0x3   :  { %s8057_s26 = sld [smem:[#allocation20_spill]]  ;;  %v93_v1 = vlaneseq  ;;  %v5913_v2 = vmov 1966171168   ;;  %s8062_s22 = sld [smem:[#allocation21_spill]]  ;;  %vm760_vm0 = vcmask 130048  }
   0x4   :  { %v91_v3 = vunpack.c.l.s4 %v5913_v2  ;;  %s5914_s28 = smov 16  }
   0x5   :  { %v6037_v8 = vshrl.u32 %v93_v1, 7 }
   0x6   :  { %v92_v14 = vunpack.c.0.s8 %v91_v3 }
   0x7   :  { %8060 = vst [vmem:[#allocation7_spill] sm:$0xff] %v6037_v8 }
   0x8   :  { %v6069_v21 = vsub.s32 %v92_v14, %v6037_v8 }
   0x9   :  { %v6016_v0 = vld [vmem:[%s8057_s26 + $0x10] sm:$0x7]  ;;  %v6025_v5 = vld [vmem:[%s8057_s26 + $0xc] sm:$0x7]  ;;  %v6030_v6 = vld [vmem:[%s8057_s26 + $0x18] sm:$0x7] }
   0xa   :  { %v6020_v4 = vcombine.low %v6016_v0, %v6016_v0  ;;  %8058 = vst [vmem:[#allocation5_spill] sm:$0xff] %v6030_v6  ;;  %v6035_v7 = vld [vmem:[%s8057_s26 + $0x14] sm:$0x7]  ;;  %v6041_v9 = vcombine.low %v6025_v5, %v6025_v5  ;;  %v6045_v10 = vcombine.low %v6030_v6, %v6030_v6  ;;  %v6054_v12 = vld [vmem:[%s8057_s26 + $0x20] sm:$0x7]  ;;  %v188_v30 = vrot.slane %v6016_v0, %v6069_v21 }
   0xb   :  { %8059 = vst [vmem:[#allocation6_spill] sm:$0xff] %v6035_v7  ;;  %v6049_v11 = vcombine.low %v6035_v7, %v6035_v7  ;;  %8061 = vst [vmem:[#allocation8_spill] sm:$0xff] %v6054_v12  ;;  %v5827_v13 = vld [vmem:[%s8062_s22] sm:$0xff]   ;;  %v6066_v20 = vcombine.low %v6054_v12, %v6054_v12  ;;  %v165_v31 = vrot.slane %v6025_v5, %v6069_v21  ;;  %v6091_v37 = vld [vmem:[%s8057_s26 + $0x1c] sm:$0x7] }
   0xc   :  { %v1707_v15 = vshrl.u32 %v6020_v4, 16  ;;  %v1709_v16 = vshll.u32 %v6020_v4, 16  ;;  %v1700_v17 = vshrl.u32 %v6041_v9, 16  ;;  %v1702_v18 = vshll.u32 %v6041_v9, 16  ;;  %5645 = vmatprep.subr.bf16.mxu0 %v5827_v13  ;;  %8063 = vst [vmem:[#allocation9_spill] sm:$0xff] %v6091_v37 }
   0xd   :  { %v1723_v19 = vshll.u32 %v6045_v10, 16  ;;  %v1721_v23 = vshrl.u32 %v6045_v10, 16  ;;  %v1716_v24 = vshll.u32 %v6049_v11, 16  ;;  %5646 = vmatpush3.bf16.msra.mxu0 %v5827_v13  ;;  %v1714_v27 = vshrl.u32 %v6049_v11, 16  ;;  %v6096_v38 = vld [vmem:[%s8057_s26 + $0x2c] sm:$0x7] }
   0xe   :  { %v1711_v22 = vrot.slane %v1709_v16, 1  ;;  %v1704_v25 = vrot.slane %v1702_v18, 1  ;;  %v1735_v28 = vshrl.u32 %v6066_v20, 16  ;;  %v6081_v32 = vrot.slane %v6030_v6, %v6069_v21  ;;  %8064 = vst [vmem:[#allocation10_spill] sm:$0xff] %v6096_v38  ;;  %v6129_v52 = vld [vmem:[%s8057_s26 + $0x24] sm:$0x7] }
   0xf   :  { %v1725_v26 = vrot.slane %v1723_v19, 1  ;;  %v6085_v34 = vrot.slane %v6035_v7, %v6069_v21  ;;  %v1718_v35 = vrot.slane %v1716_v24, 1  ;;  %v1737_v36 = vshll.u32 %v6066_v20, 16  ;;  %8065 = vst [vmem:[#allocation11_spill] sm:$0xff] %v6129_v52  ;;  %v6150_v57 = vld [vmem:[%s8057_s26 + $0x28] sm:$0x7] }
  0x10   :  { %v1712_v29 = vor.u32 %v1711_v22, %v1707_v15  ;;  %v1705_v33 = vor.u32 %v1704_v25, %v1700_v17  ;;  %v189_v39 = vcombine.high %v188_v30, %v188_v30  ;;  %v6100_v41 = vrot.slane %v188_v30, %v6069_v21  ;;  %8066 = vst [vmem:[#allocation12_spill] sm:$0xff] %v6150_v57  ;;  %v6155_v58 = vld [vmem:[%s8057_s26 + $0x4] sm:$0x7]  ;;  %v6160_v59 = vld [vmem:[%s8057_s26 + $0x8] sm:$0x7] }
  0x11   :  { %v1726_v40 = vor.u32 %v1725_v26, %v1721_v23  ;;  %v166_v42 = vcombine.high %v165_v31, %v165_v31  ;;  %v6104_v43 = vrot.slane %v165_v31, %v6069_v21  ;;  %v6110_v45 = vrot.slane %v6081_v32, %v6069_v21  ;;  %8067 = vst [vmem:[#allocation13_spill] sm:$0xff] %v6155_v58  ;;  %v6200_v24 = vld [vmem:[%s8057_s26] sm:$0x7]  ;;  %v6269_v46 = vld [vmem:[%s8057_s26 + $0x3c] sm:$0x7] }
  0x12   :  { %1798 = vrot.lane.b32.xlu1 %v1712_v29, %s5914_s28  ;;  %1796 = vrot.lane.b32.xlu0 %v1705_v33, %s5914_s28  ;;  %v6116_v47 = vrot.slane %v6085_v34, %v6069_v21  ;;  %v1719_v48 = vor.u32 %v1718_v35, %v1714_v27  ;;  %v6120_v49 = vrot.slane %v6054_v12, %v6069_v21  ;;  %v1739_v50 = vrot.slane %v1737_v36, 1 }
  0x13   :  { %v6124_v51 = vrot.slane %v6091_v37, %v6069_v21  ;;  %v6132_v53 = vrot.slane %v189_v39, %v6069_v21  ;;  %v6137_v54 = vcombine.low %v6091_v37, %v6091_v37  ;;  %v6141_v55 = vrot.slane %v6096_v38, %v6069_v21  ;;  %8068 = vst [vmem:[#allocation14_spill] sm:$0xff] %v6160_v59 }
  0x14   :  { %v6145_v56 = vcombine.low %v6096_v38, %v6096_v38  ;;  %v6165_v61 = vrot.slane %v166_v42, %v6069_v21  ;;  %v1740_v63 = vor.u32 %v1739_v50, %v1735_v28  ;;  %v6176_v13 = vrot.slane %v6129_v52, %v6069_v21  ;;  %8069 = vst [vmem:[#allocation15_spill] sm:$0xff] %v6200_v24  ;;  %v6229_v42 = vld [vmem:[%s8057_s26 + $0x34] sm:$0x7] }
  0x15   :  { %v1728_v2 = vshrl.u32 %v6137_v54, 16  ;;  %v1730_v3 = vshll.u32 %v6137_v54, 16  ;;  %v6180_v14 = vrot.slane %v6120_v49, %v6069_v21  ;;  %v6189_v18 = vrot.slane %v6124_v51, %v6069_v21  ;;  %8070 = vst [vmem:[#allocation16_spill] sm:$0xff] %v6229_v42  ;;  %8073 = vst [vmem:[#allocation19_spill] sm:$0xff] %v6269_v46 }
  0x16   :  { %1802 = vrot.lane.b32.xlu1 %v1726_v40, %s5914_s28  ;;  %1800 = vrot.lane.b32.xlu0 %v1719_v48, %s5914_s28  ;;  %v1756_v16 = vshrl.u32 %v6145_v56, 16  ;;  %v1758_v17 = vshll.u32 %v6145_v56, 16  ;;  %v6195_v23 = vcombine.low %v6129_v52, %v6129_v52  ;;  %v6204_v26 = vcombine.low %v6150_v57, %v6150_v57 }
  0x17   :  { %v1732_v19 = vrot.slane %v1730_v3, 1  ;;  %v6208_v27 = vcombine.low %v6155_v58, %v6155_v58  ;;  %v6212_v28 = vcombine.low %v6160_v59, %v6160_v59  ;;  %v6216_v30 = vrot.slane %v6141_v55, %v6069_v21 }
  0x18   :  { %v1760_v25 = vrot.slane %v1758_v17, 1  ;;  %v1742_v31 = vshrl.u32 %v6195_v23, 16  ;;  %v1744_v33 = vshll.u32 %v6195_v23, 16  ;;  %v6222_v36 = vrot.slane %v6150_v57, %v6069_v21 }
  0x19   :  { %v1733_v29 = vor.u32 %v1732_v19, %v1728_v2  ;;  %v1749_v39 = vshrl.u32 %v6204_v26, 16  ;;  %v1751_v40 = vshll.u32 %v6204_v26, 16  ;;  %v1686_v50 = vshrl.u32 %v6208_v27, 16 }
  0x1a   :  { %1806 = vrot.lane.b32.xlu1 %v1740_v63, %s5914_s28  ;;  %v1761_v35 = vor.u32 %v1760_v25, %v1756_v16  ;;  %v1746_v48 = vrot.slane %v1744_v33, 1  ;;  %v1688_v63 = vshll.u32 %v6208_v27, 16  ;;  %v1693_v2 = vshrl.u32 %v6212_v28, 16  ;;  %v6246_v25 = vld [vmem:[%s8057_s26 + $0x30] sm:$0x7] }
  0x1b   :  { %1804 = vrot.lane.b32.xlu0 %v1733_v29, %s5914_s28  ;;  %v1753_v16 = vrot.slane %v1751_v40, 1  ;;  %v1695_v17 = vshll.u32 %v6212_v28, 16  ;;  %v6241_v19 = vcombine.low %v6200_v24, %v6200_v24  ;;  %8071 = vst [vmem:[#allocation17_spill] sm:$0xff] %v6246_v25  ;;  %v6251_v29 = vld [vmem:[%s8057_s26 + $0x38] sm:$0x7]  ;;  %v6255_v33 = vrot.slane %v6176_v13, %v6069_v21  ;;  %s5915_s26 = smov 32  }
  0x1c   :  { %8072 = vst [vmem:[#allocation18_spill] sm:$0xff] %v6251_v29  ;;  %v1690_v40 = vrot.slane %v1688_v63, 1  ;;  %v6259_v22 = vcombine.low %v6229_v42, %v6229_v42  ;;  %v6264_v44 = vrot.slane %v6229_v42, %v6069_v21  ;;  %v6277_v63 = vrot.slane %v6246_v25, %v6069_v21 }
  0x1d   :  { %v1754_v3 = vor.u32 %v1753_v16, %v1749_v39  ;;  %v1697_v1 = vrot.slane %v1695_v17, 1  ;;  %v1681_v15 = vshll.u32 %v6241_v19, 16  ;;  %v1679_v39 = vshrl.u32 %v6241_v19, 16 }
  0x1e   :  { %1812 = vrot.lane.b32.xlu1 %v1761_v35, %s5914_s28  ;;  %v1747_v35 = vor.u32 %v1746_v48, %v1742_v31  ;;  %v1691_v48 = vor.u32 %v1690_v40, %v1686_v50  ;;  %v1770_v60 = vshrl.u32 %v6259_v22, 16  ;;  %v1772_v62 = vshll.u32 %v6259_v22, 16 }
  0x1f   :  { %v1698_v16 = vor.u32 %v1697_v1, %v1693_v2  ;;  %v1683_v17 = vrot.slane %v1681_v15, 1  ;;  %v6288_v50 = vcombine.low %v6246_v25, %v6246_v25  ;;  %v6292_v40 = vrot.slane %v6251_v29, %v6069_v21 }
  0x20   :  { %1808 = vrot.lane.b32.xlu0 %v1747_v35, %s5914_s28  ;;  %v6284_v35 = vrot.slane %v6222_v36, %v6069_v21  ;;  %v6296_v1 = vcombine.low %v6251_v29, %v6251_v29  ;;  %v1774_v2 = vrot.slane %v1772_v62, 1  ;;  %v6306_v31 = vcombine.low %v6269_v46, %v6269_v46 }
  0x21   :  { %v1684_v25 = vor.u32 %v1683_v17, %v1679_v39  ;;  %v6311_v42 = vrot.slane %v6264_v44, %v6069_v21  ;;  %v1763_v29 = vshrl.u32 %v6288_v50, 16  ;;  %v1765_v15 = vshll.u32 %v6288_v50, 16 }
  0x22   :  { %1810 = vrot.lane.b32.xlu1 %v1754_v3, %s5914_s28  ;;  %v6302_v3 = vrot.slane %v6269_v46, %v6069_v21  ;;  %v1775_v62 = vor.u32 %v1774_v2, %v1770_v60  ;;  %v1777_v46 = vshrl.u32 %v6296_v1, 16  ;;  %v1779_v52 = vshll.u32 %v6296_v1, 16 }
  0x23   :  { %v1767_v39 = vrot.slane %v1765_v15, 1  ;;  %v1786_v8 = vshll.u32 %v6306_v31, 16  ;;  %v6329_v60 = vrot.slane %v6292_v40, %v6069_v21  ;;  %v1784_v57 = vshrl.u32 %v6306_v31, 16 }
  0x24   :  { %1792 = vrot.lane.b32.xlu0 %v1691_v48, %s5914_s28  ;;  %v6322_v48 = vrot.slane %v6277_v63, %v6069_v21  ;;  %v6337_v15 = vrot.slane %v6302_v3, %v6069_v21  ;;  %v4284_v37 = vrot.slane %v6208_v27, 1  ;;  %v4286_v7 = vrot.slane %v6041_v9, 1 }
  0x25   :  { %v1768_v38 = vor.u32 %v1767_v39, %v1763_v29  ;;  %v1788_v17 = vrot.slane %v1786_v8, 1  ;;  %v119_v29 = vrot.slane %v6155_v58, %v6069_v21  ;;  %v511_v9 = vcombine.low %v6100_v41, %v6132_v53 }
  0x26   :  { %1794 = vrot.lane.b32.xlu1 %v1698_v16, %s5914_s28  ;;  %v1781_v16 = vrot.slane %v1779_v52, 1  ;;  %v4283_v52 = vrot.slane %v6241_v19, 1  ;;  %v8075_v19 = vcombine.high %v6100_v41, %v6100_v41 }
  0x27   :  { %v1789_v8 = vor.u32 %v1788_v17, %v1784_v57  ;;  %v142_v57 = vrot.slane %v6160_v59, %v6069_v21  ;;  %v8074_v17 = vcombine.high %v6104_v43, %v6104_v43  ;;  %v127_v39 = vrot.slane %v119_v29, %v6069_v21 }
  0x28   :  { %1790 = vrot.lane.b32.xlu0 %v1684_v25, %s5914_s28  ;;  %v1782_v12 = vor.u32 %v1781_v16, %v1777_v46  ;;  %v96_v16 = vrot.slane %v6200_v24, %v6069_v21  ;;  %v512_v46 = vcombine.low %v8075_v19, %v6116_v47 }
  0x29   :  { %v143_v25 = vcombine.high %v142_v57, %v142_v57  ;;  %v150_v6 = vrot.slane %v142_v57, %v6069_v21  ;;  %v135_v19 = vcombine.high %v127_v39, %v127_v39 }
  0x2a   :  { %1816 = vrot.lane.b32.xlu1 %v1775_v62, %s5914_s28  ;;  %v97_v62 = vcombine.high %v96_v16, %v96_v16  ;;  %v104_v27 = vrot.slane %v96_v16, %v6069_v21  ;;  %v540_v57 = vrot.slane %v512_v46, %v6069_v21 }
  0x2b   :  { %v158_v16 = vcombine.high %v150_v6, %v150_v6 }
  0x2c   :  { %1814 = vrot.lane.b32.xlu0 %v1768_v38, %s5914_s28  ;;  %v510_v38 = vcombine.low %v6165_v61, %v8074_v17  ;;  %v533_v61 = vrot.slane %v511_v9, %v6069_v21  ;;  %v111_v53 = vrot.slane %v97_v62, %v6069_v21  ;;  %v112_v17 = vcombine.high %v104_v27, %v104_v27 }
  0x2d   :  { %v8076_v9 = vcombine.high %v6085_v34, %v6085_v34  ;;  %v509_v58 = vcombine.low %v158_v16, %v6104_v43 }
  0x2e   :  { %1818 = vrot.lane.b32.xlu1 %v1782_v12, %s5914_s28  ;;  %v120_v12 = vcombine.high %v119_v29, %v119_v29  ;;  %v526_v2 = vrot.slane %v510_v38, %v6069_v21  ;;  %v157_v29 = vrot.slane %v143_v25, %v6069_v21  ;;  %v461_v24 = vcombine.low %v112_v17, %v127_v39 }
  0x2f   :  { %v226_v38 = vrot.slane %v8076_v9, %v6069_v21  ;;  %v8077_v25 = vcombine.high %v6081_v32, %v6081_v32 }
  0x30   :  { %1820 = vrot.lane.b32.xlu0 %v1789_v8, %s5914_s28  ;;  %v134_v41 = vrot.slane %v120_v12, %v6069_v21  ;;  %v460_v8 = vcombine.low %v104_v27, %v111_v53  ;;  %v227_v12 = vcombine.high %v6116_v47, %v6116_v47  ;;  %v463_v59 = vcombine.low %v150_v6, %v157_v29 }
  0x31   :  { %v249_v46 = vrot.slane %v8077_v25, %v6069_v21  ;;  %v477_v39 = vrot.slane %v461_v24, %v6069_v21  ;;  %v250_v6 = vcombine.high %v6110_v45, %v6110_v45  ;;  %v519_v47 = vrot.slane %v509_v58, %v6069_v21 }
  0x32   :  { %4301 = vrot.lane.b32.xlu1 %v4284_v37, %s5915_s26  ;;  %v462_v62 = vcombine.low %v134_v41, %v135_v19  ;;  %v542_v37 = vcombine.low %v533_v61, %v540_v57  ;;  %v470_v34 = vrot.slane %v460_v8, %v6069_v21  ;;  %v491_v43 = vrot.slane %v463_v59, %v6069_v21 }
  0x33   :  { %v273_v24 = vcombine.high %v6189_v18, %v6189_v18  ;;  %v558_v17 = vcombine.low %v226_v38, %v227_v12  ;;  %v559_v41 = vcombine.low %v6110_v45, %v249_v46  ;;  %v560_v59 = vcombine.low %v250_v6, %v6189_v18 }
  0x34   :  { %4299 = vrot.lane.b32.xlu0 %v4283_v52, %s5915_s26  ;;  %v484_v27 = vrot.slane %v462_v62, %v6069_v21  ;;  %v556_v32 = vrot.slane %v542_v37, %v6069_v21  ;;  %v8078_v52 = vcombine.high %v6124_v51, %v6124_v51  ;;  %v492_v53 = vcombine.low %v470_v34, %v477_v39 }
  0x35   :  { %v8079_v58 = vcombine.high %v6120_v49, %v6120_v49  ;;  %v8080_v51 = vrot.slane %v6212_v28, 1  ;;  %v568_v9 = vrot.slane %v558_v17, %v6069_v21  ;;  %v575_v45 = vrot.slane %v559_v41, %v6069_v21 }
  0x36   :  { %4305 = vrot.lane.b32.xlu1 %v4286_v7, %s5915_s26  ;;  %v272_v61 = vrot.slane %v8078_v52, %v6069_v21  ;;  %v493_v19 = vcombine.low %v484_v27, %v491_v43  ;;  %v541_v7 = vcombine.low %v519_v47, %v526_v2  ;;  %v500_v16 = vrot.slane %v492_v53, %v6069_v21 }
  0x37   :  { %v295_v29 = vrot.slane %v8079_v58, %v6069_v21  ;;  %v8081_v2 = vrot.slane %v6049_v11, 1  ;;  %v582_v38 = vrot.slane %v560_v59, %v6069_v21  ;;  %v296_v28 = vcombine.high %v6180_v14, %v6180_v14 }
  0x38   :  { %4303 = vrot.lane.b32.xlu0 %v8080_v51, %s5915_s26  ;;  %v561_v57 = vcombine.low %v272_v61, %v273_v24  ;;  %v507_v18 = vrot.slane %v493_v19, %v6069_v21  ;;  %v549_v49 = vrot.slane %v541_v7, %v6069_v21 }
  0x3a   :  { %4309 = vrot.lane.b32.xlu1 %v8081_v2, %s5915_s26 }
  0x3b   :  { %22 = vsyncpa [#allocation3], 0  ;;  %v589_v8 = vrot.slane %v561_v57, %v6069_v21  ;;  %v590_v62 = vcombine.low %v568_v9, %v575_v45  ;;  %v8082_v12 = vcombine.high %v6176_v13, %v6176_v13  ;;  %v319_v11 = vcombine.high %v6255_v33, %v6255_v33  ;;  %v5828_v6 = vld [vmem:[%s8004_s2] sm:$0xff]   ;;  %s5919_s21 = smov 64  }
  0x3c   :  { %v508_v25 = vcombine.low %v500_v16, %v507_v18  ;;  %v557_v46 = vcombine.low %v549_v49, %v556_v32  ;;  %v8083_v34 = vcombine.high %v6222_v36, %v6222_v36  ;;  %v607_v27 = vcombine.low %v6180_v14, %v295_v29 }
  0x3d   :  { %v318_v37 = vrot.slane %v8082_v12, %v6069_v21  ;;  %v8084_v13 = vrot.slane %v6020_v4, 1  ;;  %v591_v43 = vcombine.low %v582_v38, %v589_v8  ;;  %v598_v47 = vrot.slane %v590_v62, %v6069_v21  ;;  %v5829_v62 = vld [vmem:[%s8004_s2 + $0x8] sm:$0xff]  }
  0x3e   :  { %v341_v39 = vrot.slane %v8083_v34, %v6069_v21  ;;  %v608_v32 = vcombine.low %v296_v28, %v6255_v33  ;;  %v8085_v36 = vrot.slane %v6137_v54, 1  ;;  %5647 = vmatprep.mubr.msk.bf16.mxu0 %vm760_vm0, %v508_v25  ;;  %v617_v61 = vrot.slane %v607_v27, %v6069_v21 }
  0x3f   :  { %4307 = vrot.lane.b32.xlu0 %v8084_v13, %s5915_s26  ;;  %v609_v52 = vcombine.low %v318_v37, %v319_v11  ;;  %v342_v4 = vcombine.high %v6284_v35, %v6284_v35  ;;  %5648 = vmatmul.mubr.msk.bf16.vlgmr.msra.gmra.mrb[0].mxu0 %vm760_vm0, %v557_v46  ;;  %v605_v53 = vrot.slane %v591_v43, %v6069_v21  ;;  %v8036_v17 = vmov 0.0  }
  0x40   :  { %4313 = vrot.lane.b32.xlu1 %v8085_v36, %s5915_s26  ;;  %v610_v14 = vcombine.low %v6284_v35, %v341_v39  ;;  %v624_v33 = vrot.slane %v608_v32, %v6069_v21  ;;  %5797 = vmatprep.subr.bf16.mxu1 %v8036_v17  ;;  %v8086_v41 = vcombine.high %v6141_v55, %v6141_v55  ;;  %v8088_v58 = vrot.slane %v6045_v10, 1 }
  0x41   :  { %v631_v24 = vrot.slane %v609_v52, %v6069_v21  ;;  %5799 = vmatpush3.bf16.msra.mxu1 %v5828_v6  ;;  %v365_v35 = vcombine.high %v6216_v30, %v6216_v30  ;;  %v8087_v7 = vcombine.high %v6277_v63, %v6277_v63  ;;  %v606_v29 = vcombine.low %v598_v47, %v605_v53 }
  0x42   :  { %v638_v54 = vrot.slane %v610_v14, %v6069_v21  ;;  %v364_v19 = vrot.slane %v8086_v41, %v6069_v21  ;;  %v639_v51 = vcombine.low %v617_v61, %v624_v33  ;;  %v388_v16 = vcombine.high %v6322_v48, %v6322_v48  ;;  %5659 = vmatprep.subr.bf16.mxu0 %v8036_v17 }
  0x43   :  { %v387_v59 = vrot.slane %v8087_v7, %v6069_v21  ;;  %4311 = vrot.lane.b32.xlu0 %v8088_v58, %s5915_s26  ;;  %v656_v55 = vcombine.low %v342_v4, %v6216_v30  ;;  %v8089_v57 = vrot.slane %v6195_v23, 1  ;;  %v8090_v10 = vcombine.high %v6264_v44, %v6264_v44  ;;  %5651 = vmatprep.mubr.msk.bf16.mxu0 %vm760_vm0, %v606_v29 }
  0x44   :  { %v640_v9 = vcombine.low %v631_v24, %v638_v54  ;;  %v657_v45 = vcombine.low %v364_v19, %v365_v35  ;;  %v647_v18 = vrot.slane %v639_v51, %v6069_v21  ;;  %v659_v49 = vcombine.low %v388_v16, %v6311_v42  ;;  %5798 = vmatprep.subr.bf16.mxu1 %v8036_v17 }
  0x45   :  { %4317 = vrot.lane.b32.xlu1 %v8089_v57, %s5915_s26  ;;  %v658_v63 = vcombine.low %v6322_v48, %v387_v59  ;;  %v410_v2 = vrot.slane %v8090_v10, %v6069_v21  ;;  %v666_v30 = vrot.slane %v656_v55, %v6069_v21  ;;  %v411_v23 = vcombine.high %v6311_v42, %v6311_v42  ;;  %v8098_v10 = vld [vmem:[#allocation6_spill] sm:$0xff] }
  0x46   :  { %v654_v38 = vrot.slane %v640_v9, %v6069_v21  ;;  %v673_v48 = vrot.slane %v657_v45, %v6069_v21  ;;  %v8091_v44 = vcombine.high %v6292_v40, %v6292_v40  ;;  %v8092_v42 = vrot.slane %v6066_v20, 1  ;;  %5660 = vmatpush3.bf16.msra.mxu0 %v5828_v6  ;;  %5800 = vmatpush3.bf16.msra.mxu1 %v5829_v62 }
  0x47   :  { %v680_v28 = vrot.slane %v658_v63, %v6069_v21  ;;  %v687_v12 = vrot.slane %v659_v49, %v6069_v21  ;;  %v434_v37 = vcombine.high %v6329_v60, %v6329_v60  ;;  %v8093_v40 = vcombine.high %v6302_v3, %v6302_v3  ;;  %5661 = vmatprep.subr.bf16.mxu0 %v8036_v17 }
  0x48   :  { %v433_v8 = vrot.slane %v8091_v44, %v6069_v21  ;;  %4315 = vrot.lane.b32.xlu0 %v8092_v42, %s5915_s26  ;;  %v457_v25 = vcombine.high %v6337_v15, %v6337_v15  ;;  %v8094_v46 = vrot.slane %v6145_v56, 1  ;;  %v655_v34 = vcombine.low %v647_v18, %v654_v38  ;;  %5697 = vmatprep.subr.bf16.mxu1 %v8036_v17 }
  0x49   :  { %v456_v11 = vrot.slane %v8093_v40, %v6069_v21  ;;  %v688_v20 = vcombine.low %v666_v30, %v673_v48  ;;  %v705_v39 = vcombine.low %v410_v2, %v411_v23  ;;  %v689_v13 = vcombine.low %v680_v28, %v687_v12 }
  0x4a   :  { %4321 = vrot.lane.b32.xlu1 %v8094_v46, %s5915_s26  ;;  %v706_v27 = vcombine.low %v6329_v60, %v433_v8  ;;  %v707_v43 = vcombine.low %v434_v37, %v6337_v15  ;;  %5652 = vmatmul.mubr.msk.bf16.gmra.mrb[4].mxu0 %vm760_vm0, %v655_v34  ;;  %v6529_v60 = vld [vmem:[%s8005_s3] sm:$0xff]   ;;  %v8095_v15 = vrot.slane %v6204_v26, 1  ;;  %v4295_v6 = vrot.slane %v6288_v50, 1  ;;  %v8099_v37 = vld [vmem:[#allocation8_spill] sm:$0xff] }
  0x4b   :  { %v708_v47 = vcombine.low %v456_v11, %v457_v25  ;;  %v696_v3 = vrot.slane %v688_v20, %v6069_v21  ;;  %v715_v32 = vrot.slane %v705_v39, %v6069_v21  ;;  %v703_v52 = vrot.slane %v689_v13, %v6069_v21  ;;  %5662 = vmatpush3.bf16.msra.mxu0 %v5829_v62 }
  0x4c   :  { %v722_v56 = vrot.slane %v706_v27, %v6069_v21  ;;  %4319 = vrot.lane.b32.xlu0 %v8095_v15, %s5915_s26  ;;  %v729_v36 = vrot.slane %v707_v43, %v6069_v21  ;;  %vm5917_vm1 = vmmov 0   ;;  %v8096_v61 = vrot.slane %v6259_v22, 1  ;;  %5683 = vmatprep.subr.bf16.mxu0 %v6529_v60 }
  0x4d   :  { %v736_v14 = vrot.slane %v708_v47, %v6069_v21  ;;  %5667 = vmatprep.mubr.msk.bf16.mxu1 %vm5917_vm1, %v8036_v17  ;;  %v4298_v4 = vrot.slane %v6306_v31, 1  ;;  %v704_v50 = vcombine.low %v696_v3, %v703_v52  ;;  %v4297_v24 = vrot.slane %v6296_v1, 1 }
  0x4e   :  { %4325 = vrot.lane.b32.xlu1 %v8096_v61, %s5915_s26  ;;  %v737_v26 = vcombine.low %v715_v32, %v722_v56  ;;  %v5918_v29 = vmov 1983009808   ;;  %v8100_v56 = vld [vmem:[#allocation9_spill] sm:$0xff]  ;;  %v8101_v61 = vld [vmem:[#allocation10_spill] sm:$0xff]  ;;  %vm2635_vm2 = vcmask 261120   ;;  %vm4471_vm3 = vcmask 392192  }
  0x4f   :  { %v738_v53 = vcombine.low %v729_v36, %v736_v14  ;;  %5655 = vmatprep.mubr.msk.bf16.mxu0 %vm760_vm0, %v704_v50  ;;  %v874_v51 = vunpack.c.l.s4 %v5918_v29  ;;  %vm1517_vm4 = vcmask 259072   ;;  %vm4154_vm5 = vcmask 258048  }
  0x50   :  { %v745_v33 = vrot.slane %v737_v26, %v6069_v21  ;;  %4323 = vrot.lane.b32.xlu0 %v4295_v6, %s5915_s26  ;;  %vm4596_vm6 = vcmask 519168   ;;  %vm4741_vm7 = vcmask 1041409   ;;  %vm4743_vm8 = vcmask 1042434  }
  0x51   :  { %v752_v22 = vrot.slane %v738_v53, %v6069_v21  ;;  %v875_v38 = vunpack.c.0.s8 %v874_v51  ;;  %vm4745_vm9 = vcmask 1043459   ;;  %vm4747_vm10 = vcmask 1044484  }
  0x52   :  { %4329 = vrot.lane.b32.xlu1 %v4298_v4, %s5915_s26  ;;  %vm4749_vm11 = vcmask 1045509   ;;  %vm4751_vm12 = vcmask 1046534   ;;  %vm4753_vm13 = vcmask 1047559   ;;  %vm4838_vm14 = vcmask 523264  }
  0x53   :  { %v753_v31 = vcombine.low %v745_v33, %v752_v22 }
  0x54   :  { %4327 = vrot.lane.b32.xlu0 %v4297_v24, %s5915_s26 }
  0x55   :  { %5656 = vmatmul.mubr.msk.bf16.gmra.mrb[8].mxu0 %vm760_vm0, %v753_v31 }
  0x56   :  { %5663 = vmatprep.mubr.msk.bf16.mxu0 %vm5917_vm1, %v8036_v17 }
  0x84   :  { %v1799_v54 = vpop.permute.xlu1 %1798  ;;  %v1797_v1 = vpop.permute.xlu0 %1796 }
  0x85   :  { %v6559_v41 = vsel %vm760_vm0, %v6016_v0, %v1799_v54  ;;  %v6565_v35 = vsel %vm760_vm0, %v6025_v5, %v1797_v1  ;;  %v8097_v0 = vld [vmem:[#allocation5_spill] sm:$0xff]  ;;  %v8102_v54 = vld [vmem:[#allocation7_spill] sm:$0xff] }
  0x86   :  { %v1984_v19 = vrot.slane %v6559_v41, %v6069_v21  ;;  %v1961_v7 = vrot.slane %v6565_v35, %v6069_v21  ;;  %v6623_v1 = vsub.s32 %v875_v38, %v8102_v54 }
  0x88   :  { %v1985_v59 = vcombine.high %v1984_v19, %v1984_v19  ;;  %v1803_v58 = vpop.permute.xlu1 %1802  ;;  %v1962_v16 = vcombine.high %v1961_v7, %v1961_v7  ;;  %v6570_v55 = vrot.slane %v1961_v7, %v6069_v21  ;;  %v1801_v9 = vpop.permute.xlu0 %1800  ;;  %v1992_v45 = vrot.slane %v1984_v19, %v6069_v21 }
  0x89   :  { %v6574_v57 = vsel %vm760_vm0, %v8097_v0, %v1803_v58  ;;  %v6582_v2 = vsel %vm760_vm0, %v8098_v10, %v1801_v9 }
  0x8a   :  { %v1999_v5 = vrot.slane %v1985_v59, %v6069_v21  ;;  %v2030_v63 = vrot.slane %v6574_v57, %v6069_v21  ;;  %v1976_v18 = vrot.slane %v1962_v16, %v6069_v21  ;;  %v2270_v49 = vunpack.i.h.s16 %v6570_v55 }
  0x8b   :  { %v2007_v30 = vrot.slane %v6582_v2, %v6069_v21  ;;  %v1977_v48 = vcombine.high %v6570_v55, %v6570_v55  ;;  %v2000_v62 = vcombine.high %v1992_v45, %v1992_v45 }
  0x8c   :  { %v1807_v23 = vpop.permute.xlu1 %1806  ;;  %v2272_v28 = vunpack.i.h.s16 %v1976_v18  ;;  %v2428_v42 = vcombine.low %v1992_v45, %v1999_v5  ;;  %v2031_v12 = vcombine.high %v2030_v63, %v2030_v63  ;;  %v5494_v11 = vpack.i.b16 %v1976_v18, %v2270_v49 }
  0x8d   :  { %v2008_v44 = vcombine.high %v2007_v30, %v2007_v30  ;;  %v2015_v8 = vrot.slane %v2007_v30, %v6069_v21  ;;  %v6593_v40 = vsel %vm760_vm0, %v8099_v37, %v1807_v23  ;;  %v6597_v20 = vrot.slane %v2030_v63, %v6069_v21  ;;  %v1805_v43 = vpop.permute.xlu0 %1804  ;;  %v8103_v23 = vld [vmem:[#allocation11_spill] sm:$0xff]  ;;  %v8104_v37 = vld [vmem:[#allocation12_spill] sm:$0xff] }
  0x8e   :  { %v5495_v25 = vpack.i.b16 %v1977_v48, %v2272_v28  ;;  %v2076_v13 = vrot.slane %v6593_v40, %v6069_v21  ;;  %v6603_v15 = vsel %vm760_vm0, %v8100_v56, %v1805_v43  ;;  %v6619_v33 = vrot.slane %v2428_v42, %v6069_v21 }
  0x8f   :  { %v2022_v46 = vrot.slane %v2008_v44, %v6069_v21  ;;  %v2280_v34 = vunpack.i.h.s16 %v2015_v8  ;;  %v2023_v39 = vcombine.high %v2015_v8, %v2015_v8  ;;  %v5496_v27 = vpack.i.b16 %v2015_v8, %v2000_v62 }
  0x90   :  { %v2427_v47 = vcombine.low %v5494_v11, %v5495_v25  ;;  %v1813_v6 = vpop.permute.xlu1 %1812  ;;  %v2077_v52 = vcombine.high %v2076_v13, %v2076_v13  ;;  %v6606_v36 = vrot.slane %v2076_v13, %v6069_v21  ;;  %v2053_v14 = vrot.slane %v6603_v15, %v6069_v21  ;;  %v8105_v25 = vld [vmem:[#allocation13_spill] sm:$0xff] }
  0x91   :  { %v2282_v3 = vunpack.i.h.s16 %v2022_v46  ;;  %v5497_v32 = vpack.i.b16 %v2022_v46, %v2280_v34  ;;  %v6612_v4 = vsel %vm760_vm0, %v8101_v61, %v1813_v6  ;;  %v2045_v19 = vrot.slane %v2031_v12, %v6069_v21  ;;  %v8106_v34 = vld [vmem:[#allocation14_spill] sm:$0xff] }
  0x92   :  { %v2145_v53 = vrot.slane %v6612_v4, %v6069_v21  ;;  %v2054_v24 = vcombine.high %v2053_v14, %v2053_v14  ;;  %v2061_v22 = vrot.slane %v2053_v14, %v6069_v21  ;;  %v1809_v31 = vpop.permute.xlu0 %1808  ;;  %v2091_v7 = vrot.slane %v2077_v52, %v6069_v21 }
  0x93   :  { %v6614_v26 = vpack.i.b16 %v2023_v39, %v2282_v3  ;;  %v2429_v50 = vcombine.low %v5496_v27, %v5497_v32  ;;  %v6629_v51 = vrot.slane %v2427_v47, %v6069_v21  ;;  %v2046_v16 = vcombine.high %v6597_v20, %v6597_v20 }
  0x94   :  { %v2146_v59 = vcombine.high %v2145_v53, %v2145_v53  ;;  %v2153_v58 = vrot.slane %v2145_v53, %v6069_v21  ;;  %v1811_v29 = vpop.permute.xlu1 %1810  ;;  %v2092_v0 = vcombine.high %v6606_v36, %v6606_v36  ;;  %v2068_v9 = vrot.slane %v2054_v24, %v6069_v21 }
  0x95   :  { %v2430_v45 = vcombine.low %v6614_v26, %v6597_v20  ;;  %v6639_v5 = vrot.slane %v2429_v50, %v6069_v21  ;;  %v2290_v63 = vunpack.i.h.s16 %v2061_v22  ;;  %v2069_v18 = vcombine.high %v2061_v22, %v2061_v22 }
  0x96   :  { %v2160_v10 = vrot.slane %v2146_v59, %v6069_v21  ;;  %v2292_v49 = vunpack.i.h.s16 %v2068_v9  ;;  %v5499_v30 = vpack.i.b16 %v2061_v22, %v2046_v16  ;;  %v6644_v38 = vsel %vm760_vm0, %v8103_v23, %v1809_v31  ;;  %v1793_v48 = vpop.permute.xlu0 %1792 }
  0x97   :  { %v2478_v28 = vcombine.low %v6606_v36, %v2091_v7  ;;  %v2310_v44 = vunpack.i.h.s16 %v2153_v58  ;;  %v2099_v62 = vrot.slane %v6644_v38, %v6069_v21  ;;  %v6651_v11 = vsel %vm760_vm0, %v8104_v37, %v1811_v29 }
  0x98   :  { %v2312_v8 = vunpack.i.h.s16 %v2160_v10  ;;  %v1795_v42 = vpop.permute.xlu1 %1794  ;;  %v5501_v12 = vpack.i.b16 %v2069_v18, %v2292_v49  ;;  %v6655_v46 = vsel %vm760_vm0, %v8105_v25, %v1793_v48  ;;  %v5500_v27 = vpack.i.b16 %v2068_v9, %v2290_v63 }
  0x99   :  { %v6659_v39 = vsel %vm760_vm0, %v8106_v34, %v1795_v42  ;;  %v2161_v13 = vcombine.high %v2153_v58, %v2153_v58  ;;  %v2100_v43 = vcombine.high %v2099_v62, %v2099_v62  ;;  %v2107_v47 = vrot.slane %v2099_v62, %v6069_v21  ;;  %v8107_v34 = vld [vmem:[#allocation15_spill] sm:$0xff] }
  0x9a   :  { %v2476_v3 = vcombine.low %v2045_v19, %v5499_v30  ;;  %v2122_v32 = vrot.slane %v6651_v11, %v6069_v21  ;;  %v1915_v56 = vrot.slane %v6655_v46, %v6069_v21  ;;  %v1938_v6 = vrot.slane %v6659_v39, %v6069_v21  ;;  %v1791_v52 = vpop.permute.xlu0 %1790 }
  0x9b   :  { %v6669_v36 = vrot.slane %v2478_v28, %v6069_v21  ;;  %v6671_v14 = vpack.i.b16 %v2161_v13, %v2312_v8  ;;  %v2114_v61 = vrot.slane %v2100_v43, %v6069_v21  ;;  %v2300_v50 = vunpack.i.h.s16 %v2107_v47 }
  0x9c   :  { %v1817_v53 = vpop.permute.xlu1 %1816  ;;  %v2477_v24 = vcombine.low %v5500_v27, %v5501_v12  ;;  %v6674_v22 = vpack.i.b16 %v2160_v10, %v2310_v44  ;;  %v2115_v31 = vcombine.high %v2107_v47, %v2107_v47  ;;  %v2130_v54 = vrot.slane %v2122_v32, %v6069_v21 }
  0x9d   :  { %v2302_v19 = vunpack.i.h.s16 %v2114_v61  ;;  %v2123_v7 = vcombine.high %v2122_v32, %v2122_v32  ;;  %v1916_v59 = vcombine.high %v1915_v56, %v1915_v56  ;;  %v1923_v29 = vrot.slane %v1915_v56, %v6069_v21 }
  0x9e   :  { %v6679_v16 = vrot.slane %v2476_v3, %v6069_v21  ;;  %v2138_v9 = vcombine.high %v2130_v54, %v2130_v54  ;;  %v1939_v63 = vcombine.high %v1938_v6, %v1938_v6  ;;  %v1946_v18 = vrot.slane %v1938_v6, %v6069_v21  ;;  %v1815_v49 = vpop.permute.xlu0 %1814  ;;  %v8108_v6 = vld [vmem:[#allocation16_spill] sm:$0xff] }
  0x9f   :  { %v2527_v10 = vcombine.low %v6674_v22, %v6671_v14  ;;  %v5503_v30 = vpack.i.b16 %v2114_v61, %v2300_v50  ;;  %v5504_v23 = vpack.i.b16 %v2115_v31, %v2302_v19  ;;  %v1930_v48 = vrot.slane %v1916_v59, %v6069_v21  ;;  %v8109_v19 = vld [vmem:[#allocation17_spill] sm:$0xff] }
  0xa0   :  { %v6685_v28 = vpop.permute.xlu1 %1818  ;;  %v6688_v44 = vrot.slane %v2477_v24, %v6069_v21  ;;  %v5502_v8 = vpack.i.b16 %v2107_v47, %v2092_v0  ;;  %v5505_v62 = vpack.i.b16 %v2153_v58, %v2138_v9  ;;  %v1954_v42 = vcombine.high %v1946_v18, %v1946_v18 }
  0xa1   :  { %v2137_v12 = vrot.slane %v2123_v7, %v6069_v21  ;;  %v1931_v37 = vcombine.high %v1923_v29, %v1923_v29  ;;  %v2262_v25 = vunpack.i.h.s16 %v1930_v48  ;;  %v6693_v27 = vsel %vm760_vm0, %v8107_v34, %v1791_v52 }
  0xa2   :  { %v2260_v13 = vunpack.i.h.s16 %v1923_v29  ;;  %v1953_v43 = vrot.slane %v1939_v63, %v6069_v21  ;;  %v5493_v3 = vpack.i.b16 %v6570_v55, %v1954_v42  ;;  %v1892_v32 = vrot.slane %v6693_v27, %v6069_v21  ;;  %v1821_v56 = vpop.permute.xlu0 %1820 }
  0xa3   :  { %v2479_v0 = vcombine.low %v5502_v8, %v5503_v30  ;;  %v2525_v58 = vcombine.low %v5504_v23, %v2130_v54  ;;  %v5492_v47 = vpack.i.b16 %v1931_v37, %v2262_v25  ;;  %v6701_v14 = vsel %vm760_vm0, %v8108_v6, %v1817_v53 }
  0xa4   :  { %v4302_v61 = vpop.permute.xlu1 %4301  ;;  %v2526_v50 = vcombine.low %v2137_v12, %v5505_v62  ;;  %v2381_v52 = vcombine.low %v1953_v43, %v5493_v3  ;;  %v1893_v24 = vcombine.high %v1892_v32, %v1892_v32  ;;  %v1900_v22 = vrot.slane %v1892_v32, %v6069_v21 }
  0xa5   :  { %v2380_v31 = vcombine.low %v5492_v47, %v1946_v18  ;;  %v2191_v55 = vrot.slane %v6701_v14, %v6069_v21  ;;  %v6708_v7 = vsel %vm760_vm0, %v8109_v19, %v1815_v49  ;;  %v2458_v53 = vrot.slane %v2430_v45, %v6069_v21 }
  0xa6   :  { %v5491_v54 = vpack.i.b16 %v1930_v48, %v2260_v13  ;;  %v2409_v59 = vrot.slane %v2381_v52, %v6069_v21  ;;  %v1907_v9 = vrot.slane %v1893_v24, %v6069_v21  ;;  %v1908_v63 = vcombine.high %v1900_v22, %v1900_v22  ;;  %v4300_v18 = vpop.permute.xlu0 %4299 }
  0xa7   :  { %v2402_v30 = vrot.slane %v2380_v31, %v6069_v21  ;;  %v2192_v23 = vcombine.high %v2191_v55, %v2191_v55  ;;  %v2199_v8 = vrot.slane %v2191_v55, %v6069_v21  ;;  %v2168_v49 = vrot.slane %v6708_v7, %v6069_v21  ;;  %v8111_v31 = vld [vmem:[#allocation19_spill] sm:$0xff] }
  0xa8   :  { %v6720_v62 = vpop.permute.xlu1 %4305  ;;  %v5490_v20 = vpack.i.b16 %v1923_v29, %v1908_v63  ;;  %v2378_v26 = vcombine.low %v1900_v22, %v1907_v9  ;;  %v2459_v45 = vcombine.low %v6629_v51, %v6619_v33  ;;  %v2460_v48 = vcombine.low %v6639_v5, %v2458_v53  ;;  %v8110_v22 = vld [vmem:[#allocation18_spill] sm:$0xff] }
  0xa9   :  { %v6726_v42 = vrot.slane %v2479_v0, %v6069_v21  ;;  %v6729_v12 = vrot.slane %v2525_v58, %v6069_v21  ;;  %v2411_v37 = vcombine.low %v2402_v30, %v2409_v59  ;;  %v2206_v25 = vrot.slane %v2192_v23, %v6069_v21 }
  0xaa   :  { %v2379_v34 = vcombine.low %v5490_v20, %v5491_v54  ;;  %v6733_v13 = vrot.slane %v2527_v10, %v6069_v21  ;;  %v2169_v29 = vcombine.high %v2168_v49, %v2168_v49  ;;  %v2176_v43 = vrot.slane %v2168_v49, %v6069_v21  ;;  %v4304_v3 = vpop.permute.xlu0 %4303 }
  0xab   :  { %v6737_v33 = vrot.slane %v2526_v50, %v6069_v21  ;;  %v2388_v51 = vrot.slane %v2378_v26, %v6069_v21  ;;  %v2207_v5 = vcombine.high %v2199_v8, %v2199_v8  ;;  %v2322_v32 = vunpack.i.h.s16 %v2206_v25 }
  0xac   :  { %v4310_v0 = vpop.permute.xlu1 %4309  ;;  %v2395_v58 = vrot.slane %v2379_v34, %v6069_v21  ;;  %v2183_v47 = vrot.slane %v2169_v29, %v6069_v21  ;;  %v2467_v6 = vrot.slane %v2459_v45, %v6069_v21  ;;  %v2474_v10 = vrot.slane %v2460_v48, %v6069_v21 }
  0xad   :  { %v2425_v52 = vrot.slane %v2411_v37, %v6069_v21  ;;  %v2320_v24 = vunpack.i.h.s16 %v2199_v8  ;;  %v6748_v50 = vsel %vm760_vm0, %v8110_v22, %v6685_v28  ;;  %v6752_v55 = vsel %vm760_vm0, %v8111_v31, %v1821_v56 }
  0xae   :  { %v2410_v19 = vcombine.low %v2388_v51, %v2395_v58  ;;  %v2184_v53 = vcombine.high %v2176_v43, %v2176_v43  ;;  %v2528_v54 = vcombine.low %v2176_v43, %v2183_v47  ;;  %v2475_v59 = vcombine.low %v2467_v6, %v2474_v10 }
  0xaf   :  { %v2557_v63 = vcombine.low %v6729_v12, %v6737_v33  ;;  %v5510_v30 = vpack.i.b16 %v2207_v5, %v2322_v32  ;;  %v2214_v23 = vrot.slane %v6748_v50, %v6069_v21  ;;  %v2237_v28 = vrot.slane %v6752_v55, %v6069_v21 }
  0xb0   :  { %v2418_v20 = vrot.slane %v2410_v19, %v6069_v21  ;;  %v2556_v56 = vrot.slane %v2528_v54, %v6069_v21  ;;  %5668 = vmatmul.mubr.msk.bf16.vlgmr.msra.gmra.mrb[0].mxu1 %vm2635_vm2, %v2475_v59  ;;  %v4334_v26 = vsel %vm2635_vm2, %v6655_v46, %v4302_v61  ;;  %v4332_v45 = vsel %vm2635_vm2, %v6693_v27, %v4300_v18  ;;  %v5831_v27 = vld [vmem:[%s8005_s3 + $0x8] sm:$0xff]  }
  0xb1   :  { %v4308_v9 = vpop.permute.xlu0 %4307  ;;  %v2215_v48 = vcombine.high %v2214_v23, %v2214_v23  ;;  %v2222_v37 = vrot.slane %v2214_v23, %v6069_v21  ;;  %v2238_v34 = vcombine.high %v2237_v28, %v2237_v28  ;;  %v2245_v29 = vrot.slane %v2237_v28, %v6069_v21  ;;  %5671 = vmatprep.mubr.msk.bf16.mxu1 %vm5917_vm1, %v8036_v17 }
  0xb2   :  { %v4314_v49 = vpop.permute.xlu1 %4313  ;;  %v2426_v43 = vcombine.low %v2418_v20, %v2425_v52  ;;  %v6771_v51 = vpack.i.b16 %v2206_v25, %v2320_v24  ;;  %v6773_v5 = vpack.i.b16 %v2199_v8, %v2184_v53  ;;  %v2508_v46 = vcombine.low %v6679_v16, %v6688_v44 }
  0xb3   :  { %v2558_v18 = vcombine.low %v6733_v13, %v2556_v56  ;;  %v2230_v32 = vcombine.high %v2222_v37, %v2222_v37  ;;  %v2252_v58 = vrot.slane %v2238_v34, %v6069_v21  ;;  %v4385_v47 = vcombine.low %v4332_v45, %v4334_v26 }
  0xb4   :  { %v2229_v25 = vrot.slane %v2215_v48, %v6069_v21  ;;  %v2575_v8 = vcombine.low %v5510_v30, %v2222_v37  ;;  %v2330_v10 = vunpack.i.h.s16 %v2245_v29  ;;  %v2509_v16 = vcombine.low %v6669_v36, %v6726_v42  ;;  %5664 = vmatmul.mubr.msk.bf16.vlgmr.msra.gmra.mrb[12].mxu0 %vm2635_vm2, %v2426_v43 }
  0xb5   :  { %v4312_v61 = vpop.permute.xlu0 %4311  ;;  %v2253_v44 = vcombine.high %v2245_v29, %v2245_v29  ;;  %v2332_v52 = vunpack.i.h.s16 %v2252_v58  ;;  %v5511_v24 = vpack.i.b16 %v2245_v29, %v2230_v32  ;;  %v4338_v13 = vsel %vm2635_vm2, %v6565_v35, %v6720_v62  ;;  %5684 = vmatpush3.bf16.msra.mxu0 %v6529_v60 }
  0xb6   :  { %v2516_v22 = vrot.slane %v2508_v46, %v6069_v21  ;;  %v2523_v31 = vrot.slane %v2509_v16, %v6069_v21  ;;  %v4336_v19 = vsel %vm2635_vm2, %v6659_v39, %v4304_v3  ;;  %v4342_v36 = vsel %vm2635_vm2, %v6582_v2, %v4310_v0  ;;  %5685 = vmatprep.subr.bf16.mxu0 %v5831_v27  ;;  %v5832_v2 = vld [vmem:[%s8005_s3 + $0x10] sm:$0xff]  }
  0xb7   :  { %v4318_v6 = vpop.permute.xlu1 %4317  ;;  %v2574_v53 = vcombine.low %v6773_v5, %v6771_v51  ;;  %v5512_v54 = vpack.i.b16 %v2252_v58, %v2330_v10  ;;  %v5513_v59 = vpack.i.b16 %v2253_v44, %v2332_v52  ;;  %v4386_v35 = vcombine.low %v4336_v19, %v4338_v13 }
  0xb8   :  { %v2576_v60 = vcombine.low %v2229_v25, %v5511_v24  ;;  %v4393_v30 = vrot.slane %v4385_v47, %v6623_v1  ;;  %v2524_v23 = vcombine.low %v2516_v22, %v2523_v31  ;;  %v4340_v28 = vsel %vm2635_vm2, %v6559_v41, %v4308_v9  ;;  %v5473_v22 = vld [vmem:[%s8006_s4] ss:$0 sm:$0xff] }
  0xb9   :  { %v2591_v39 = vrot.slane %v2575_v8, %v6069_v21  ;;  %v2577_v3 = vcombine.low %v5512_v54, %v5513_v59  ;;  %v4400_v0 = vrot.slane %v4386_v35, %v6623_v1  ;;  %v4402_v20 = vcombine.low %v4340_v28, %v4342_v36  ;;  %5686 = vmatpush3.bf16.msra.mxu0 %v5831_v27 }
  0xba   :  { %v4316_v42 = vpop.permute.xlu0 %4315  ;;  %5672 = vmatmul.mubr.msk.bf16.gmra.mrb[4].mxu1 %vm2635_vm2, %v2524_v23  ;;  %v2572_v56 = vrot.slane %v2558_v18, %v6069_v21  ;;  %v4346_v26 = vsel %vm2635_vm2, %v6603_v15, %v4314_v49  ;;  %v4344_v41 = vsel %vm2635_vm2, %v6574_v57, %v4312_v61  ;;  %v4350_v9 = vsel %vm2635_vm2, %v6644_v38, %v4318_v6 }
  0xbb   :  { %v2605_v48 = vrot.slane %v2577_v3, %v6069_v21  ;;  %v4401_v37 = vcombine.low %v4393_v30, %v4400_v0  ;;  %5675 = vmatprep.mubr.msk.bf16.mxu1 %vm5917_vm1, %v8036_v17  ;;  %v2565_v34 = vrot.slane %v2557_v63, %v6069_v21  ;;  %v4403_v29 = vcombine.low %v4344_v41, %v4346_v26 }
  0xbc   :  { %v4322_v62 = vpop.permute.xlu1 %4321  ;;  %v2598_v49 = vrot.slane %v2576_v60, %v6069_v21  ;;  %v4348_v57 = vsel %vm2635_vm2, %v6593_v40, %v4316_v42  ;;  %5687 = vmatprep.subr.bf16.mxu0 %v5832_v2  ;;  %v4410_v51 = vrot.slane %v4402_v20, %v6623_v1  ;;  %v2584_v33 = vrot.slane %v2574_v53, %v6069_v21 }
  0xbd   :  { %v4354_v38 = vsel %vm2635_vm2, %v6612_v4, %v4322_v62  ;;  %v4417_v5 = vrot.slane %v4403_v29, %v6623_v1  ;;  %5689 = vmatprep.mubr.msk.bf16.mxu0 %vm4471_vm3, %v4401_v37  ;;  %v4419_v12 = vcombine.low %v4348_v57, %v4350_v9  ;;  %5688 = vmatpush3.bf16.msra.mxu0 %v5832_v2 }
  0xbe   :  { %v4320_v45 = vpop.permute.xlu0 %4319  ;;  %v2573_v63 = vcombine.low %v2565_v34, %v2572_v56  ;;  %v2607_v46 = vcombine.low %v2598_v49, %v2605_v48  ;;  %5717 = vmatprep.subr.bf16.mxu0 %v8036_v17  ;;  %v2606_v32 = vcombine.low %v2584_v33, %v2591_v39  ;;  %v6870_v53 = vrot.slane %v5473_v22, %v6623_v1 }
  0xbf   :  { %v4352_v43 = vsel %vm2635_vm2, %v6651_v11, %v4320_v45  ;;  %v4418_v4 = vcombine.low %v4410_v51, %v4417_v5  ;;  %v4427_v58 = vrot.slane %v4419_v12, %v6623_v1  ;;  %v1130_v59 = vcombine.high %v5473_v22, %v5473_v22 }
  0xc0   :  { %v4326_v15 = vpop.permute.xlu1 %4325  ;;  %v4420_v40 = vcombine.low %v4352_v43, %v4354_v38  ;;  %v2621_v25 = vrot.slane %v2607_v46, %v6069_v21  ;;  %v2614_v16 = vrot.slane %v2606_v32, %v6069_v21  ;;  %v6879_v62 = vcombine.high %v6870_v53, %v6870_v53 }
  0xc1   :  { %v4358_v11 = vsel %vm2635_vm2, %v6701_v14, %v4326_v15  ;;  %5690 = vmatmul.mubr.msk.bf16.vlgmr.msra.gmra.mrb[16].mxu0 %vm4471_vm3, %v4418_v4  ;;  %v6882_v60 = vrot.slane %v1130_v59, %v6623_v1 }
  0xc2   :  { %v4324_v61 = vpop.permute.xlu0 %4323  ;;  %v4434_v47 = vrot.slane %v4420_v40, %v6623_v1  ;;  %5676 = vmatmul.mubr.msk.bf16.gmra.mrb[8].mxu1 %vm2635_vm2, %v2573_v63  ;;  %v2622_v52 = vcombine.low %v2614_v16, %v2621_v25 }
  0xc3   :  { %v4356_v27 = vsel %vm2635_vm2, %v6708_v7, %v4324_v61  ;;  %5679 = vmatprep.mubr.msk.bf16.mxu1 %vm5917_vm1, %v8036_v17 }
  0xc4   :  { %v4330_v18 = vpop.permute.xlu1 %4329  ;;  %v4435_v8 = vcombine.low %v4427_v58, %v4434_v47  ;;  %v4436_v14 = vcombine.low %v4356_v27, %v4358_v11 }
  0xc5   :  { %v4362_v6 = vsel %vm2635_vm2, %v6752_v55, %v4330_v18 }
  0xc6   :  { %v4328_v10 = vpop.permute.xlu0 %4327  ;;  %5693 = vmatprep.mubr.msk.bf16.mxu0 %vm4471_vm3, %v4435_v8  ;;  %v4444_v55 = vrot.slane %v4436_v14, %v6623_v1 }
  0xc7   :  { %v4360_v7 = vsel %vm2635_vm2, %v6748_v50, %v4328_v10 }
  0xc8   :  { %v4437_v44 = vcombine.low %v4360_v7, %v4362_v6 }
  0xca   :  { %v4451_v24 = vrot.slane %v4437_v44, %v6623_v1  ;;  %5680 = vmatmul.mubr.msk.bf16.gmra.mrb[12].mxu1 %vm2635_vm2, %v2622_v52 }
  0xcb   :  { %5713 = vmatprep.mubr.msk.bf16.mxu1 %vm5917_vm1, %v8036_v17 }
  0xcc   :  { %v4452_v13 = vcombine.low %v4444_v55, %v4451_v24 }
  0xce   :  { %5694 = vmatmul.mubr.msk.bf16.gmra.mrb[20].mxu0 %vm4471_vm3, %v4452_v13 }
  0xcf   :  { %5733 = vmatprep.mubr.msk.bf16.mxu0 %vm5917_vm1, %v8036_v17 }
 0x112   :  { %v6858_v50 = vpop.f32.mrb[0].mxu0 }
 0x113   :  { %v6863_v31 = vpop.f32.mrb[1].mxu0  ;;  %v6890_v3 = vrot.slane %v6858_v50, %v6623_v1 }
 0x114   :  { %v872_v19 = vcombine.high %v6863_v31, %v6863_v31  ;;  %v6867_v36 = vpop.f32.mrb[2].mxu0 }
 0x115   :  { %v816_v42 = vpop.f32.mrb[3].mxu0  ;;  %v1157_v9 = vadd.f32 %v6882_v60, %v6890_v3  ;;  %v923_v45 = vcombine.high %v6867_v36, %v6867_v36 }
 0x116   :  { %v6873_v54 = vrot.slane %v872_v19, %v6623_v1  ;;  %v889_v30 = vcombine.high %v816_v42, %v816_v42  ;;  %v896_v28 = vrot.slane %v816_v42, %v6623_v1 }
 0x117   :  { %v1291_v38 = vrot.slane %v1157_v9, %v6623_v1  ;;  %v6907_v43 = vrot.slane %v923_v45, %v6623_v1 }
 0x118   :  { %v888_v35 = vcombine.high %v6873_v54, %v6873_v54  ;;  %v903_v0 = vrot.slane %v889_v30, %v6623_v1  ;;  %v904_v56 = vcombine.high %v896_v28, %v896_v28  ;;  %v1153_v26 = vadd.f32 %v6879_v62, %v896_v28 }
 0x119   :  { %v939_v4 = vcombine.high %v6907_v43, %v6907_v43 }
 0x11a   :  { %v1152_v2 = vadd.f32 %v6870_v53, %v888_v35  ;;  %v905_v48 = vcombine.high %v903_v0, %v903_v0  ;;  %v1155_v37 = vadd.f32 %v6870_v53, %v903_v0  ;;  %v1154_v34 = vadd.f32 %v6882_v60, %v904_v56 }
 0x11b   :  { %v1164_v6 = vadd.f32 %v6870_v53, %v939_v4 }
 0x11c   :  { %v1261_v29 = vcombine.low %v1152_v2, %v1153_v26  ;;  %v1156_v15 = vadd.f32 %v6879_v62, %v905_v48  ;;  %v1275_v57 = vrot.slane %v1154_v34, %v6623_v1 }
 0x11d   :  { %v6884_v23 = vpop.f32.mrb[4].mxu0 }
 0x11e   :  { %v829_v39 = vpop.f32.mrb[5].mxu0  ;;  %v1268_v49 = vrot.slane %v1261_v29, %v6623_v1  ;;  %v1277_v51 = vcombine.low %v1155_v37, %v1156_v15  ;;  %v974_v63 = vcombine.high %v6884_v23, %v6884_v23 }
 0x11f   :  { %v5654_v20 = vpop.f32.mrb[6].mxu0  ;;  %v940_v40 = vcombine.high %v829_v39, %v829_v39  ;;  %v947_v18 = vrot.slane %v829_v39, %v6623_v1 }
 0x120   :  { %v6894_v41 = vpop.f32.mrb[7].mxu0  ;;  %v6909_v5 = vcombine.low %v1268_v49, %v1275_v57  ;;  %v1284_v33 = vrot.slane %v1277_v51, %v6623_v1  ;;  %v6926_v32 = vrot.slane %v974_v63, %v6623_v1  ;;  %v991_v44 = vcombine.high %v5654_v20, %v5654_v20 }
 0x121   :  { %v954_v58 = vrot.slane %v940_v40, %v6623_v1  ;;  %v955_v47 = vcombine.high %v947_v18, %v947_v18  ;;  %v1165_v8 = vadd.f32 %v6879_v62, %v947_v18  ;;  %v998_v24 = vrot.slane %v5654_v20, %v6623_v1 }
 0x122   :  { %v6920_v11 = vcombine.low %v1284_v33, %v1291_v38  ;;  %v990_v14 = vcombine.high %v6926_v32, %v6926_v32  ;;  %v1005_v35 = vrot.slane %v991_v44, %v6623_v1  ;;  %v6948_v0 = vrot.slane %v6894_v41, %v6623_v1 }
 0x123   :  { %v956_v25 = vcombine.high %v954_v58, %v954_v58  ;;  %v1166_v10 = vadd.f32 %v6882_v60, %v955_v47  ;;  %v1325_v7 = vcombine.low %v1164_v6, %v1165_v8  ;;  %v1167_v52 = vadd.f32 %v6870_v53, %v954_v58 }
 0x124   :  { %v1176_v22 = vadd.f32 %v6870_v53, %v990_v14  ;;  %v1006_v19 = vcombine.high %v998_v24, %v998_v24  ;;  %v1177_v42 = vadd.f32 %v6879_v62, %v998_v24  ;;  %v1007_v20 = vcombine.high %v1005_v35, %v1005_v35 }
 0x125   :  { %v1339_v16 = vrot.slane %v1166_v10, %v6623_v1  ;;  %v1168_v55 = vadd.f32 %v6879_v62, %v956_v25  ;;  %v1332_v13 = vrot.slane %v1325_v7, %v6623_v1  ;;  %v1169_v26 = vadd.f32 %v6882_v60, %v6948_v0 }
 0x126   :  { %v1178_v28 = vadd.f32 %v6882_v60, %v1006_v19  ;;  %v1389_v2 = vcombine.low %v1176_v22, %v1177_v42  ;;  %v1179_v34 = vadd.f32 %v6870_v53, %v1005_v35  ;;  %v1180_v29 = vadd.f32 %v6879_v62, %v1007_v20 }
 0x127   :  { %v6941_v59 = vcombine.low %v1332_v13, %v1339_v16  ;;  %v1341_v30 = vcombine.low %v1167_v52, %v1168_v55  ;;  %v1355_v48 = vrot.slane %v1169_v26, %v6623_v1  ;;  %v879_v52 = vrot.slane %v6863_v31, %v6623_v1 }
 0x128   :  { %v5657_v12 = vpop.f32.mrb[8].mxu0  ;;  %v1396_v39 = vrot.slane %v1389_v2, %v6623_v1  ;;  %v1403_v56 = vrot.slane %v1178_v28, %v6623_v1  ;;  %v1405_v38 = vcombine.low %v1179_v34, %v1180_v29  ;;  %v906_v22 = vcombine.high %v6858_v50, %v6858_v50 }
 0x129   :  { %v6914_v46 = vpop.f32.mrb[9].mxu0  ;;  %v1348_v9 = vrot.slane %v1341_v30, %v6623_v1  ;;  %v1042_v37 = vcombine.high %v5657_v12, %v5657_v12  ;;  %v1049_v58 = vrot.slane %v5657_v12, %v6623_v1  ;;  %v981_v42 = vrot.slane %v6884_v23, %v6623_v1 }
 0x12a   :  { %v6916_v61 = vpop.f32.mrb[10].mxu0  ;;  %v6954_v45 = vcombine.low %v1396_v39, %v1403_v56  ;;  %v6966_v63 = vrot.slane %v6914_v46, %v6623_v1  ;;  %v1412_v18 = vrot.slane %v1405_v38, %v6623_v1  ;;  %v887_v35 = vcombine.high %v879_v52, %v879_v52 }
 0x12b   :  { %v6922_v27 = vpop.f32.mrb[11].mxu0  ;;  %v6959_v15 = vcombine.low %v1348_v9, %v1355_v48  ;;  %v1056_v49 = vrot.slane %v1042_v37, %v6623_v1  ;;  %v6975_v6 = vrot.slane %v6916_v61, %v6623_v1  ;;  %v1057_v7 = vcombine.high %v1049_v58, %v1049_v58 }
 0x12c   :  { %v1181_v4 = vadd.f32 %v6882_v60, %v6966_v63  ;;  %v1025_v10 = vcombine.high %v6922_v27, %v6922_v27  ;;  %v1189_v55 = vadd.f32 %v6879_v62, %v1049_v58  ;;  %v920_v31 = vrot.slane %v906_v22, %v6623_v1 }
 0x12d   :  { %v1058_v57 = vcombine.high %v1056_v49, %v1056_v49  ;;  %v1191_v51 = vadd.f32 %v6870_v53, %v1056_v49  ;;  %v1193_v8 = vadd.f32 %v6882_v60, %v6975_v6  ;;  %v1190_v24 = vadd.f32 %v6882_v60, %v1057_v7  ;;  %v5521_v7 = vld [vmem:[%s8007_s5] ss:$0 sm:$0xff] }
 0x12e   :  { %v1419_v47 = vrot.slane %v1181_v4, %v6623_v1  ;;  %v6986_v12 = vrot.slane %v1025_v10, %v6623_v1  ;;  %v921_v2 = vcombine.high %v6890_v3, %v6890_v3  ;;  %v989_v20 = vcombine.high %v981_v42, %v981_v42 }
 0x12f   :  { %v1192_v33 = vadd.f32 %v6879_v62, %v1058_v57  ;;  %v1483_v16 = vrot.slane %v1193_v8, %v6623_v1  ;;  %v1467_v30 = vrot.slane %v1190_v24, %v6623_v1  ;;  %v1149_v56 = vadd.f32 %v6870_v53, %v879_v52 }
 0x130   :  { %v6977_v25 = vcombine.low %v1412_v18, %v1419_v47  ;;  %v1041_v13 = vcombine.high %v6986_v12, %v6986_v12  ;;  %v1150_v50 = vadd.f32 %v6879_v62, %v887_v35  ;;  %v930_v26 = vrot.slane %v6867_v36, %v6623_v1 }
 0x131   :  { %v1469_v40 = vcombine.low %v1191_v51, %v1192_v33  ;;  %v1158_v9 = vadd.f32 %v6870_v53, %v921_v2  ;;  %v1159_v48 = vadd.f32 %v6879_v62, %v920_v31  ;;  %v922_v37 = vcombine.high %v920_v31, %v920_v31 }
 0x132   :  { %v1188_v19 = vadd.f32 %v6870_v53, %v1041_v13  ;;  %v1173_v34 = vadd.f32 %v6870_v53, %v981_v42  ;;  %v1174_v3 = vadd.f32 %v6879_v62, %v989_v20  ;;  %v1151_v29 = vadd.f32 %v6882_v60, %v6873_v54 }
 0x133   :  { %v1476_v14 = vrot.slane %v1469_v40, %v6623_v1  ;;  %v1245_v49 = vcombine.low %v1149_v56, %v1150_v50  ;;  %v938_v57 = vcombine.high %v930_v26, %v930_v26  ;;  %v1293_v38 = vcombine.low %v1158_v9, %v1159_v48 }
 0x134   :  { %v1453_v28 = vcombine.low %v1188_v19, %v1189_v55  ;;  %v1160_v51 = vadd.f32 %v6882_v60, %v922_v37  ;;  %v1175_v36 = vadd.f32 %v6882_v60, %v6926_v32  ;;  %v1373_v33 = vcombine.low %v1173_v34, %v1174_v3 }
 0x135   :  { %v6988_v44 = vcombine.low %v1476_v14, %v1483_v16  ;;  %v1252_v40 = vrot.slane %v1245_v49, %v6623_v1  ;;  %v1259_v4 = vrot.slane %v1151_v29, %v6623_v1  ;;  %v1161_v18 = vadd.f32 %v6870_v53, %v930_v26 }
 0x136   :  { %v1460_v39 = vrot.slane %v1453_v28, %v6623_v1  ;;  %v1162_v58 = vadd.f32 %v6879_v62, %v938_v57  ;;  %v1008_v54 = vcombine.high %v6914_v46, %v6914_v46  ;;  %v1300_v47 = vrot.slane %v1293_v38, %v6623_v1 }
 0x137   :  { %v1307_v8 = vrot.slane %v1160_v51, %v6623_v1  ;;  %v1380_v14 = vrot.slane %v1373_v33, %v6623_v1  ;;  %v1387_v32 = vrot.slane %v1175_v36, %v6623_v1  ;;  %v1032_v10 = vrot.slane %v6922_v27, %v6623_v1 }
 0x138   :  { %v7010_v23 = vcombine.low %v1460_v39, %v1467_v30  ;;  %v1260_v16 = vcombine.low %v1252_v40, %v1259_v4  ;;  %v1163_v52 = vadd.f32 %v6882_v60, %v6907_v43  ;;  %v1309_v46 = vcombine.low %v1161_v18, %v1162_v58 }
 0x139   :  { %v1022_v55 = vrot.slane %v1008_v54, %v6623_v1  ;;  %v1023_v24 = vcombine.high %v6966_v63, %v6966_v63  ;;  %v3310_v13 = vcombine.high %v5521_v7, %v5521_v7  ;;  %v3317_v22 = vrot.slane %v5521_v7, %v6069_v21 }
 0x13a   :  { %v1308_v19 = vcombine.low %v1300_v47, %v1307_v8  ;;  %v1388_v27 = vcombine.low %v1380_v14, %v1387_v32  ;;  %v1040_v42 = vcombine.high %v1032_v10, %v1032_v10  ;;  %v1518_v35 = vsel %vm1517_vm4, %v1260_v16, -inf }
 0x13b   :  { %v1316_v30 = vrot.slane %v1309_v46, %v6623_v1  ;;  %v1323_v28 = vrot.slane %v1163_v52, %v6623_v1  ;;  %v1525_v43 = vsel %vm1517_vm4, %v6909_v5, -inf  ;;  %v1532_v31 = vsel %vm1517_vm4, %v6920_v11, -inf }
 0x13c   :  { %v1024_v2 = vcombine.high %v1022_v55, %v1022_v55  ;;  %v1182_v63 = vadd.f32 %v6870_v53, %v1023_v24  ;;  %v1183_v39 = vadd.f32 %v6879_v62, %v1022_v55  ;;  %v3324_v20 = vrot.slane %v3310_v13, %v6069_v21 }
 0x13d   :  { %v3325_v56 = vcombine.high %v3317_v22, %v3317_v22  ;;  %v1539_v50 = vsel %vm1517_vm4, %v1308_v19, -inf  ;;  %v1574_v26 = vsel %vm1517_vm4, %v1388_v27, -inf  ;;  %v1185_v9 = vadd.f32 %v6870_v53, %v1032_v10 }
 0x13e   :  { %v1186_v48 = vadd.f32 %v6879_v62, %v1040_v42  ;;  %v1519_v5 = vrot.slane %v1518_v35, 4  ;;  %v1324_v37 = vcombine.low %v1316_v30, %v1323_v28  ;;  %v1526_v34 = vrot.slane %v1525_v43, 4 }
 0x13f   :  { %v1533_v11 = vrot.slane %v1532_v31, 4  ;;  %v957_v3 = vcombine.high %v6894_v41, %v6894_v41  ;;  %v1184_v29 = vadd.f32 %v6882_v60, %v1024_v2  ;;  %v1421_v49 = vcombine.low %v1182_v63, %v1183_v39 }
 0x140   :  { %v7060_v57 = vrot.slane %v3317_v22, %v6069_v21  ;;  %v1575_v38 = vrot.slane %v1574_v26, 4  ;;  %v1059_v51 = vcombine.high %v6916_v61, %v6916_v61  ;;  %v7065_v36 = vrot.slane %v3324_v20, %v6069_v21 }
 0x141   :  { %v7068_v33 = vrot.slane %v3325_v56, %v6069_v21  ;;  %v1540_v40 = vrot.slane %v1539_v50, 4  ;;  %v1581_v41 = vsel %vm1517_vm4, %v6954_v45, -inf  ;;  %v1187_v4 = vadd.f32 %v6882_v60, %v6986_v12 }
 0x142   :  { %v1437_v18 = vcombine.low %v1185_v9, %v1186_v48  ;;  %v1520_v58 = vmax.f32 %v1518_v35, %v1519_v5  ;;  %v1546_v54 = vsel %vm1517_vm4, %v1324_v37, -inf  ;;  %v1527_v47 = vmax.f32 %v1525_v43, %v1526_v34 }
 0x143   :  { %v1534_v8 = vmax.f32 %v1532_v31, %v1533_v11  ;;  %v971_v61 = vrot.slane %v957_v3, %v6623_v1  ;;  %v972_v14 = vcombine.high %v6948_v0, %v6948_v0  ;;  %v1428_v32 = vrot.slane %v1421_v49, %v6623_v1 }
 0x144   :  { %v1435_v10 = vrot.slane %v1184_v29, %v6623_v1  ;;  %v1576_v7 = vmax.f32 %v1574_v26, %v1575_v38  ;;  %v1582_v45 = vrot.slane %v1581_v41, 4  ;;  %v1073_v16 = vrot.slane %v1059_v51, %v6623_v1 }
 0x145   :  { %v7083_v12 = vcombine.high %v7060_v57, %v7060_v57  ;;  %v1588_v52 = vsel %vm1517_vm4, %v6977_v25, -inf  ;;  %v1074_v46 = vcombine.high %v6975_v6, %v6975_v6  ;;  %v1444_v0 = vrot.slane %v1437_v18, %v6623_v1 }
 0x146   :  { %v1451_v55 = vrot.slane %v1187_v4, %v6623_v1  ;;  %v1541_v24 = vmax.f32 %v1539_v50, %v1540_v40  ;;  %v1521_v13 = vrot.slane %v1520_v58, 2  ;;  %v1547_v22 = vrot.slane %v1546_v54, 4 }
 0x147   :  { %v1528_v19 = vrot.slane %v1527_v47, 2  ;;  %v1535_v27 = vrot.slane %v1534_v8, 2  ;;  %v1170_v42 = vadd.f32 %v6870_v53, %v972_v14  ;;  %v1171_v35 = vadd.f32 %v6879_v62, %v971_v61 }
 0x148   :  { %v1436_v30 = vcombine.low %v1428_v32, %v1435_v10  ;;  %v1577_v28 = vrot.slane %v1576_v7, 2  ;;  %v1583_v43 = vmax.f32 %v1581_v41, %v1582_v45  ;;  %v973_v25 = vcombine.high %v971_v61, %v971_v61 }
 0x149   :  { %v1589_v31 = vrot.slane %v1588_v52, 4  ;;  %v1075_v2 = vcombine.high %v1073_v16, %v1073_v16  ;;  %v1194_v6 = vadd.f32 %v6870_v53, %v1074_v46  ;;  %v1195_v63 = vadd.f32 %v6879_v62, %v1073_v16 }
 0x14a   :  { %v1452_v39 = vcombine.low %v1444_v0, %v1451_v55  ;;  %v1542_v20 = vrot.slane %v1541_v24, 2  ;;  %v1522_v56 = vmax.f32 %v1520_v58, %v1521_v13  ;;  %v1548_v50 = vmax.f32 %v1546_v54, %v1547_v22 }
 0x14b   :  { %v1529_v26 = vmax.f32 %v1527_v47, %v1528_v19  ;;  %v1536_v9 = vmax.f32 %v1534_v8, %v1535_v27  ;;  %v1553_v48 = vsel %vm1517_vm4, %v6941_v59, -inf  ;;  %v1357_v5 = vcombine.low %v1170_v42, %v1171_v35 }
 0x14c   :  { %v1595_v37 = vsel %vm1517_vm4, %v1436_v30, -inf  ;;  %v1584_v34 = vrot.slane %v1583_v43, 2  ;;  %v1172_v11 = vadd.f32 %v6882_v60, %v973_v25  ;;  %v1560_v53 = vsel %vm1517_vm4, %v6959_v15, -inf }
 0x14d   :  { %v1590_v3 = vmax.f32 %v1588_v52, %v1589_v31  ;;  %v1578_v62 = vmax.f32 %v1576_v7, %v1577_v28  ;;  %v1196_v29 = vadd.f32 %v6882_v60, %v1075_v2  ;;  %v1485_v49 = vcombine.low %v1194_v6, %v1195_v63 }
 0x14e   :  { %v1602_v38 = vsel %vm1517_vm4, %v1452_v39, -inf  ;;  %v1523_v51 = vrot.slane %v1522_v56, 1  ;;  %v1549_v40 = vrot.slane %v1548_v50, 2  ;;  %v1554_v41 = vrot.slane %v1553_v48, 4 }
 0x14f   :  { %v1596_v59 = vrot.slane %v1595_v37, 4  ;;  %v1530_v4 = vrot.slane %v1529_v26, 1  ;;  %v1364_v18 = vrot.slane %v1357_v5, %v6623_v1  ;;  %v1561_v58 = vrot.slane %v1560_v53, 4 }
 0x150   :  { %v1616_v54 = vsel %vm1517_vm4, %v6988_v44, -inf  ;;  %v1585_v47 = vmax.f32 %v1583_v43, %v1584_v34  ;;  %v1371_v15 = vrot.slane %v1172_v11, %v6623_v1  ;;  %v1591_v8 = vrot.slane %v1590_v3, 2 }
 0x151   :  { %v1603_v61 = vrot.slane %v1602_v38, 4  ;;  %v1537_v60 = vrot.slane %v1536_v9, 1  ;;  %v1579_v14 = vrot.slane %v1578_v62, 1  ;;  %v1492_v32 = vrot.slane %v1485_v49, %v6623_v1 }
 0x152   :  { %v1499_v10 = vrot.slane %v1196_v29, %v6623_v1  ;;  %v7109_v7 = vmax.f32 %v1541_v24, %v1542_v20  ;;  %v1555_v45 = vmax.f32 %v1553_v48, %v1554_v41  ;;  %v1597_v16 = vmax.f32 %v1595_v37, %v1596_v59 }
 0x153   :  { %v1617_v52 = vrot.slane %v1616_v54, 4  ;;  %v7111_v46 = vmax.f32 %v1522_v56, %v1523_v51  ;;  %v7113_v0 = vmax.f32 %v1548_v50, %v1549_v40  ;;  %v1562_v44 = vmax.f32 %v1560_v53, %v1561_v58 }
 0x154   :  { %v7117_v55 = vcombine.high %v7068_v33, %v7068_v33  ;;  %v1586_v13 = vrot.slane %v1585_v47, 1  ;;  %v1372_v22 = vcombine.low %v1364_v18, %v1371_v15  ;;  %v1592_v19 = vmax.f32 %v1590_v3, %v1591_v8 }
 0x155   :  { %8112 = vst [vmem:[#allocation5_spill] sm:$0xff] %v7111_v46  ;;  %v1604_v27 = vmax.f32 %v1602_v38, %v1603_v61  ;;  %v7119_v42 = vmax.f32 %v1529_v26, %v1530_v4  ;;  %v7121_v1 = vmax.f32 %v1536_v9, %v1537_v60  ;;  %v7123_v24 = vmax.f32 %v1578_v62, %v1579_v14 }
 0x156   :  { %v1500_v35 = vcombine.low %v1492_v32, %v1499_v10  ;;  %v1556_v28 = vrot.slane %v1555_v45, 2  ;;  %v1598_v43 = vrot.slane %v1597_v16, 2  ;;  %v1618_v25 = vmax.f32 %v1616_v54, %v1617_v52 }
 0x157   :  { %8113 = vst [vmem:[#allocation6_spill] sm:$0xff] %v7119_v42  ;;  %8114 = vst [vmem:[#allocation8_spill] sm:$0xff] %v7121_v1  ;;  %v1563_v6 = vrot.slane %v1562_v44, 2  ;;  %v1609_v63 = vsel %vm1517_vm4, %v7010_v23, -inf  ;;  %v7130_v39 = vmax.f32 %v1585_v47, %v1586_v13  ;;  %v7133_v20 = vsel %vm1517_vm4, %v1372_v22, -inf }
 0x158   :  { %8115 = vst [vmem:[#allocation9_spill] sm:$0xff] %v7123_v24  ;;  %8117 = vst [vmem:[#allocation7_spill] sm:$0xff] %v7133_v20  ;;  %v1593_v56 = vrot.slane %v1592_v19, 1  ;;  %v1605_v50 = vrot.slane %v1604_v27, 2  ;;  %v7139_v5 = vsel %vm1517_vm4, %v1500_v35, -inf  ;;  %v7141_v37 = vmax.f32 %v1555_v45, %v1556_v28 }
 0x159   :  { %8116 = vst [vmem:[#allocation10_spill] sm:$0xff] %v7130_v39  ;;  %8118 = vst [vmem:[#allocation11_spill] sm:$0xff] %v7139_v5  ;;  %v7143_v34 = vmax.f32 %v1597_v16, %v1598_v43  ;;  %v1619_v23 = vrot.slane %v1618_v25, 2  ;;  %v1610_v11 = vrot.slane %v1609_v63, 4  ;;  %v7145_v3 = vmax.f32 %v1562_v44, %v1563_v6 }
 0x15a   :  { %8119 = vst [vmem:[#allocation12_spill] sm:$0xff] %v7141_v37  ;;  %v7150_v40 = vmax.f32 %v1592_v19, %v1593_v56  ;;  %v7153_v59 = vmax.f32 %v1604_v27, %v1605_v50 }
 0x15b   :  { %8120 = vst [vmem:[#allocation13_spill] sm:$0xff] %v7143_v34  ;;  %8121 = vst [vmem:[#allocation14_spill] sm:$0xff] %v7145_v3  ;;  %v7158_v61 = vmax.f32 %v1618_v25, %v1619_v23  ;;  %v7160_v60 = vmax.f32 %v1609_v63, %v1610_v11 }
 0x15c   :  { %8122 = vst [vmem:[#allocation15_spill] sm:$0xff] %v7150_v40  ;;  %8123 = vst [vmem:[#allocation16_spill] sm:$0xff] %v7153_v59 }
 0x15d   :  { %8124 = vst [vmem:[#allocation17_spill] sm:$0xff] %v7158_v61  ;;  %8125 = vst [vmem:[#allocation18_spill] sm:$0xff] %v7160_v60 }
 0x183   :  { %v2693_v53 = vpop.f32.mrb[0].mxu1 }
 0x184   :  { %v2832_v29 = vcombine.high %v2693_v53, %v2693_v53  ;;  %v2839_v49 = vrot.slane %v2693_v53, %v6069_v21  ;;  %v5669_v38 = vpop.f32.mrb[1].mxu1 }
 0x185   :  { %v2696_v4 = vpop.f32.mrb[2].mxu1 }
 0x186   :  { %v2846_v18 = vrot.slane %v2832_v29, %v6069_v21  ;;  %v2847_v58 = vcombine.high %v2839_v49, %v2839_v49  ;;  %v2855_v54 = vrot.slane %v2839_v49, %v6069_v21  ;;  %v2881_v47 = vcombine.high %v2696_v4, %v2696_v4  ;;  %v5670_v15 = vpop.f32.mrb[3].mxu1 }
 0x187   :  { %v2888_v14 = vrot.slane %v2696_v4, %v6069_v21  ;;  %v7163_v32 = vpop.f32.mrb[12].mxu0 }
 0x188   :  { %v2848_v10 = vcombine.high %v2846_v18, %v2846_v18  ;;  %v2862_v45 = vrot.slane %v2846_v18, %v6069_v21  ;;  %v2869_v16 = vrot.slane %v2847_v58, %v6069_v21  ;;  %v2877_v52 = vcombine.high %v2855_v54, %v2855_v54  ;;  %v5665_v44 = vpop.f32.mrb[13].mxu0 }
 0x189   :  { %v2895_v22 = vrot.slane %v2881_v47, %v6069_v21  ;;  %v2896_v19 = vcombine.high %v2888_v14, %v2888_v14  ;;  %v2904_v27 = vrot.slane %v2888_v14, %v6069_v21  ;;  %v7170_v35 = vpop.f32.mrb[14].mxu0  ;;  %v7175_v56 = vadd.f32 %v7068_v33, %v2855_v54 }
 0x18a   :  { %v2876_v28 = vrot.slane %v2848_v10, %v6069_v21  ;;  %v2878_v43 = vcombine.high %v2862_v45, %v2862_v45  ;;  %v2879_v25 = vcombine.high %v2869_v16, %v2869_v16  ;;  %v3371_v6 = vadd.f32 %v7083_v12, %v2869_v16  ;;  %v5666_v63 = vpop.f32.mrb[15].mxu0 }
 0x18b   :  { %v3372_v50 = vadd.f32 %v7117_v55, %v2877_v52  ;;  %v2897_v23 = vcombine.high %v2895_v22, %v2895_v22  ;;  %v2911_v11 = vrot.slane %v2895_v22, %v6069_v21  ;;  %v3374_v49 = vadd.f32 %v7060_v57, %v2862_v45 }
 0x18c   :  { %v2880_v53 = vcombine.high %v2876_v28, %v2876_v28  ;;  %v3373_v29 = vadd.f32 %v7065_v36, %v2879_v25  ;;  %v3375_v38 = vadd.f32 %v7068_v33, %v2876_v28  ;;  %v2918_v18 = vrot.slane %v2896_v19, %v6069_v21 }
 0x18d   :  { %v3632_v4 = vcombine.low %v3371_v6, %v3372_v50  ;;  %v2925_v58 = vrot.slane %v2897_v23, %v6069_v21  ;;  %v2926_v47 = vcombine.high %v2904_v27, %v2904_v27  ;;  %v2701_v54 = vpop.f32.mrb[4].mxu1  ;;  %v3376_v15 = vadd.f32 %v7083_v12, %v2878_v43 }
 0x18e   :  { %v3377_v14 = vadd.f32 %v7117_v55, %v2880_v53  ;;  %v3670_v10 = vcombine.low %v3374_v49, %v3375_v38  ;;  %v2927_v16 = vcombine.high %v2911_v11, %v2911_v11  ;;  %v5673_v52 = vpop.f32.mrb[5].mxu1  ;;  %v3653_v44 = vrot.slane %v3373_v29, %v6069_v21 }
 0x18f   :  { %v2928_v22 = vcombine.high %v2918_v18, %v2918_v18  ;;  %v2929_v45 = vcombine.high %v2925_v58, %v2925_v58  ;;  %v3378_v28 = vadd.f32 %v7065_v36, %v2904_v27  ;;  %v7188_v25 = vpop.f32.mrb[6].mxu1  ;;  %v7191_v19 = vrot.slane %v3632_v4, %v6069_v21 }
 0x190   :  { %v3671_v6 = vcombine.low %v3376_v15, %v3377_v14  ;;  %v3678_v43 = vrot.slane %v3670_v10, %v6069_v21  ;;  %v3379_v63 = vadd.f32 %v7060_v57, %v2918_v18  ;;  %v5674_v50 = vpop.f32.mrb[7].mxu1  ;;  %v3380_v23 = vadd.f32 %v7068_v33, %v2926_v47 }
 0x191   :  { %v3381_v53 = vadd.f32 %v7083_v12, %v2928_v22  ;;  %v3382_v29 = vadd.f32 %v7117_v55, %v2911_v11  ;;  %v3383_v27 = vadd.f32 %v7065_v36, %v2925_v58  ;;  %v3384_v38 = vadd.f32 %v7060_v57, %v2927_v16 }
 0x192   :  { %v3685_v49 = vrot.slane %v3671_v6, %v6069_v21  ;;  %v3385_v4 = vadd.f32 %v7068_v33, %v2929_v45  ;;  %v3692_v15 = vrot.slane %v3378_v28, %v6069_v21  ;;  %v3709_v14 = vcombine.low %v3379_v63, %v3380_v23 }
 0x193   :  { %v3710_v10 = vcombine.low %v3381_v53, %v3382_v29  ;;  %v3731_v18 = vrot.slane %v3383_v27, %v6069_v21  ;;  %v2930_v52 = vcombine.high %v2701_v54, %v2701_v54  ;;  %v7205_v47 = vrot.slane %v3653_v44, %v6069_v21 }
 0x194   :  { %v3693_v22 = vcombine.low %v3678_v43, %v3685_v49  ;;  %v3748_v11 = vcombine.low %v3384_v38, %v3385_v4  ;;  %v2937_v58 = vrot.slane %v2701_v54, %v6069_v21  ;;  %v7208_v50 = vpop.f32.mrb[16].mxu0  ;;  %v3707_v16 = vrot.slane %v3692_v15, %v6069_v21 }
 0x195   :  { %v3717_v45 = vrot.slane %v3709_v14, %v6069_v21  ;;  %v3724_v28 = vrot.slane %v3710_v10, %v6069_v21  ;;  %v2944_v6 = vrot.slane %v2930_v52, %v6069_v21  ;;  %v7214_v63 = vpop.f32.mrb[8].mxu1  ;;  %v7216_v23 = vpop.f32.mrb[17].mxu0  ;;  %v7220_v43 = vrot.slane %v3731_v18, %v6069_v21 }
 0x196   :  { %v3700_v44 = vrot.slane %v3693_v22, %v6069_v21  ;;  %v2945_v54 = vcombine.high %v2937_v58, %v2937_v58  ;;  %v2953_v53 = vrot.slane %v2937_v58, %v6069_v21  ;;  %v5677_v29 = vpop.f32.mrb[9].mxu1  ;;  %v7223_v27 = vpop.f32.mrb[18].mxu0  ;;  %v3756_v15 = vrot.slane %v3748_v11, %v6069_v21 }
 0x197   :  { %v3732_v49 = vcombine.low %v3717_v45, %v3724_v28  ;;  %v2946_v38 = vcombine.high %v2944_v6, %v2944_v6  ;;  %v2960_v4 = vrot.slane %v2944_v6, %v6069_v21  ;;  %v7227_v14 = vpop.f32.mrb[10].mxu1  ;;  %v7229_v10 = vpop.f32.mrb[19].mxu0  ;;  %v2979_v58 = vcombine.high %v7188_v25, %v7188_v25 }
 0x198   :  { %v3708_v52 = vcombine.low %v3700_v44, %v3707_v16  ;;  %v2967_v18 = vrot.slane %v2945_v54, %v6069_v21  ;;  %v2975_v22 = vcombine.high %v2953_v53, %v2953_v53  ;;  %v5678_v29 = vpop.f32.mrb[11].mxu1  ;;  %v3386_v11 = vadd.f32 %v7083_v12, %v2953_v53 }
 0x199   :  { %v7235_v51 = vrot.slane %v3732_v49, %v6069_v21  ;;  %v2974_v45 = vrot.slane %v2946_v38, %v6069_v21  ;;  %v2976_v28 = vcombine.high %v2960_v4, %v2960_v4  ;;  %v3390_v13 = vadd.f32 %v7068_v33, %v2960_v4 }
 0x19a   :  { %v4183_v6 = vsel %vm4154_vm5, %v3708_v52, -inf  ;;  %v2977_v48 = vcombine.high %v2967_v18, %v2967_v18  ;;  %v3387_v16 = vadd.f32 %v7117_v55, %v2967_v18  ;;  %v3388_v44 = vadd.f32 %v7065_v36, %v2975_v22 }
 0x19b   :  { %v4184_v54 = vrot.slane %v4183_v6, 4  ;;  %v2978_v41 = vcombine.high %v2974_v45, %v2974_v45  ;;  %v3391_v29 = vadd.f32 %v7083_v12, %v2974_v45  ;;  %v3392_v38 = vadd.f32 %v7117_v55, %v2976_v28 }
 0x19c   :  { %v3389_v49 = vadd.f32 %v7060_v57, %v2977_v48  ;;  %v3749_v8 = vcombine.low %v3386_v11, %v3387_v16  ;;  %v3770_v53 = vrot.slane %v3388_v44, %v6069_v21  ;;  %v2986_v18 = vrot.slane %v7188_v25, %v6069_v21 }
 0x19d   :  { %v7247_v9 = vmax.f32 %v4183_v6, %v4184_v54  ;;  %v7250_v52 = vadd.f32 %v7065_v36, %v2978_v41  ;;  %v2993_v22 = vrot.slane %v2979_v58, %v6069_v21  ;;  %v7255_v4 = vpop.f32.mrb[12].mxu1  ;;  %v3788_v6 = vcombine.low %v3391_v29, %v3392_v38 }
 0x19e   :  { %v3763_v28 = vrot.slane %v3749_v8, %v6069_v21  ;;  %v3787_v11 = vcombine.low %v3389_v49, %v3390_v13  ;;  %v5681_v16 = vpop.f32.mrb[13].mxu1  ;;  %v7266_v25 = vrot.slane %v3770_v53, %v6069_v21  ;;  %v2994_v58 = vcombine.high %v2986_v18, %v2986_v18 }
 0x19f   :  { %v2995_v54 = vcombine.high %v2993_v22, %v2993_v22  ;;  %v7268_v26 = vpop.f32.mrb[14].mxu1  ;;  %v7276_v8 = vrot.slane %v3788_v6, %v6069_v21  ;;  %v3002_v13 = vrot.slane %v2986_v18, %v6069_v21  ;;  %v3009_v53 = vrot.slane %v2993_v22, %v6069_v21 }
 0x1a0   :  { %v3771_v62 = vcombine.low %v3756_v15, %v3763_v28  ;;  %v7273_v2 = vrot.slane %v3787_v11, %v6069_v21  ;;  %v5682_v29 = vpop.f32.mrb[15].mxu1  ;;  %v3016_v16 = vrot.slane %v2994_v58, %v6069_v21  ;;  %v2734_v6 = vcombine.high %v7163_v32, %v7163_v32 }
 0x1a1   :  { %v7257_v45 = vpop.f32.mrb[20].mxu0  ;;  %v7286_v15 = vrot.slane %v2995_v54, %v6069_v21  ;;  %v3024_v18 = vcombine.high %v3002_v13, %v3002_v13  ;;  %v3025_v29 = vcombine.high %v3009_v53, %v3009_v53  ;;  %v3394_v48 = vadd.f32 %v7060_v57, %v3002_v13 }
 0x1a2   :  { %v7262_v44 = vpop.f32.mrb[21].mxu0  ;;  %v7289_v28 = vrot.slane %v3771_v62, %v6069_v21  ;;  %v3026_v30 = vcombine.high %v3016_v16, %v3016_v16  ;;  %v3395_v22 = vadd.f32 %v7068_v33, %v3016_v16  ;;  %v3398_v62 = vadd.f32 %v7065_v36, %v3009_v53 }
 0x1a3   :  { %v7270_v31 = vpop.f32.mrb[22].mxu0  ;;  %v3396_v54 = vadd.f32 %v7083_v12, %v3024_v18  ;;  %v7303_v41 = vadd.f32 %v7060_v57, %v7286_v15  ;;  %v7307_v11 = vadd.f32 %v7068_v33, %v3025_v29  ;;  %v2741_v13 = vrot.slane %v7163_v32, %v6069_v21 }
 0x1a4   :  { %v7279_v49 = vpop.f32.mrb[23].mxu0  ;;  %v3397_v38 = vadd.f32 %v7117_v55, %v3026_v30  ;;  %v3826_v17 = vcombine.low %v3394_v48, %v3395_v22  ;;  %v3848_v18 = vrot.slane %v3398_v62, %v6069_v21  ;;  %v2748_v53 = vrot.slane %v2734_v6, %v6069_v21 }
 0x1a5   :  { %v2783_v58 = vcombine.high %v7170_v35, %v7170_v35  ;;  %v2749_v24 = vcombine.high %v2741_v13, %v2741_v13  ;;  %v2790_v48 = vrot.slane %v7170_v35, %v6069_v21  ;;  %v2757_v22 = vrot.slane %v2741_v13, %v6069_v21 }
 0x1a6   :  { %v3827_v39 = vcombine.low %v3396_v54, %v3397_v38  ;;  %v3834_v30 = vrot.slane %v3826_v17, %v6069_v21  ;;  %v2750_v29 = vcombine.high %v2748_v53, %v2748_v53  ;;  %v2764_v62 = vrot.slane %v2748_v53, %v6069_v21 }
 0x1a7   :  { %v3863_v16 = vrot.slane %v3848_v18, %v6069_v21  ;;  %v2771_v38 = vrot.slane %v2749_v24, %v6069_v21  ;;  %v2797_v17 = vrot.slane %v2783_v58, %v6069_v21  ;;  %v2779_v5 = vcombine.high %v2757_v22, %v2757_v22 }
 0x1a8   :  { %v3841_v6 = vrot.slane %v3827_v39, %v6069_v21  ;;  %v2778_v54 = vrot.slane %v2750_v29, %v6069_v21  ;;  %v2780_v35 = vcombine.high %v2764_v62, %v2764_v62  ;;  %v3354_v61 = vadd.f32 %v7060_v57, %v2757_v22 }
 0x1a9   :  { %v2781_v60 = vcombine.high %v2771_v38, %v2771_v38  ;;  %v3355_v13 = vadd.f32 %v7068_v33, %v2771_v38  ;;  %v3358_v53 = vadd.f32 %v7065_v36, %v2764_v62  ;;  %v2798_v24 = vcombine.high %v2790_v48, %v2790_v48 }
 0x1aa   :  { %v3849_v32 = vcombine.low %v3834_v30, %v3841_v6  ;;  %v2782_v59 = vcombine.high %v2778_v54, %v2778_v54  ;;  %v3359_v39 = vadd.f32 %v7060_v57, %v2778_v54  ;;  %v3360_v18 = vadd.f32 %v7068_v33, %v2780_v35 }
 0x1ab   :  { %v3356_v29 = vadd.f32 %v7083_v12, %v2779_v5  ;;  %v3357_v34 = vadd.f32 %v7117_v55, %v2781_v60  ;;  %v3514_v1 = vcombine.low %v3354_v61, %v3355_v13  ;;  %v3536_v30 = vrot.slane %v3358_v53, %v6069_v21 }
 0x1ac   :  { %v3856_v58 = vrot.slane %v3849_v32, %v6069_v21  ;;  %v2799_v22 = vcombine.high %v2797_v17, %v2797_v17  ;;  %v2806_v6 = vrot.slane %v2790_v48, %v6069_v21  ;;  %v2813_v62 = vrot.slane %v2797_v17, %v6069_v21 }
 0x1ad   :  { %v3515_v42 = vcombine.low %v3356_v29, %v3357_v34  ;;  %v3522_v54 = vrot.slane %v3514_v1, %v6069_v21  ;;  %v3553_v35 = vcombine.low %v3359_v39, %v3360_v18  ;;  %v2820_v46 = vrot.slane %v2798_v24, %v6069_v21 }
 0x1ae   :  { %v3864_v38 = vcombine.low %v3856_v58, %v3863_v16  ;;  %v2827_v32 = vrot.slane %v2799_v22, %v6069_v21  ;;  %v2828_v5 = vcombine.high %v2806_v6, %v2806_v6  ;;  %v2829_v40 = vcombine.high %v2813_v62, %v2813_v62  ;;  %v5833_v22 = vld [vmem:[%s8009_s7] sm:$0xff]  }
 0x1af   :  { %v3529_v60 = vrot.slane %v3515_v42, %v6069_v21  ;;  %v3361_v13 = vadd.f32 %v7083_v12, %v2782_v59  ;;  %v3362_v48 = vadd.f32 %v7117_v55, %v2806_v6  ;;  %v2830_v16 = vcombine.high %v2820_v46, %v2820_v46  ;;  %5698 = vmatpush3.bf16.msra.mxu1 %v5833_v22 }
 0x1b0   :  { %v4211_v61 = vsel %vm4154_vm5, %v3864_v38, -inf  ;;  %v2831_v34 = vcombine.high %v2827_v32, %v2827_v32  ;;  %v3363_v1 = vadd.f32 %v7065_v36, %v2820_v46  ;;  %v3364_v39 = vadd.f32 %v7060_v57, %v2828_v5  ;;  %v5834_v46 = vld [vmem:[%s8011_s9] sm:$0xff]  }
 0x1b1   :  { %v4212_v17 = vrot.slane %v4211_v61, 4  ;;  %v3537_v53 = vcombine.low %v3522_v54, %v3529_v60  ;;  %v3366_v18 = vadd.f32 %v7083_v12, %v2813_v62  ;;  %v3367_v24 = vadd.f32 %v7117_v55, %v2827_v32  ;;  %5718 = vmatpush3.bf16.msra.mxu0 %v5834_v46  ;;  %v5835_v60 = vld [vmem:[%s8009_s7 + $0x8] sm:$0xff]   ;;  %v5837_v46 = vld [vmem:[%s8009_s7 + $0x10] sm:$0xff]  }
 0x1b2   :  { %v3365_v29 = vadd.f32 %v7068_v33, %v2830_v16  ;;  %v3368_v42 = vadd.f32 %v7065_v36, %v2829_v40  ;;  %v3369_v59 = vadd.f32 %v7060_v57, %v2831_v34  ;;  %v3551_v62 = vrot.slane %v3536_v30, %v6069_v21 }
 0x1b3   :  { %v4213_v58 = vmax.f32 %v4211_v61, %v4212_v17  ;;  %v3544_v6 = vrot.slane %v3537_v53, %v6069_v21  ;;  %v3554_v38 = vcombine.low %v3361_v13, %v3362_v48  ;;  %v3575_v54 = vrot.slane %v3363_v1, %v6069_v21  ;;  %v5836_v17 = vld [vmem:[%s8011_s9 + $0x8] sm:$0xff]  }
 0x1b4   :  { %v3592_v5 = vcombine.low %v3364_v39, %v3365_v29  ;;  %v3593_v40 = vcombine.low %v3366_v18, %v3367_v24  ;;  %v3614_v61 = vrot.slane %v3368_v42, %v6069_v21  ;;  %v3561_v30 = vrot.slane %v3553_v35, %v6069_v21 }
 0x1b5   :  { %v4214_v32 = vrot.slane %v4213_v58, 2  ;;  %v3552_v16 = vcombine.low %v3544_v6, %v3551_v62  ;;  %v3568_v13 = vrot.slane %v3554_v38, %v6069_v21  ;;  %v3631_v48 = vcombine.low %v3369_v59, %v7175_v56  ;;  %v5838_v6 = vld [vmem:[%s8011_s9 + $0x10] sm:$0xff]  }
 0x1b6   :  { %v8126_v34 = vmov 0.0   ;;  %v3590_v53 = vrot.slane %v3575_v54, %v6069_v21  ;;  %v3600_v39 = vrot.slane %v3592_v5, %v6069_v21  ;;  %v3607_v18 = vrot.slane %v3593_v40, %v6069_v21 }
 0x1b7   :  { %5699 = vmatprep.subr.bf16.mxu1 %v8126_v34  ;;  %v7374_v1 = vmax.f32 %v4213_v58, %v4214_v32  ;;  %5719 = vmatprep.subr.bf16.mxu0 %v8126_v34  ;;  %v4155_v24 = vsel %vm4154_vm5, %v3552_v16, -inf  ;;  %v3576_v29 = vcombine.low %v3561_v30, %v3568_v13  ;;  %v3639_v35 = vrot.slane %v3631_v48, %v6069_v21 }
 0x1b8   :  { %v3028_v56 = vcombine.high %v7214_v63, %v7214_v63  ;;  %v4156_v42 = vrot.slane %v4155_v24, 4  ;;  %v3615_v59 = vcombine.low %v3600_v39, %v3607_v18  ;;  %v3629_v58 = vrot.slane %v3614_v61, %v6069_v21  ;;  %5700 = vmatpush3.bf16.msra.mxu1 %v5835_v60  ;;  %5720 = vmatpush3.bf16.msra.mxu0 %v5836_v17  ;;  %v5839_v18 = vld [vmem:[%s8009_s7 + $0x18] sm:$0xff]  }
 0x1b9   :  { %v3035_v22 = vrot.slane %v7214_v63, %v6069_v21  ;;  %v3583_v62 = vrot.slane %v3576_v29, %v6069_v21  ;;  %v3654_v38 = vcombine.low %v3639_v35, %v7191_v19  ;;  %v8127_v32 = vcombine.high %v7286_v15, %v7286_v15  ;;  %5701 = vmatprep.subr.bf16.mxu1 %v8126_v34 }
 0x1ba   :  { %v3042_v54 = vrot.slane %v3028_v56, %v6069_v21  ;;  %v4157_v5 = vmax.f32 %v4155_v24, %v4156_v42  ;;  %v3622_v40 = vrot.slane %v3615_v59, %v6069_v21  ;;  %5721 = vmatprep.subr.bf16.mxu0 %v8126_v34 }
 0x1bb   :  { %v3401_v63 = vadd.f32 %v7083_v12, %v8127_v32  ;;  %v3043_v61 = vcombine.high %v3035_v22, %v3035_v22  ;;  %v3051_v60 = vrot.slane %v3035_v22, %v6069_v21  ;;  %v3591_v17 = vcombine.low %v3583_v62, %v3590_v53  ;;  %v5840_v53 = vld [vmem:[%s8011_s9 + $0x18] sm:$0xff]  }
 0x1bc   :  { %v7405_v19 = vrot.slane %v3654_v38, %v6069_v21  ;;  %v3044_v16 = vcombine.high %v3042_v54, %v3042_v54  ;;  %v3058_v30 = vrot.slane %v3042_v54, %v6069_v21  ;;  %v4158_v15 = vrot.slane %v4157_v5, 2  ;;  %5702 = vmatpush3.bf16.msra.mxu1 %v5837_v46  ;;  %5722 = vmatpush3.bf16.msra.mxu0 %v5838_v6 }
 0x1bd   :  { %v3630_v13 = vcombine.low %v3622_v40, %v3629_v58  ;;  %v3065_v48 = vrot.slane %v3043_v61, %v6069_v21  ;;  %v3073_v39 = vcombine.high %v3051_v60, %v3051_v60  ;;  %v4162_v29 = vsel %vm4154_vm5, %v3591_v17, -inf  ;;  %5703 = vmatprep.subr.bf16.mxu1 %v8126_v34  ;;  %5723 = vmatprep.subr.bf16.mxu0 %v8126_v34 }
 0x1be   :  { %v3072_v35 = vrot.slane %v3044_v16, %v6069_v21  ;;  %v3074_v56 = vcombine.high %v3058_v30, %v3058_v30  ;;  %v7421_v42 = vmax.f32 %v4157_v5, %v4158_v15  ;;  %v4163_v59 = vrot.slane %v4162_v29, 4  ;;  %v5841_v5 = vld [vmem:[%s8009_s7 + $0x20] sm:$0xff]  }
 0x1bf   :  { %v4169_v58 = vsel %vm4154_vm5, %v3630_v13, -inf  ;;  %v3075_v22 = vcombine.high %v3065_v48, %v3065_v48  ;;  %v3402_v62 = vadd.f32 %v7117_v55, %v3051_v60  ;;  %v3403_v38 = vadd.f32 %v7065_v36, %v3065_v48  ;;  %v5842_v13 = vld [vmem:[%s8011_s9 + $0x20] sm:$0xff]  }
 0x1c0   :  { %v4170_v6 = vrot.slane %v4169_v58, 4  ;;  %v4164_v32 = vmax.f32 %v4162_v29, %v4163_v59  ;;  %v3076_v40 = vcombine.high %v3072_v35, %v3072_v35  ;;  %5704 = vmatpush3.bf16.msra.mxu1 %v5839_v18  ;;  %5724 = vmatpush3.bf16.msra.mxu0 %v5840_v53  ;;  %v3404_v17 = vadd.f32 %v7060_v57, %v3073_v39 }
 0x1c1   :  { %v3405_v61 = vadd.f32 %v7068_v33, %v3075_v22  ;;  %v3406_v16 = vadd.f32 %v7083_v12, %v3058_v30  ;;  %v3407_v60 = vadd.f32 %v7117_v55, %v3072_v35  ;;  %v3408_v15 = vadd.f32 %v7065_v36, %v3074_v56  ;;  %5705 = vmatprep.subr.bf16.mxu1 %v8126_v34 }
 0x1c2   :  { %v4165_v48 = vrot.slane %v4164_v32, 2  ;;  %v7440_v18 = vmax.f32 %v4169_v58, %v4170_v6  ;;  %v3866_v53 = vcombine.low %v3401_v63, %v3402_v62  ;;  %v3887_v29 = vrot.slane %v3403_v38, %v6069_v21  ;;  %5725 = vmatprep.subr.bf16.mxu0 %v8126_v34 }
 0x1c3   :  { %v8128_v30 = vcombine.low %v7303_v41, %v7307_v11  ;;  %v3904_v35 = vcombine.low %v3404_v17, %v3405_v61  ;;  %v3905_v56 = vcombine.low %v3406_v16, %v3407_v60  ;;  %v3926_v59 = vrot.slane %v3408_v15, %v6069_v21 }
 0x1c4   :  { %v7449_v22 = vmax.f32 %v4164_v32, %v4165_v48  ;;  %v3880_v46 = vrot.slane %v3866_v53, %v6069_v21  ;;  %v3902_v58 = vrot.slane %v3887_v29, %v6069_v21  ;;  %v3077_v63 = vcombine.high %v7227_v14, %v7227_v14  ;;  %5706 = vmatpush3.bf16.msra.mxu1 %v5841_v5 }
 0x1c5   :  { %v3873_v39 = vrot.slane %v8128_v30, %v6069_v21  ;;  %v3912_v6 = vrot.slane %v3904_v35, %v6069_v21  ;;  %v3919_v62 = vrot.slane %v3905_v56, %v6069_v21  ;;  %v3941_v41 = vrot.slane %v3926_v59, %v6069_v21  ;;  %5726 = vmatpush3.bf16.msra.mxu0 %v5842_v13 }
 0x1c6   :  { %v3084_v11 = vrot.slane %v7227_v14, %v6069_v21  ;;  %v3091_v61 = vrot.slane %v3077_v63, %v6069_v21  ;;  %v3409_v17 = vadd.f32 %v7060_v57, %v3076_v40  ;;  %5707 = vmatprep.subr.bf16.mxu1 %v8126_v34  ;;  %5727 = vmatprep.subr.bf16.mxu0 %v8126_v34 }
 0x1c7   :  { %v3888_v32 = vcombine.low %v3873_v39, %v3880_v46  ;;  %v3927_v5 = vcombine.low %v3912_v6, %v3919_v62  ;;  %v3126_v15 = vcombine.high %v7255_v4, %v7255_v4  ;;  %v3133_v48 = vrot.slane %v7255_v4, %v6069_v21 }
 0x1c8   :  { %v3092_v16 = vcombine.high %v3084_v11, %v3084_v11  ;;  %v3100_v60 = vrot.slane %v3084_v11, %v6069_v21  ;;  %v3093_v13 = vcombine.high %v3091_v61, %v3091_v61  ;;  %v3107_v46 = vrot.slane %v3091_v61, %v6069_v21 }
 0x1c9   :  { %v3895_v14 = vrot.slane %v3888_v32, %v6069_v21  ;;  %v3934_v40 = vrot.slane %v3927_v5, %v6069_v21 }
 0x1ca   :  { %v3114_v53 = vrot.slane %v3092_v16, %v6069_v21  ;;  %v3122_v29 = vcombine.high %v3100_v60, %v3100_v60  ;;  %v3410_v30 = vadd.f32 %v7068_v33, %v3100_v60  ;;  %v3121_v35 = vrot.slane %v3093_v13, %v6069_v21 }
 0x1cb   :  { %v3903_v39 = vcombine.low %v3895_v14, %v3902_v58  ;;  %v3123_v56 = vcombine.high %v3107_v46, %v3107_v46  ;;  %v3414_v59 = vadd.f32 %v7060_v57, %v3107_v46  ;;  %v3942_v63 = vcombine.low %v3934_v40, %v3941_v41 }
 0x1cc   :  { %v3124_v6 = vcombine.high %v3114_v53, %v3114_v53  ;;  %v3411_v62 = vadd.f32 %v7083_v12, %v3114_v53  ;;  %v3412_v11 = vadd.f32 %v7117_v55, %v3122_v29  ;;  %v3125_v32 = vcombine.high %v3121_v35, %v3121_v35 }
 0x1cd   :  { %v4218_v4 = vsel %vm4154_vm5, %v3903_v39, -inf  ;;  %v3415_v61 = vadd.f32 %v7068_v33, %v3121_v35  ;;  %v3416_v5 = vadd.f32 %v7083_v12, %v3123_v56  ;;  %v4225_v58 = vsel %vm4154_vm5, %v3942_v63, -inf }
 0x1ce   :  { %v4219_v16 = vrot.slane %v4218_v4, 4  ;;  %v3413_v60 = vadd.f32 %v7065_v36, %v3124_v6  ;;  %v3943_v14 = vcombine.low %v3409_v17, %v3410_v30  ;;  %v4226_v13 = vrot.slane %v4225_v58, 4 }
 0x1cf   :  { %v3417_v41 = vadd.f32 %v7117_v55, %v3125_v32  ;;  %v3944_v46 = vcombine.low %v3411_v62, %v3412_v11  ;;  %v3982_v40 = vcombine.low %v3414_v59, %v3415_v61  ;;  %v3140_v35 = vrot.slane %v3126_v15, %v6069_v21 }
 0x1d0   :  { %v4220_v53 = vmax.f32 %v4218_v4, %v4219_v16  ;;  %v3951_v29 = vrot.slane %v3943_v14, %v6069_v21  ;;  %v3965_v39 = vrot.slane %v3413_v60, %v6069_v21  ;;  %v7489_v24 = vmax.f32 %v4225_v58, %v4226_v13 }
 0x1d1   :  { %v3958_v63 = vrot.slane %v3944_v46, %v6069_v21  ;;  %v3983_v6 = vcombine.low %v3416_v5, %v3417_v41  ;;  %v3990_v30 = vrot.slane %v3982_v40, %v6069_v21  ;;  %v3141_v32 = vcombine.high %v3133_v48, %v3133_v48 }
 0x1d2   :  { %v4221_v17 = vrot.slane %v4220_v53, 2  ;;  %v3142_v62 = vcombine.high %v3140_v35, %v3140_v35  ;;  %v3980_v11 = vrot.slane %v3965_v39, %v6069_v21  ;;  %v3149_v61 = vrot.slane %v3133_v48, %v6069_v21 }
 0x1d3   :  { %v3966_v59 = vcombine.low %v3951_v29, %v3958_v63  ;;  %v3997_v4 = vrot.slane %v3983_v6, %v6069_v21  ;;  %v3156_v16 = vrot.slane %v3140_v35, %v6069_v21  ;;  %v3163_v58 = vrot.slane %v3141_v32, %v6069_v21 }
 0x1d4   :  { %v3170_v5 = vrot.slane %v3142_v62, %v6069_v21  ;;  %v3171_v13 = vcombine.high %v3149_v61, %v3149_v61  ;;  %v3418_v41 = vadd.f32 %v7065_v36, %v3149_v61  ;;  %v7502_v46 = vmax.f32 %v4220_v53, %v4221_v17 }
 0x1d5   :  { %v3973_v60 = vrot.slane %v3966_v59, %v6069_v21  ;;  %v4005_v14 = vcombine.low %v3990_v30, %v3997_v4  ;;  %v3172_v40 = vcombine.high %v3156_v16, %v3156_v16  ;;  %v3173_v29 = vcombine.high %v3163_v58, %v3163_v58 }
 0x1d6   :  { %v3174_v39 = vcombine.high %v3170_v5, %v3170_v5  ;;  %v3419_v63 = vadd.f32 %v7060_v57, %v3163_v58  ;;  %v3420_v35 = vadd.f32 %v7068_v33, %v3171_v13  ;;  %v3422_v6 = vadd.f32 %v7117_v55, %v3156_v16 }
 0x1d7   :  { %v3981_v48 = vcombine.low %v3973_v60, %v3980_v11  ;;  %v3421_v32 = vadd.f32 %v7083_v12, %v3173_v29  ;;  %v3423_v62 = vadd.f32 %v7065_v36, %v3170_v5  ;;  %v3424_v30 = vadd.f32 %v7060_v57, %v3172_v40 }
 0x1d8   :  { %v3425_v59 = vadd.f32 %v7068_v33, %v3174_v39  ;;  %v4004_v17 = vrot.slane %v3418_v41, %v6069_v21  ;;  %v4012_v11 = vrot.slane %v4005_v14, %v6069_v21  ;;  %v4021_v4 = vcombine.low %v3419_v63, %v3420_v35  ;;  %v7524_v14 = vld [vmem:[%s8008_s6] ss:$0 sm:$0xff] }
 0x1d9   :  { %v4232_v53 = vsel %vm4154_vm5, %v3981_v48, -inf  ;;  %v4022_v58 = vcombine.low %v3421_v32, %v3422_v6  ;;  %v4043_v60 = vrot.slane %v3423_v62, %v6069_v21  ;;  %v3175_v40 = vcombine.high %v7268_v26, %v7268_v26 }
 0x1da   :  { %v4233_v61 = vrot.slane %v4232_v53, 4  ;;  %v4060_v16 = vcombine.low %v3424_v30, %v3425_v59  ;;  %v4019_v5 = vrot.slane %v4004_v17, %v6069_v21  ;;  %v3182_v29 = vrot.slane %v7268_v26, %v6069_v21 }
 0x1db   :  { %v4029_v39 = vrot.slane %v4021_v4, %v6069_v21  ;;  %v4036_v48 = vrot.slane %v4022_v58, %v6069_v21  ;;  %v7531_v63 = vrot.slane %v4043_v60, %v6069_v21  ;;  %v3189_v6 = vrot.slane %v3175_v40, %v6069_v21 }
 0x1dc   :  { %v7526_v41 = vmax.f32 %v4232_v53, %v4233_v61  ;;  %v4020_v35 = vcombine.low %v4012_v11, %v4019_v5  ;;  %v3190_v32 = vcombine.high %v3182_v29, %v3182_v29  ;;  %v3198_v26 = vrot.slane %v3182_v29, %v6069_v21 }
 0x1dd   :  { %v4044_v62 = vcombine.low %v4029_v39, %v4036_v48  ;;  %v4068_v30 = vrot.slane %v4060_v16, %v6069_v21  ;;  %v4559_v59 = vcombine.high %v7208_v50, %v7208_v50  ;;  %v4584_v53 = vadd.f32 %v7208_v50, %v7524_v14 }
 0x1de   :  { %v4239_v17 = vsel %vm4154_vm5, %v4020_v35, -inf  ;;  %v3191_v4 = vcombine.high %v3189_v6, %v3189_v6  ;;  %v3205_v61 = vrot.slane %v3189_v6, %v6069_v21  ;;  %v3212_v11 = vrot.slane %v3190_v32, %v6069_v21 }
 0x1df   :  { %v7544_v58 = vrot.slane %v4044_v62, %v6069_v21  ;;  %v4240_v60 = vrot.slane %v4239_v17, 4  ;;  %v3220_v5 = vcombine.high %v3198_v26, %v3198_v26  ;;  %v4557_v16 = vcombine.high %v7216_v23, %v7216_v23 }
 0x1e0   :  { %v3219_v40 = vrot.slane %v3191_v4, %v6069_v21  ;;  %v3221_v29 = vcombine.high %v3205_v61, %v3205_v61  ;;  %v3222_v39 = vcombine.high %v3212_v11, %v3212_v11  ;;  %v3427_v50 = vadd.f32 %v7117_v55, %v3212_v11 }
 0x1e1   :  { %v7550_v48 = vmax.f32 %v4239_v17, %v4240_v60  ;;  %v3426_v35 = vadd.f32 %v7083_v12, %v3198_v26  ;;  %v3428_v6 = vadd.f32 %v7065_v36, %v3220_v5  ;;  %v3430_v32 = vadd.f32 %v7068_v33, %v3205_v61 }
 0x1e2   :  { %v3223_v62 = vcombine.high %v3219_v40, %v3219_v40  ;;  %v3429_v15 = vadd.f32 %v7060_v57, %v3222_v39  ;;  %v3431_v13 = vadd.f32 %v7083_v12, %v3219_v40  ;;  %v3432_v38 = vadd.f32 %v7117_v55, %v3221_v29 }
 0x1e3   :  { %v4061_v56 = vcombine.low %v3426_v35, %v3427_v50  ;;  %v4082_v17 = vrot.slane %v3428_v6, %v6069_v21  ;;  %v4585_v11 = vadd.f32 %v7524_v14, %v4559_v59  ;;  %v4625_v61 = vsel %vm4596_vm6, %v4584_v53, -inf }
 0x1e4   :  { %v7563_v26 = vadd.f32 %v7065_v36, %v3223_v62  ;;  %v4099_v60 = vcombine.low %v3429_v15, %v3430_v32  ;;  %v4100_v33 = vcombine.low %v3431_v13, %v3432_v38  ;;  %v4626_v55 = vrot.slane %v4625_v61, 4 }
 0x1e5   :  { %v4075_v12 = vrot.slane %v4061_v56, %v6069_v21  ;;  %v4632_v5 = vsel %vm4596_vm6, %v4585_v11, -inf  ;;  %v7570_v40 = vrot.slane %v4082_v17, %v6069_v21  ;;  %v4580_v59 = vadd.f32 %v7524_v14, %v7216_v23 }
 0x1e6   :  { %v7573_v29 = vrot.slane %v4099_v60, %v6069_v21  ;;  %v7576_v36 = vrot.slane %v4100_v33, %v6069_v21  ;;  %v4633_v15 = vrot.slane %v4632_v5, 4  ;;  %v4627_v13 = vmax.f32 %v4625_v61, %v4626_v55 }
 0x1e7   :  { %v4083_v38 = vcombine.low %v4068_v30, %v4075_v12  ;;  %v4581_v56 = vadd.f32 %v7524_v14, %v4557_v16  ;;  %v4560_v50 = vcombine.high %v7223_v27, %v7223_v27  ;;  %v4586_v35 = vadd.f32 %v7223_v27, %v7524_v14 }
 0x1e8   :  { %v4634_v39 = vmax.f32 %v4632_v5, %v4633_v15  ;;  %v4628_v30 = vrot.slane %v4627_v13, 2  ;;  %v4597_v32 = vsel %vm4596_vm6, %v4580_v59, -inf  ;;  %v4558_v27 = vcombine.high %v7229_v10, %v7229_v10 }
 0x1e9   :  { %v7588_v6 = vrot.slane %v4083_v38, %v6069_v21  ;;  %v4604_v23 = vsel %vm4596_vm6, %v4581_v56, -inf  ;;  %v4598_v16 = vrot.slane %v4597_v32, 4  ;;  %v4587_v11 = vadd.f32 %v7524_v14, %v4560_v50 }
 0x1ea   :  { %v4635_v62 = vrot.slane %v4634_v39, 2  ;;  %v4605_v17 = vrot.slane %v4604_v23, 4  ;;  %v4629_v33 = vmax.f32 %v4627_v13, %v4628_v30  ;;  %v4639_v61 = vsel %vm4596_vm6, %v4586_v35, -inf }
 0x1eb   :  { %v4599_v55 = vmax.f32 %v4597_v32, %v4598_v16  ;;  %v4640_v15 = vrot.slane %v4639_v61, 4  ;;  %v4646_v59 = vsel %vm4596_vm6, %v4587_v11, -inf  ;;  %v4582_v56 = vadd.f32 %v7524_v14, %v7229_v10 }
 0x1ec   :  { %v4636_v12 = vmax.f32 %v4634_v39, %v4635_v62  ;;  %v4606_v5 = vmax.f32 %v4604_v23, %v4605_v17  ;;  %v4630_v38 = vrot.slane %v4629_v33, 1  ;;  %v4583_v50 = vadd.f32 %v7524_v14, %v4558_v27 }
 0x1ed   :  { %v4600_v60 = vrot.slane %v4599_v55, 2  ;;  %v4641_v30 = vmax.f32 %v4639_v61, %v4640_v15  ;;  %v4647_v57 = vrot.slane %v4646_v59, 4  ;;  %v4611_v39 = vsel %vm4596_vm6, %v4582_v56, -inf }
 0x1ee   :  { %v4637_v4 = vrot.slane %v4636_v12, 1  ;;  %v4607_v13 = vrot.slane %v4606_v5, 2  ;;  %v7602_v35 = vmax.f32 %v4629_v33, %v4630_v38  ;;  %v4618_v32 = vsel %vm4596_vm6, %v4583_v50, -inf }
 0x1ef   :  { %v4601_v62 = vmax.f32 %v4599_v55, %v4600_v60  ;;  %v4642_v17 = vrot.slane %v4641_v30, 2  ;;  %v7610_v11 = vmax.f32 %v4646_v59, %v4647_v57  ;;  %v4612_v27 = vrot.slane %v4611_v39, 4 }
 0x1f0   :  { %v4608_v16 = vmax.f32 %v4606_v5, %v4607_v13  ;;  %v7608_v10 = vmax.f32 %v4636_v12, %v4637_v4  ;;  %v4619_v53 = vrot.slane %v4618_v32, 4  ;;  %v4563_v38 = vcombine.high %v7257_v45, %v7257_v45 }
 0x1f1   :  { %v4602_v61 = vrot.slane %v4601_v62, 1  ;;  %v4643_v15 = vmax.f32 %v4641_v30, %v4642_v17  ;;  %v4613_v50 = vmax.f32 %v4611_v39, %v4612_v27  ;;  %v4592_v60 = vadd.f32 %v7257_v45, %v7524_v14 }
 0x1f2   :  { %v4609_v33 = vrot.slane %v4608_v16, 1  ;;  %v4620_v23 = vmax.f32 %v4618_v32, %v4619_v53  ;;  %v4593_v55 = vadd.f32 %v7524_v14, %v4563_v38  ;;  %v4561_v30 = vcombine.high %v7262_v44, %v7262_v44 }
 0x1f3   :  { %v4603_v4 = vmax.f32 %v4601_v62, %v4602_v61  ;;  %v4644_v57 = vrot.slane %v4643_v15, 1  ;;  %v4614_v5 = vrot.slane %v4613_v50, 2  ;;  %v4681_v13 = vsel %vm4596_vm6, %v4592_v60, -inf }
 0x1f4   :  { %v4610_v12 = vmax.f32 %v4608_v16, %v4609_v33  ;;  %v4621_v59 = vrot.slane %v4620_v23, 2  ;;  %v4682_v53 = vrot.slane %v4681_v13, 4  ;;  %v4688_v45 = vsel %vm4596_vm6, %v4593_v55, -inf }
 0x1f5   :  { %v4709_v17 = vmax.f32 %v4603_v4, 0.0  ;;  %v4615_v32 = vmax.f32 %v4613_v50, %v4614_v5  ;;  %v4588_v62 = vadd.f32 %v7524_v14, %v7262_v44  ;;  %v7625_v16 = vmax.f32 %v4643_v15, %v4644_v57 }
 0x1f6   :  { %v4710_v54 = vmax.f32 %v4610_v12, 0.0  ;;  %v4622_v27 = vmax.f32 %v4620_v23, %v4621_v59  ;;  %v4683_v61 = vmax.f32 %v4681_v13, %v4682_v53  ;;  %v4689_v33 = vrot.slane %v4688_v45, 4 }
 0x1f7   :  { %v4589_v38 = vadd.f32 %v7524_v14, %v4561_v30  ;;  %v4616_v60 = vrot.slane %v4615_v32, 1  ;;  %v4653_v4 = vsel %vm4596_vm6, %v4588_v62, -inf  ;;  %v4564_v12 = vcombine.high %v7270_v31, %v7270_v31 }
 0x1f8   :  { %v4623_v56 = vrot.slane %v4622_v27, 1  ;;  %v4684_v50 = vrot.slane %v4683_v61, 2  ;;  %v4690_v23 = vmax.f32 %v4688_v45, %v4689_v33  ;;  %v4654_v5 = vrot.slane %v4653_v4, 4 }
 0x1f9   :  { %v4660_v55 = vsel %vm4596_vm6, %v4589_v38, -inf  ;;  %v7633_v44 = vsel %vm4741_vm7, %v4710_v54, %v4709_v17  ;;  %v7635_v15 = vmax.f32 %v4615_v32, %v4616_v60  ;;  %v4594_v59 = vadd.f32 %v7270_v31, %v7524_v14 }
 0x1fa   :  { %v4661_v57 = vrot.slane %v4660_v55, 4  ;;  %v4685_v13 = vmax.f32 %v4683_v61, %v4684_v50  ;;  %v4691_v30 = vrot.slane %v4690_v23, 2  ;;  %v4655_v53 = vmax.f32 %v4653_v4, %v4654_v5 }
 0x1fb   :  { %v4595_v62 = vadd.f32 %v7524_v14, %v4564_v12  ;;  %v7640_v39 = vmax.f32 %v4622_v27, %v4623_v56  ;;  %v4695_v38 = vsel %vm4596_vm6, %v4594_v59, -inf  ;;  %v4562_v31 = vcombine.high %v7279_v49, %v7279_v49 }
 0x1fc   :  { %v4662_v33 = vmax.f32 %v4660_v55, %v4661_v57  ;;  %v4686_v54 = vrot.slane %v4685_v13, 1  ;;  %v4692_v17 = vmax.f32 %v4690_v23, %v4691_v30  ;;  %v4656_v32 = vrot.slane %v4655_v53, 2 }
 0x1fd   :  { %v4696_v60 = vrot.slane %v4695_v38, 4  ;;  %v4702_v3 = vsel %vm4596_vm6, %v4595_v62, -inf  ;;  %v4590_v61 = vadd.f32 %v7524_v14, %v7279_v49  ;;  %v4591_v23 = vadd.f32 %v7524_v14, %v4562_v31 }
 0x1fe   :  { %v4663_v20 = vrot.slane %v4662_v33, 2  ;;  %v7649_v56 = vmax.f32 %v4685_v13, %v4686_v54  ;;  %v4693_v27 = vrot.slane %v4692_v17, 1  ;;  %v4657_v4 = vmax.f32 %v4655_v53, %v4656_v32 }
 0x1ff   :  { %v4697_v12 = vmax.f32 %v4695_v38, %v4696_v60  ;;  %v4703_v5 = vrot.slane %v4702_v3, 4  ;;  %v4667_v55 = vsel %vm4596_vm6, %v4590_v61, -inf  ;;  %v4712_v57 = vmax.f32 %v7640_v39, 0.0 }
 0x200   :  { %v4664_v50 = vmax.f32 %v4662_v33, %v4663_v20  ;;  %v7654_v59 = vmax.f32 %v4692_v17, %v4693_v27  ;;  %v4658_v30 = vrot.slane %v4657_v4, 1  ;;  %v4668_v49 = vrot.slane %v4667_v55, 4 }
 0x201   :  { %v4698_v62 = vrot.slane %v4697_v12, 2  ;;  %v7656_v37 = vmax.f32 %v4702_v3, %v4703_v5  ;;  %v4674_v13 = vsel %vm4596_vm6, %v4591_v23, -inf  ;;  %v8129_v14 = vcombine.low %v7273_v2, %v7276_v8 }
 0x202   :  { %v4665_v45 = vrot.slane %v4664_v50, 1  ;;  %v4659_v53 = vmax.f32 %v4657_v4, %v4658_v30  ;;  %v4675_v20 = vrot.slane %v4674_v13, 4  ;;  %v4721_v54 = vmax.f32 %v7649_v56, 0.0 }
 0x203   :  { %v4699_v38 = vmax.f32 %v4697_v12, %v4698_v62  ;;  %v3817_v33 = vrot.slane %v8129_v14, %v6069_v21  ;;  %v4669_v32 = vmax.f32 %v4667_v55, %v4668_v49  ;;  %v8130_v3 = vrot.slane %v7250_v52, %v6069_v21 }
 0x204   :  { %v4666_v17 = vmax.f32 %v4664_v50, %v4665_v45  ;;  %v4717_v31 = vmax.f32 %v4659_v53, 0.0  ;;  %v4705_v27 = vrot.slane %v7656_v37, 2  ;;  %v4676_v4 = vmax.f32 %v4674_v13, %v4675_v20 }
 0x205   :  { %v3824_v60 = vrot.slane %v8130_v3, %v6069_v21  ;;  %v4700_v61 = vrot.slane %v4699_v38, 1  ;;  %v4670_v5 = vrot.slane %v4669_v32, 2  ;;  %v8131_v2 = vrot.slane %v7421_v42, 1 }
 0x206   :  { %v4718_v12 = vmax.f32 %v4666_v17, 0.0  ;;  %v4677_v30 = vrot.slane %v4676_v4, 2  ;;  %v8132_v45 = vrot.slane %v7449_v22, 1  ;;  %v8133_v52 = vrot.slane %v7440_v18, 2 }
 0x207   :  { %v3825_v23 = vcombine.low %v3817_v33, %v3824_v60  ;;  %v4161_v8 = vmax.f32 %v7421_v42, %v8131_v2  ;;  %v8134_v62 = vcombine.low %v7405_v19, %v7205_v47  ;;  %v7682_v13 = vmax.f32 %v4699_v38, %v4700_v61 }
 0x208   :  { %v4168_v50 = vmax.f32 %v7449_v22, %v8132_v45  ;;  %v4173_v55 = vmax.f32 %v7440_v18, %v8133_v52  ;;  %v4671_v53 = vmax.f32 %v4669_v32, %v4670_v5  ;;  %v8135_v42 = vrot.slane %v7247_v9, 2 }
 0x209   :  { %v4176_v49 = vsel %vm4154_vm5, %v8134_v62, -inf  ;;  %v4678_v33 = vmax.f32 %v4676_v4, %v4677_v30  ;;  %v8136_v22 = vcombine.low %v7235_v51, %v7220_v43  ;;  %v8137_v47 = vcombine.low %v7289_v28, %v7266_v25 }
 0x20a   :  { %v4177_v20 = vrot.slane %v4176_v49, 4  ;;  %v4187_v14 = vmax.f32 %v7247_v9, %v8135_v42  ;;  %v4174_v17 = vrot.slane %v4173_v55, 1  ;;  %v4672_v38 = vrot.slane %v4671_v53, 1 }
 0x20b   :  { %v4190_v18 = vsel %vm4154_vm5, %v8136_v22, -inf  ;;  %v4197_v19 = vsel %vm4154_vm5, %v8137_v47, -inf  ;;  %v4679_v61 = vrot.slane %v4678_v33, 1  ;;  %v4204_v4 = vsel %vm4154_vm5, %v3825_v23, -inf }
 0x20c   :  { %v4178_v32 = vmax.f32 %v4176_v49, %v4177_v20  ;;  %v4188_v3 = vrot.slane %v4187_v14, 1  ;;  %v4191_v60 = vrot.slane %v4190_v18, 4  ;;  %v4175_v5 = vmax.f32 %v4173_v55, %v4174_v17 }
 0x20d   :  { %v4198_v9 = vrot.slane %v4197_v19, 4  ;;  %v7696_v2 = vmax.f32 %v4671_v53, %v4672_v38  ;;  %v7699_v25 = vsel %vm4741_vm7, %v4718_v12, %v4717_v31  ;;  %v7701_v28 = vmax.f32 %v4678_v33, %v4679_v61  ;;  %v5843_v31 = vld [vmem:[%s8009_s7 + $0x28] sm:$0xff]  }
 0x20e   :  { %v4179_v51 = vrot.slane %v4178_v32, 2  ;;  %v4189_v43 = vmax.f32 %v4187_v14, %v4188_v3  ;;  %v4192_v30 = vmax.f32 %v4190_v18, %v4191_v60  ;;  %v4205_v52 = vrot.slane %v4204_v4, 4  ;;  %v5844_v12 = vld [vmem:[%s8011_s9 + $0x28] sm:$0xff]   ;;  %5708 = vmatpush3.bf16.msra.mxu1 %v5843_v31 }
 0x20f   :  { %v4199_v45 = vmax.f32 %v4197_v19, %v4198_v9  ;;  %v4267_v55 = vmax.f32 %v4161_v8, 0.0  ;;  %v4268_v20 = vmax.f32 %v4168_v50, 0.0  ;;  %v4719_v23 = vmax.f32 %v7696_v2, 0.0  ;;  %5728 = vmatpush3.bf16.msra.mxu0 %v5844_v12  ;;  %5709 = vmatprep.subr.bf16.mxu1 %v8126_v34 }
 0x210   :  { %v4180_v62 = vmax.f32 %v4178_v32, %v4179_v51  ;;  %v4193_v49 = vrot.slane %v4192_v30, 2  ;;  %v4206_v42 = vmax.f32 %v4204_v4, %v4205_v52  ;;  %v4269_v17 = vmax.f32 %v4175_v5, 0.0  ;;  %5729 = vmatprep.subr.bf16.mxu0 %v8126_v34 }
 0x211   :  { %v4200_v53 = vrot.slane %v4199_v45, 2  ;;  %v4720_v14 = vmax.f32 %v7701_v28, 0.0  ;;  %v4271_v8 = vmax.f32 %v4189_v43, 0.0  ;;  %v4780_v47 = vsel %vm4741_vm7, %v4268_v20, %v4267_v55  ;;  %v5848_v28 = vld [vmem:[%s8011_s9 + $0x38] sm:$0xff]  }
 0x212   :  { %v4181_v33 = vrot.slane %v4180_v62, 1  ;;  %v4194_v22 = vmax.f32 %v4192_v30, %v4193_v49  ;;  %v4207_v18 = vrot.slane %v4206_v42, 2  ;;  %v8138_v19 = vrot.slane %v7610_v11, 2 }
 0x213   :  { %v4201_v50 = vmax.f32 %v4199_v45, %v4200_v53  ;;  %v4781_v60 = vsel %vm4743_vm8, %v4269_v17, %v4780_v47  ;;  %v4714_v61 = vmax.f32 %v7608_v10, 0.0  ;;  %v4715_v51 = vmax.f32 %v7625_v16, 0.0 }
 0x214   :  { %v4650_v38 = vmax.f32 %v7610_v11, %v8138_v19  ;;  %v4182_v32 = vmax.f32 %v4180_v62, %v4181_v33  ;;  %v4195_v3 = vrot.slane %v4194_v22, 1  ;;  %v4208_v9 = vmax.f32 %v4206_v42, %v4207_v18 }
 0x215   :  { %v4202_v5 = vrot.slane %v4201_v50, 1  ;;  %v8139_v11 = vmax.f32 %v7635_v15, 0.0  ;;  %v8140_v10 = vcombine.low %v7573_v29, %v7576_v36  ;;  %v8141_v42 = vmax.f32 %v7602_v35, 0.0 }
 0x216   :  { %v4651_v4 = vrot.slane %v4650_v38, 1  ;;  %v4196_v43 = vmax.f32 %v4194_v22, %v4195_v3  ;;  %v4270_v30 = vmax.f32 %v4182_v32, 0.0  ;;  %v4209_v49 = vrot.slane %v4208_v9, 1 }
 0x217   :  { %v4817_v45 = vsel %vm4743_vm8, %v8139_v11, %v7633_v44  ;;  %v4129_v52 = vrot.slane %v8140_v10, %v6069_v21  ;;  %v4203_v62 = vmax.f32 %v4201_v50, %v4202_v5  ;;  %v8142_v44 = vrot.slane %v7563_v26, %v6069_v21 }
 0x218   :  { %v4652_v55 = vmax.f32 %v4650_v38, %v4651_v4  ;;  %v4818_v20 = vsel %vm4745_vm9, %v4712_v57, %v4817_v45  ;;  %v4272_v16 = vmax.f32 %v4196_v43, 0.0  ;;  %v4782_v53 = vsel %vm4745_vm9, %v4270_v30, %v4781_v60 }
 0x219   :  { %v4819_v15 = vsel %vm4747_vm10, %v8141_v42, %v4818_v20  ;;  %v4136_v29 = vrot.slane %v8142_v44, %v6069_v21  ;;  %v4210_v36 = vmax.f32 %v4208_v9, %v4209_v49  ;;  %v4273_v17 = vmax.f32 %v4203_v62, 0.0  ;;  %v5845_v42 = vld [vmem:[%s8009_s7 + $0x30] sm:$0xff]  }
 0x21a   :  { %v4783_v31 = vsel %vm4747_vm10, %v4271_v8, %v4782_v53  ;;  %v4716_v12 = vmax.f32 %v4652_v55, 0.0  ;;  %v4820_v57 = vsel %vm4749_vm11, %v4714_v61, %v4819_v15  ;;  %v8143_v22 = vrot.slane %v7374_v1, 1  ;;  %v5846_v15 = vld [vmem:[%s8011_s9 + $0x30] sm:$0xff]   ;;  %5710 = vmatpush3.bf16.msra.mxu1 %v5845_v42 }
 0x21b   :  { %v4784_v39 = vsel %vm4749_vm11, %v4272_v16, %v4783_v31  ;;  %v4137_v33 = vcombine.low %v4129_v52, %v4136_v29  ;;  %v4274_v50 = vmax.f32 %v4210_v36, 0.0  ;;  %v4821_v26 = vsel %vm4751_vm12, %v4715_v51, %v4820_v57  ;;  %5730 = vmatpush3.bf16.msra.mxu0 %v5846_v15  ;;  %5711 = vmatprep.subr.bf16.mxu1 %v8126_v34 }
 0x21c   :  { %v4217_v35 = vmax.f32 %v7374_v1, %v8143_v22  ;;  %v4785_v18 = vsel %vm4751_vm12, %v4273_v17, %v4784_v39  ;;  %v8144_v21 = vrot.slane %v7502_v46, 1  ;;  %v4822_v8 = vsel %vm4753_vm13, %v4716_v12, %v4821_v26  ;;  %5731 = vmatprep.subr.bf16.mxu0 %v8126_v34 }
 0x21d   :  { %v8145_v19 = vrot.slane %v7489_v24, 2  ;;  %v4235_v32 = vrot.slane %v7526_v41, 2  ;;  %v8146_v3 = vrot.slane %v7550_v48, 2  ;;  %v4786_v60 = vsel %vm4753_vm13, %v4274_v50, %v4785_v18 }
 0x21e   :  { %v4224_v47 = vmax.f32 %v7502_v46, %v8144_v21  ;;  %v8147_v61 = vcombine.low %v7544_v58, %v7531_v63  ;;  %v8148_v46 = vcombine.low %v7588_v6, %v7570_v40  ;;  %4794 = vrot.lane.b32.xlu0 %v4786_v60, %s5915_s26  ;;  %v4275_v45 = vmax.f32 %v4217_v35, 0.0  ;;  %v8152_v60 = vld [vmem:[#allocation14_spill] sm:$0xff] }
 0x21f   :  { %v4229_v38 = vmax.f32 %v7489_v24, %v8145_v19  ;;  %v4243_v1 = vmax.f32 %v7550_v48, %v8146_v3  ;;  %v4260_v24 = vsel %vm4154_vm5, %v4137_v33, -inf  ;;  %v4236_v51 = vmax.f32 %v7526_v41, %v4235_v32  ;;  %v8151_v19 = vld [vmem:[#allocation12_spill] sm:$0xff]  ;;  %5732 = vmatpush3.bf16.msra.mxu0 %v5848_v28 }
 0x220   :  { %v4246_v5 = vsel %vm4154_vm5, %v8147_v61, -inf  ;;  %v4253_v9 = vsel %vm4154_vm5, %v8148_v46, -inf  ;;  %v4261_v11 = vrot.slane %v4260_v24, 4  ;;  %v4276_v63 = vmax.f32 %v4224_v47, 0.0  ;;  %5757 = vmatprep.subr.bf16.mxu0 %v8126_v34 }
 0x221   :  { %v4230_v4 = vrot.slane %v4229_v38, 1  ;;  %v4244_v48 = vrot.slane %v4243_v1, 1  ;;  %v4247_v43 = vrot.slane %v4246_v5, 4  ;;  %v4254_v30 = vrot.slane %v4253_v9, 4 }
 0x222   :  { %v4237_v10 = vrot.slane %v4236_v51, 1  ;;  %v4262_v6 = vmax.f32 %v4260_v24, %v4261_v11  ;;  %v4787_v49 = vsel %vm4741_vm7, %v4276_v63, %v4275_v45  ;;  %v4706_v55 = vmax.f32 %v7656_v37, %v4705_v27  ;;  %4830 = vrot.lane.b32.xlu0 %v4822_v8, %s5919_s21  ;;  %v8155_v63 = vld [vmem:[#allocation15_spill] sm:$0xff] }
 0x223   :  { %v4231_v58 = vmax.f32 %v4229_v38, %v4230_v4  ;;  %v4245_v52 = vmax.f32 %v4243_v1, %v4244_v48  ;;  %v4248_v62 = vmax.f32 %v4246_v5, %v4247_v43  ;;  %v4255_v40 = vmax.f32 %v4253_v9, %v4254_v30 }
 0x224   :  { %v4238_v41 = vmax.f32 %v4236_v51, %v4237_v10  ;;  %v4263_v29 = vrot.slane %v4262_v6, 2  ;;  %v4707_v36 = vrot.slane %v4706_v55, 1  ;;  %v4722_v37 = vmax.f32 %v7654_v59, 0.0 }
 0x225   :  { %v4249_v20 = vrot.slane %v4248_v62, 2  ;;  %v4277_v16 = vmax.f32 %v4231_v58, 0.0  ;;  %v4279_v53 = vmax.f32 %v4245_v52, 0.0  ;;  %v4256_v44 = vrot.slane %v4255_v40, 2 }
 0x226   :  { %v4278_v17 = vmax.f32 %v4238_v41, 0.0  ;;  %v4723_v12 = vmax.f32 %v7682_v13, 0.0  ;;  %v4264_v57 = vmax.f32 %v4262_v6, %v4263_v29  ;;  %v4708_v33 = vmax.f32 %v4706_v55, %v4707_v36  ;;  %v8158_v6 = vld [vmem:[#allocation6_spill] sm:$0xff]  ;;  %v8162_v29 = vld [vmem:[#allocation13_spill] sm:$0xff] }
 0x227   :  { %v4250_v27 = vmax.f32 %v4248_v62, %v4249_v20  ;;  %v4788_v31 = vsel %vm4743_vm8, %v4277_v16, %v4787_v49  ;;  %v4257_v39 = vmax.f32 %v4255_v40, %v4256_v44  ;;  %v4824_v22 = vsel %vm4743_vm8, %v4719_v23, %v7699_v25  ;;  %v5847_v23 = vld [vmem:[%s8009_s7 + $0x38] sm:$0xff]   ;;  %v8156_v62 = vld [vmem:[#allocation5_spill] sm:$0xff] }
 0x228   :  { %v4789_v59 = vsel %vm4745_vm9, %v4278_v17, %v4788_v31  ;;  %v4825_v50 = vsel %vm4745_vm9, %v4720_v14, %v4824_v22  ;;  %v8149_v13 = vrot.slane %v7109_v7, 1  ;;  %v4265_v21 = vrot.slane %v4264_v57, 1  ;;  %5712 = vmatpush3.bf16.msra.mxu1 %v5847_v23  ;;  %v8167_v22 = vld [vmem:[#allocation17_spill] sm:$0xff] }
 0x229   :  { %v4251_v35 = vrot.slane %v4250_v27, 1  ;;  %v4258_v26 = vrot.slane %v4257_v39, 1  ;;  %v4790_v2 = vsel %vm4747_vm10, %v4279_v53, %v4789_v59  ;;  %v4724_v25 = vmax.f32 %v4708_v33, 0.0  ;;  %5737 = vmatprep.subr.bf16.mxu1 %v8126_v34  ;;  %v8160_v53 = vld [vmem:[#allocation8_spill] sm:$0xff]  ;;  %v8168_v59 = vld [vmem:[#allocation11_spill] sm:$0xff] }
 0x22a   :  { %v1545_v18 = vmax.f32 %v7109_v7, %v8149_v13  ;;  %v4826_v7 = vsel %vm4747_vm10, %v4721_v54, %v4825_v50  ;;  %v8150_v47 = vrot.slane %v7113_v0, 1  ;;  %v1558_v38 = vrot.slane %v8151_v19, 1  ;;  %v8153_v54 = vld [vmem:[#allocation7_spill] sm:$0xff] }
 0x22b   :  { %v4252_v14 = vmax.f32 %v4250_v27, %v4251_v35  ;;  %v4259_v32 = vmax.f32 %v4257_v39, %v4258_v26  ;;  %v4266_v3 = vmax.f32 %v4264_v57, %v4265_v21  ;;  %v4827_v1 = vsel %vm4749_vm11, %v4722_v37, %v4826_v7  ;;  %v8164_v27 = vld [vmem:[#allocation16_spill] sm:$0xff] }
 0x22c   :  { %v1552_v8 = vmax.f32 %v7113_v0, %v8150_v47  ;;  %v1565_v61 = vrot.slane %v8152_v60, 1  ;;  %v4828_v46 = vsel %vm4751_vm12, %v4723_v12, %v4827_v1  ;;  %v1559_v56 = vmax.f32 %v8151_v19, %v1558_v38  ;;  %v8166_v12 = vld [vmem:[#allocation18_spill] sm:$0xff]  ;;  %v8170_v47 = vld [vmem:[#allocation9_spill] sm:$0xff] }
 0x22d   :  { %v4280_v5 = vmax.f32 %v4252_v14, 0.0  ;;  %v8154_v9 = vrot.slane %v8153_v54, 4  ;;  %v4281_v0 = vmax.f32 %v4259_v32, 0.0  ;;  %v4282_v4 = vmax.f32 %v4266_v3, 0.0  ;;  %v8172_v19 = vld [vmem:[#allocation10_spill] sm:$0xff] }
 0x22e   :  { %v4829_v51 = vsel %vm4753_vm13, %v4724_v25, %v4828_v46  ;;  %v1566_v48 = vmax.f32 %v8152_v60, %v1565_v61  ;;  %v1633_v11 = vmax.f32 %v1545_v18, 0.0  ;;  %v1634_v45 = vmax.f32 %v1552_v8, 0.0 }
 0x22f   :  { %v1569_v24 = vmax.f32 %v8153_v54, %v8154_v9  ;;  %v4791_v43 = vsel %vm4749_vm11, %v4280_v5, %v4790_v2  ;;  %v1640_v58 = vmax.f32 %v8155_v63, 0.0  ;;  %v1635_v52 = vmax.f32 %v1559_v56, 0.0 }
 0x230   :  { %v4792_v10 = vsel %vm4751_vm12, %v4281_v0, %v4791_v43  ;;  %v8157_v40 = vmax.f32 %v8156_v62, 0.0  ;;  %v8159_v49 = vmax.f32 %v8158_v6, 0.0  ;;  %v1636_v16 = vmax.f32 %v1566_v48, 0.0  ;;  %v5849_v6 = vld [vmem:[%s8013_s11] sm:$0xff]  }
 0x231   :  { %v1570_v30 = vrot.slane %v1569_v24, 2  ;;  %v4793_v41 = vsel %vm4753_vm13, %v4282_v4, %v4792_v10  ;;  %v8161_v42 = vmax.f32 %v8160_v53, 0.0  ;;  %v8163_v36 = vrot.slane %v8162_v29, 1  ;;  %v5855_v53 = vld [vmem:[%s8013_s11 + $0x18] sm:$0xff]  }
 0x232   :  { %v4742_v55 = vsel %vm4741_vm7, %v8159_v49, %v8157_v40  ;;  %4796 = vrot.lane.b32.xlu1 %v4793_v41, %s5915_s26  ;;  %v8165_v17 = vrot.slane %v8164_v27, 1  ;;  %v1612_v39 = vrot.slane %v8166_v12, 2  ;;  %v1621_v35 = vrot.slane %v8167_v22, 1  ;;  %v5850_v49 = vld [vmem:[%s8015_s13] sm:$0xff]   ;;  %v5852_v41 = vld [vmem:[%s8015_s13 + $0x8] sm:$0xff]  }
 0x233   :  { %v1571_v20 = vmax.f32 %v1569_v24, %v1570_v30  ;;  %v4744_v15 = vsel %vm4743_vm8, %v8161_v42, %v4742_v55  ;;  %v1601_v37 = vmax.f32 %v8162_v29, %v8163_v36  ;;  %v8169_v50 = vrot.slane %v8168_v59, 4  ;;  %v5851_v55 = vld [vmem:[%s8013_s11 + $0x8] sm:$0xff]   ;;  %v5856_v42 = vld [vmem:[%s8015_s13 + $0x18] sm:$0xff]  }
 0x234   :  { %v4746_v44 = vsel %vm4745_vm9, %v1633_v11, %v4744_v15  ;;  %v1608_v31 = vmax.f32 %v8164_v27, %v8165_v17  ;;  %v1613_v26 = vmax.f32 %v8166_v12, %v1612_v39  ;;  %v1622_v28 = vmax.f32 %v8167_v22, %v1621_v35  ;;  %v5857_v15 = vld [vmem:[%s8013_s11 + $0x20] sm:$0xff]   ;;  %v5859_v29 = vld [vmem:[%s8013_s11 + $0x28] sm:$0xff]   ;;  %v5862_v27 = vld [vmem:[%s8015_s13 + $0x30] sm:$0xff]  }
 0x235   :  { %v1572_v57 = vrot.slane %v1571_v20, 1  ;;  %v4748_v33 = vsel %vm4747_vm10, %v1634_v45, %v4746_v44  ;;  %v1625_v13 = vmax.f32 %v8168_v59, %v8169_v50  ;;  %v1641_v21 = vmax.f32 %v1601_v37, 0.0  ;;  %v5858_v44 = vld [vmem:[%s8015_s13 + $0x20] sm:$0xff]   ;;  %v5860_v36 = vld [vmem:[%s8015_s13 + $0x28] sm:$0xff]   ;;  %v5861_v37 = vld [vmem:[%s8013_s11 + $0x30] sm:$0xff]  }
 0x236   :  { %v4750_v18 = vsel %vm4749_vm11, %v1635_v52, %v4748_v33  ;;  %v1642_v2 = vmax.f32 %v1608_v31, 0.0  ;;  %4832 = vrot.lane.b32.xlu1 %v4829_v51, %s5919_s21  ;;  %v1614_v7 = vrot.slane %v1613_v26, 1  ;;  %v8171_v8 = vmax.f32 %v8170_v47, 0.0  ;;  %v5863_v17 = vld [vmem:[%s8013_s11 + $0x38] sm:$0xff]   ;;  %v5539_v12 = vld [vmem:[%s8012_s10] ss:$0 sm:$0xff] }
 0x237   :  { %v1573_v25 = vmax.f32 %v1571_v20, %v1572_v57  ;;  %v4752_v23 = vsel %vm4751_vm12, %v1636_v16, %v4750_v18  ;;  %v1626_v14 = vrot.slane %v1625_v13, 2  ;;  %v8173_v38 = vmax.f32 %v8172_v19, 0.0  ;;  %v5853_v20 = vld [vmem:[%s8013_s11 + $0x10] sm:$0xff]   ;;  %v5864_v31 = vld [vmem:[%s8015_s13 + $0x38] sm:$0xff]  }
 0x238   :  { %v1615_v61 = vmax.f32 %v1613_v26, %v1614_v7  ;;  %v1644_v54 = vmax.f32 %v1622_v28, 0.0  ;;  %v5854_v16 = vld [vmem:[%s8015_s13 + $0x10] sm:$0xff]   ;;  %v5530_v7 = vld [vmem:[%s8010_s8] ss:$0 sm:$0xff] }
 0x239   :  { %v4755_v32 = vsel %vm4741_vm7, %v8173_v38, %v8171_v8  ;;  %v1637_v3 = vmax.f32 %v1573_v25, 0.0  ;;  %v1627_v1 = vmax.f32 %v1625_v13, %v1626_v14 }
 0x23a   :  { %v4756_v60 = vsel %vm4743_vm8, %v1640_v58, %v4755_v32  ;;  %v1643_v24 = vmax.f32 %v1615_v61, 0.0 }
 0x23b   :  { %v4757_v5 = vsel %vm4745_vm9, %v1641_v21, %v4756_v60  ;;  %v4754_v46 = vsel %vm4753_vm13, %v1637_v3, %v4752_v23  ;;  %v1628_v56 = vrot.slane %v1627_v1, 1 }
 0x23c   :  { %v4758_v9 = vsel %vm4747_vm10, %v1642_v2, %v4757_v5 }
 0x23d   :  { %v1629_v0 = vmax.f32 %v1627_v1, %v1628_v56  ;;  %v4759_v4 = vsel %vm4749_vm11, %v1643_v24, %v4758_v9 }
 0x23e   :  { %v4760_v48 = vsel %vm4751_vm12, %v1644_v54, %v4759_v4  ;;  %v5866_v4 = vld [vmem:[%s8017_s15 + $0x8] sm:$0xff]  }
 0x23f   :  { %v1645_v51 = vmax.f32 %v1629_v0, 0.0  ;;  %v5865_v0 = vld [vmem:[%s8017_s15] sm:$0xff]  }
 0x241   :  { %v4761_v43 = vsel %vm4753_vm13, %v1645_v51, %v4760_v48  ;;  %v5867_v51 = vld [vmem:[%s8017_s15 + $0x10] sm:$0xff]   ;;  %v5868_v48 = vld [vmem:[%s8017_s15 + $0x18] sm:$0xff]  }
 0x290   :  { %v4795_v30 = vpop.permute.xlu0 %4794 }
 0x291   :  { %v4836_v63 = vsel %vm2635_vm2, %v4754_v46, %v4795_v30  ;;  %v5870_v30 = vld [vmem:[%s8017_s15 + $0x28] sm:$0xff]  }
 0x294   :  { %v4831_v45 = vpop.permute.xlu0 %4830 }
 0x295   :  { %v7867_v52 = vsel %vm4838_vm14, %v4836_v63, %v4831_v45  ;;  %v5872_v45 = vld [vmem:[%s8017_s15 + $0x38] sm:$0xff]   ;;  %v5559_v63 = vld [vmem:[%s8016_s14] ss:$0 sm:$0xff] }
 0x2a4   :  { %v4797_v11 = vpop.permute.xlu1 %4796 }
 0x2a5   :  { %v4837_v58 = vsel %vm2635_vm2, %v4761_v43, %v4797_v11  ;;  %v5869_v43 = vld [vmem:[%s8017_s15 + $0x20] sm:$0xff]   ;;  %v5871_v11 = vld [vmem:[%s8017_s15 + $0x30] sm:$0xff]  }
 0x2a8   :  { %v4833_v10 = vpop.permute.xlu1 %4832 }
 0x2a9   :  { %v7869_v62 = vsel %vm4838_vm14, %v4837_v58, %v4833_v10 }
 0x2aa   :  { %v4841_v40 = vpack.c.bf16 %v7869_v62, %v7867_v52 }
 0x2ac   :  { %5714 = vmatmul.mubr.bf16.vlgmr.msra.gmra.mrb[16].mxu1 %v4841_v40  ;;  %5734 = vmatmul.mubr.bf16.vlgmr.msra.gmra.mrb[24].mxu0 %v4841_v40 }
 0x2ad   :  { %5753 = vmatprep.mubr.msk.bf16.mxu1 %vm5917_vm1, %v8126_v34  ;;  %5773 = vmatprep.mubr.msk.bf16.mxu0 %vm5917_vm1, %v8126_v34 }
 0x2ae   :  { %5738 = vmatpush3.bf16.msra.mxu1 %v5849_v6  ;;  %5758 = vmatpush3.bf16.msra.mxu0 %v5850_v49 }
 0x2af   :  { %5739 = vmatprep.subr.bf16.mxu1 %v8126_v34  ;;  %5759 = vmatprep.subr.bf16.mxu0 %v8126_v34 }
 0x2b2   :  { %5740 = vmatpush3.bf16.msra.mxu1 %v5851_v55  ;;  %5760 = vmatpush3.bf16.msra.mxu0 %v5852_v41 }
 0x2b3   :  { %5741 = vmatprep.subr.bf16.mxu1 %v8126_v34  ;;  %5761 = vmatprep.subr.bf16.mxu0 %v8126_v34 }
 0x2b6   :  { %5742 = vmatpush3.bf16.msra.mxu1 %v5853_v20  ;;  %5762 = vmatpush3.bf16.msra.mxu0 %v5854_v16 }
 0x2b7   :  { %5743 = vmatprep.subr.bf16.mxu1 %v8126_v34  ;;  %5763 = vmatprep.subr.bf16.mxu0 %v8126_v34 }
 0x2ba   :  { %5744 = vmatpush3.bf16.msra.mxu1 %v5855_v53  ;;  %5764 = vmatpush3.bf16.msra.mxu0 %v5856_v42 }
 0x2bb   :  { %5745 = vmatprep.subr.bf16.mxu1 %v8126_v34  ;;  %5765 = vmatprep.subr.bf16.mxu0 %v8126_v34 }
 0x2be   :  { %5746 = vmatpush3.bf16.msra.mxu1 %v5857_v15  ;;  %5766 = vmatpush3.bf16.msra.mxu0 %v5858_v44 }
 0x2bf   :  { %5747 = vmatprep.subr.bf16.mxu1 %v8126_v34  ;;  %5767 = vmatprep.subr.bf16.mxu0 %v8126_v34 }
 0x2c2   :  { %5748 = vmatpush3.bf16.msra.mxu1 %v5859_v29  ;;  %5768 = vmatpush3.bf16.msra.mxu0 %v5860_v36  ;;  %v5550_v29 = vld [vmem:[%s8014_s12] ss:$0 sm:$0xff]  ;;  %s5920_s12 = smov [#allocation2]  }
 0x2c3   :  { %5749 = vmatprep.subr.bf16.mxu1 %v8126_v34  ;;  %5769 = vmatprep.subr.bf16.mxu0 %v8126_v34  ;;  %s5455_s19 = sshll.u32 %s5920_s12, 4  ;;  %s5456_s19 = int_to_ptr.vmem [resolvable:$true] %s5455_s19 }
 0x2c4   :  { %s5889_s6 = scalar_lea.vmem %s5456_s19, 256  ;;  %p5894_p1 = scmp.lt.s32.totalorder %s5456_s19, %s5456_s19 }
 0x2c5   :  { %p5890_p0 = scmp.ne.s32.totalorder %s5456_s19, %s5889_s6  ;;  %p5895_p2 = scmp.lt.s32.totalorder %s5889_s6, %s5889_s6 }
 0x2c6   :  { %5750 = vmatpush3.bf16.msra.mxu1 %v5861_v37  ;;  %5770 = vmatpush3.bf16.msra.mxu0 %v5862_v27 }
 0x2c7   :  { %5751 = vmatprep.subr.bf16.mxu1 %v8126_v34  ;;  %5771 = vmatprep.subr.bf16.mxu0 %v8126_v34  ;;  %p5896_p3 = por %p5895_p2, %p5894_p1 }
 0x2c9   :  { %p5897_p4 = pnand %p5896_p3, %p5890_p0 }
 0x2ca   :  { %5752 = vmatpush3.bf16.msra.mxu1 %v5863_v17  ;;  %5772 = vmatpush3.bf16.msra.mxu0 %v5864_v31 }
 0x2cb   :  { %5777 = vmatprep.subr.bf16.mxu1 %v8126_v34 }
 0x37f   :  { %v4947_v39 = vpop.f32.mrb[16].mxu1  ;;  %v5061_v57 = vpop.f32.mrb[24].mxu0 }
 0x380   :  { %v5062_v33 = vadd.f32 %v5539_v12, %v5061_v57  ;;  %v5715_v22 = vpop.f32.mrb[17].mxu1  ;;  %v5735_v35 = vpop.f32.mrb[25].mxu0  ;;  %v4948_v47 = vadd.f32 %v5530_v7, %v4947_v39 }
 0x381   :  { %v4950_v59 = vpop.f32.mrb[18].mxu1  ;;  %v5064_v50 = vpop.f32.mrb[26].mxu0 }
 0x382   :  { %v5548_v13 = vmul.f32 -1.442695, %v5062_v33  ;;  %v5065_v18 = vadd.f32 %v5539_v12, %v5064_v50  ;;  %v5716_v26 = vpop.f32.mrb[19].mxu1  ;;  %v5736_v21 = vpop.f32.mrb[27].mxu0  ;;  %v4951_v8 = vadd.f32 %v5530_v7, %v4950_v59  ;;  %v4954_v38 = vmax.f32 %v4948_v47, 0.0 }
 0x383   :  { %v5570_v26 = vld [vmem:[%s8018_s16] ss:$0 sm:$0xff] }
 0x384   :  { %5873 = vpow2.f32 %v5548_v13  ;;  %v5549_v2 = vmul.f32 -1.442695, %v5065_v18  ;;  %v4955_v1 = vmax.f32 %v4951_v8, 0.0 }
 0x386   :  { %5875 = vpow2.f32 %v5549_v2 }
 0x38e   :  { %v5874_v25 = vpop.eup %5873 }
 0x38f   :  { %v5074_v23 = vadd.f32 1.0, %v5874_v25 }
 0x390   :  { %v5876_v28 = vpop.eup %5875 }
 0x391   :  { %5877 = vrcp.f32 %v5074_v23  ;;  %v5075_v14 = vadd.f32 1.0, %v5876_v28 }
 0x393   :  { %5879 = vrcp.f32 %v5075_v14 }
 0x39b   :  { %v5878_v19 = vpop.eup %5877 }
 0x39c   :  { %v5082_v32 = vsub.f32 1.0, %v5878_v19  ;;  %v5080_v60 = vmul.f32 %v5878_v19, %v7867_v52 }
 0x39d   :  { %v5880_v3 = vpop.eup %5879 }
 0x39e   :  { %v5083_v61 = vsub.f32 1.0, %v5880_v3  ;;  %v5084_v5 = vmul.f32 %v5082_v32, %v4954_v38  ;;  %v5081_v46 = vmul.f32 %v5880_v3, %v7869_v62 }
 0x3a0   :  { %v5085_v56 = vmul.f32 %v5083_v61, %v4955_v1  ;;  %v5086_v54 = vadd.f32 %v5084_v5, %v5080_v60 }
 0x3a2   :  { %v5087_v9 = vadd.f32 %v5085_v56, %v5081_v46 }
 0x3a4   :  { %v5088_v24 = vpack.c.bf16 %v5087_v9, %v5086_v54 }
 0x3a6   :  { %5754 = vmatmul.mubr.bf16.vlgmr.msra.gmra.mrb[20].mxu1 %v5088_v24  ;;  %5774 = vmatmul.mubr.bf16.vlgmr.msra.gmra.mrb[28].mxu0 %v5088_v24 }
 0x3a7   :  { %5793 = vmatprep.mubr.msk.bf16.mxu1 %vm5917_vm1, %v8126_v34  ;;  %5778 = vmatpush3.bf16.msra.mxu1 %v5865_v0 }
 0x3a8   :  { %5779 = vmatprep.subr.bf16.mxu1 %v8126_v34 }
 0x3ab   :  { %5780 = vmatpush3.bf16.msra.mxu1 %v5866_v4 }
 0x3ac   :  { %5781 = vmatprep.subr.bf16.mxu1 %v8126_v34 }
 0x3af   :  { %5782 = vmatpush3.bf16.msra.mxu1 %v5867_v51 }
 0x3b0   :  { %5783 = vmatprep.subr.bf16.mxu1 %v8126_v34 }
 0x3b3   :  { %5784 = vmatpush3.bf16.msra.mxu1 %v5868_v48 }
 0x3b4   :  { %5785 = vmatprep.subr.bf16.mxu1 %v8126_v34 }
 0x3b7   :  { %5786 = vmatpush3.bf16.msra.mxu1 %v5869_v43 }
 0x3b8   :  { %5787 = vmatprep.subr.bf16.mxu1 %v8126_v34 }
 0x3bb   :  { %5788 = vmatpush3.bf16.msra.mxu1 %v5870_v30 }
 0x3bc   :  { %5789 = vmatprep.subr.bf16.mxu1 %v8126_v34 }
 0x3bf   :  { %5790 = vmatpush3.bf16.msra.mxu1 %v5871_v11 }
 0x3c0   :  { %5791 = vmatprep.subr.bf16.mxu1 %v8126_v34 }
 0x3c3   :  { %5792 = vmatpush3.bf16.msra.mxu1 %v5872_v45 }
 0x479   :  { %v5194_v58 = vpop.f32.mrb[20].mxu1  ;;  %v5308_v10 = vpop.f32.mrb[28].mxu0 }
 0x47a   :  { %v5309_v52 = vadd.f32 %v5559_v63, %v5308_v10  ;;  %v5755_v62 = vpop.f32.mrb[21].mxu1  ;;  %v5775_v40 = vpop.f32.mrb[29].mxu0  ;;  %v5195_v36 = vadd.f32 %v5550_v29, %v5194_v58 }
 0x47b   :  { %v5197_v6 = vpop.f32.mrb[22].mxu1  ;;  %v5311_v49 = vpop.f32.mrb[30].mxu0 }
 0x47c   :  { %v5568_v55 = vmul.f32 -1.442695, %v5309_v52  ;;  %v5312_v41 = vadd.f32 %v5559_v63, %v5311_v49  ;;  %v5756_v20 = vpop.f32.mrb[23].mxu1  ;;  %v5776_v16 = vpop.f32.mrb[31].mxu0  ;;  %v5198_v37 = vadd.f32 %v5550_v29, %v5197_v6  ;;  %v5201_v17 = vmax.f32 %v5195_v36, 0.0 }
 0x47e   :  { %5881 = vpow2.f32 %v5568_v55  ;;  %v5569_v53 = vmul.f32 -1.442695, %v5312_v41  ;;  %v5202_v39 = vmax.f32 %v5198_v37, 0.0 }
 0x480   :  { %5883 = vpow2.f32 %v5569_v53 }
 0x488   :  { %v5882_v34 = vpop.eup %5881 }
 0x489   :  { %v5321_v42 = vadd.f32 1.0, %v5882_v34 }
 0x48a   :  { %v5884_v15 = vpop.eup %5883 }
 0x48b   :  { %5885 = vrcp.f32 %v5321_v42  ;;  %v5322_v44 = vadd.f32 1.0, %v5884_v15 }
 0x48d   :  { %5887 = vrcp.f32 %v5322_v44 }
 0x495   :  { %v5886_v27 = vpop.eup %5885 }
 0x496   :  { %v5329_v31 = vsub.f32 1.0, %v5886_v27  ;;  %v5327_v57 = vmul.f32 %v5886_v27, %v5086_v54 }
 0x497   :  { %v5888_v12 = vpop.eup %5887 }
 0x498   :  { %v5330_v33 = vsub.f32 1.0, %v5888_v12  ;;  %v5331_v22 = vmul.f32 %v5329_v31, %v5201_v17  ;;  %v5328_v35 = vmul.f32 %v5888_v12, %v5087_v9 }
 0x49a   :  { %v5332_v59 = vmul.f32 %v5330_v33, %v5202_v39  ;;  %v5333_v50 = vadd.f32 %v5331_v22, %v5327_v57 }
 0x49c   :  { %v5334_v13 = vadd.f32 %v5332_v59, %v5328_v35 }
 0x49e   :  { %v5335_v18 = vpack.c.bf16 %v5334_v13, %v5333_v50 }
 0x4a0   :  { %5794 = vmatmul.mubr.bf16.vlgmr.msra.gmra.mrb[24].mxu1 %v5335_v18 }
 0x573   :  { %v5441_v21 = vpop.f32.mrb[24].mxu1 }
 0x574   :  { %v5442_v2 = vadd.f32 %v5570_v26, %v5441_v21  ;;  %v5795_v25 = vpop.f32.mrb[25].mxu1 }
 0x575   :  { %v5444_v23 = vpop.f32.mrb[26].mxu1 }
 0x576   :  { %5448 = vst [vmem:[#allocation2] sm:$0xff] %v5442_v2  ;;  %v5445_v28 = vadd.f32 %v5570_v26, %v5444_v23  ;;  %v5796_v14 = vpop.f32.mrb[27].mxu1 }
 0x578   :  { %5449 = vst [vmem:[#allocation2 + $0x8] sm:$0xff] %v5445_v28 }
 0x579   :  { %5900 = shalt.err (!%p5897_p4)
}
 0x57a   :  { %s5901_s1 = scalar_lea.hbm %s8019_s17, 256 }
 0x57b   :  { %p5902_p5 = scmp.ne.s32.totalorder %s8019_s17, %s5901_s1  ;;  %p5905_p6 = scmp.lt.u32.totalorder %s5901_s1, %s8019_s17 }
 0x57d   :  { %p5907_p7 = pnand %p5905_p6, %p5902_p5 }
 0x57f   :  { %5910 = shalt.err (!%p5907_p7)
}
 0x580   :  { %s5921_s20 = smov 128   ;;  %s5922_s21 = smov 8  }
 0x581   :  { %5461 = dma.vmem_to_hbm [thread:$0]  %s5456_s19, 256, %s8019_s17, [#allocation3], %s5921_s20, %s5921_s20, %s5922_s21  }
 0x582   :  { %5911 = dma.done.wait [#allocation3], 256  }
 0x583   :  { %5912 = vsyncadd [#allocation3], 4294967040 }
 0x584   :  { %5465 = vsyncpa [#allocation3], 1 }

</bundles_post_ra>
